<compile_context>
chip_gen: v5e
topology: v5e:2x2
jax: 0.10.0
libtpu: 0.0.40
codegen_flags: <defaults>
</compile_context>

<pallas_src>
import functools

import jax
import jax.numpy as jnp
from jax.experimental import pallas as pl
from jax.experimental.pallas import tpu as pltpu

LN_EPS = 1e-5          # torch.nn.LayerNorm / TransformerEncoderLayer default
PAD_IDX = 0
ORDERING_PAD_IDX = 1023
NEG_INF = -1e9

MODALITY_MAPPING = {"lang": 1, "vis": 2, "action": 3, "intent": 4}


def _layernorm(x, g, b):
    mu = jnp.mean(x, axis=-1, keepdims=True)
    var = jnp.mean((x - mu) ** 2, axis=-1, keepdims=True)
    return (x - mu) * jax.lax.rsqrt(var + LN_EPS) * g + b


# ----------------------------------------------------------------------------
# Fused Pallas kernel: input LayerNorm + N x TransformerEncoderLayer (post-LN, relu)
# Single grid step; batch folded onto the sublane axis; all layers unrolled; activations
# stay in VMEM/vregs for the whole stack.
# ----------------------------------------------------------------------------
def _fused_encoder_kernel(len_ref,                      # scalar prefetch: [B] int32 (SMEM)
                          x_ref,                        # [B*T, D] f32  (emb + pos, flattened)
                          encg_ref, encb_ref,           # [1, D] input LayerNorm
                          wqkv_ref, bqkv_ref,           # [L, D, 3D] bf16, [L, 1, 3D] f32
                          wo_ref, bo_ref,               # [L, D, D] bf16, [L, 1, D] f32
                          ln1g_ref, ln1b_ref,           # [L, 1, D] f32
                          w1_ref, b1_ref,               # [L, D, Dff] bf16, [L, 1, Dff] f32
                          w2_ref, b2_ref,               # [L, Dff, D] bf16, [L, 1, D] f32
                          ln2g_ref, ln2b_ref,           # [L, 1, D] f32
                          o_ref,                        # [B*T, D] f32
                          *, num_heads, num_layers, batch, seq_len):
    x = x_ref[...]                                      # [B*T, D] f32
    D = x.shape[-1]
    H = num_heads
    hd = D // H
    T = seq_len
    B = batch

    # Key-padding additive bias per batch element, built from prefetched lengths and
    # hoisted out of the layer loop.  NOTE: valid_len == 0 would make every key masked;
    # the max-subtraction then cancels the bias and softmax attends uniformly to padded
    # positions (instead of producing NaN like PyTorch) -- documented edge case.
    col = jax.lax.broadcasted_iota(jnp.int32, (1, T), 1)
    key_bias = [jnp.where(col >= len_ref[b], NEG_INF, 0.0).astype(jnp.float32)
                for b in range(B)]                      # B x [1, T]

    # Input LayerNorm (dropout = identity in eval mode).
    x = _layernorm(x, encg_ref[...], encb_ref[...])

    for l in range(num_layers):                         # static unroll (L is small)
        # ---- fused QKV projection, all heads & all batch rows at once ----
        qkv = jnp.dot(x.astype(jnp.bfloat16), wqkv_ref[l],
                      preferred_element_type=jnp.float32) + bqkv_ref[l]     # [B*T, 3D]

        # ---- per-(batch, head) attention (scores are inherently per-batch) ----
        ctx_rows = []
        for b in range(B):                              # static, B is tiny
            r0 = b * T
            bias = key_bias[b]                          # [1, T]
            head_ctx = []
            for h in range(H):                          # static, per-head hd-wide dots
                c0 = h * hd
                q_h = qkv[r0:r0 + T, c0:c0 + hd]                      # [T, hd] (scale folded)
                k_h = qkv[r0:r0 + T, D + c0:D + c0 + hd]              # [T, hd]
                v_h = qkv[r0:r0 + T, 2 * D + c0:2 * D + c0 + hd]      # [T, hd]
                s = jax.lax.dot_general(q_h, k_h, (((1,), (1,)), ((), ())),
                                        preferred_element_type=jnp.float32)   # [T, T]
                s = s + bias
                s = s - jnp.max(s, axis=-1, keepdims=True)
                p = jnp.exp(s)
                p = p * pl.reciprocal(jnp.sum(p, axis=-1, keepdims=True), approx=True)
                head_ctx.append(jnp.dot(p, v_h, preferred_element_type=jnp.float32))
            ctx_rows.append(jnp.concatenate(head_ctx, axis=-1))        # [T, D]
        ctx = jnp.concatenate(ctx_rows, axis=0)                        # [B*T, D]

        # ---- fused output projection (single [B*T, D] @ [D, D]) ----
        attn = jnp.dot(ctx.astype(jnp.bfloat16), wo_ref[l],
                       preferred_element_type=jnp.float32) + bo_ref[l]

        # ---- residual + LayerNorm 1 ----
        y = _layernorm(x + attn, ln1g_ref[l], ln1b_ref[l])

        # ---- FFN: relu(y @ W1 + b1) @ W2 + b2, residual + LayerNorm 2 ----
        h1 = jnp.maximum(
            jnp.dot(y.astype(jnp.bfloat16), w1_ref[l],
                    preferred_element_type=jnp.float32) + b1_ref[l], 0.0)
        h2 = jnp.dot(h1.astype(jnp.bfloat16), w2_ref[l],
                     preferred_element_type=jnp.float32) + b2_ref[l]
        x = _layernorm(y + h2, ln2g_ref[l], ln2b_ref[l])

    o_ref[...] = x


def fused_encoder(sp, x0_flat, lengths, num_heads, num_layers, batch, seq_len):
    BT, D = x0_flat.shape
    L = num_layers
    Dff = sp["w1"].shape[-1]

    def full(shape):
        return pl.BlockSpec(shape, lambda i, lens: (0,) * len(shape))

    kernel = functools.partial(_fused_encoder_kernel, num_heads=num_heads,
                               num_layers=L, batch=batch, seq_len=seq_len)
    return pl.pallas_call(
        kernel,
        out_shape=jax.ShapeDtypeStruct((BT, D), jnp.float32),
        grid_spec=pltpu.PrefetchScalarGridSpec(
            num_scalar_prefetch=1,
            grid=(1,),
            in_specs=[
                full((BT, D)),                                       # x0 (flattened)
                full((1, D)), full((1, D)),                          # input LN gamma/beta
                full((L, D, 3 * D)), full((L, 1, 3 * D)),            # fused QKV (all heads)
                full((L, D, D)), full((L, 1, D)),                    # out-proj + bias
                full((L, 1, D)), full((L, 1, D)),                    # LN1 gamma/beta
                full((L, D, Dff)), full((L, 1, Dff)),                # FFN W1/b1
                full((L, Dff, D)), full((L, 1, D)),                  # FFN W2/b2
                full((L, 1, D)), full((L, 1, D)),                    # LN2 gamma/beta
            ],
            out_specs=full((BT, D)),
        ),
        compiler_params=pltpu.CompilerParams(
            dimension_semantics=("arbitrary",),
            vmem_limit_bytes=32 * 1024 * 1024),
    )(lengths, x0_flat,
      sp["enc_ln_g"], sp["enc_ln_b"],
      sp["wqkv"], sp["bqkv"], sp["wo"], sp["bo"],
      sp["ln1_g"], sp["ln1_b"], sp["w1"], sp["b1"], sp["w2"], sp["b2"],
      sp["ln2_g"], sp["ln2_b"])


# ----------------------------------------------------------------------------
# Parameter init (deterministic, synthetic, torch-like layout)
# ----------------------------------------------------------------------------
def init_params(key, demb, num_heads, num_layers):
    def nrm(k, shape, s=0.02):
        return (s * jax.random.normal(k, shape)).astype(jnp.float32)

    keys = jax.random.split(key, 3 + num_layers)
    params = {
        # LearnedEncoding(demb, 5) -- modality encoding
        "modality_table": (0.1 * jax.random.uniform(keys[0], (5, demb),
                                                    minval=-1.0, maxval=1.0)).astype(jnp.float32),
        # LearnedEncoding(demb, 1024, padding_idx=1023) -- positional encoding
        "pos_table": (0.1 * jax.random.uniform(keys[1], (ORDERING_PAD_IDX + 1, demb),
                                               minval=-1.0, maxval=1.0)
                      ).astype(jnp.float32).at[ORDERING_PAD_IDX].set(0.0),
        # input LayerNorm
        "enc_ln_g": jnp.ones((1, demb), jnp.float32),
        "enc_ln_b": jnp.zeros((1, demb), jnp.float32),
        "layers": [],
    }
    dff = demb  # dim_feedforward = args.demb
    for li in range(num_layers):
        lk = jax.random.split(keys[3 + li], 12)
        params["layers"].append({
            "wq": nrm(lk[0], (demb, demb)), "wk": nrm(lk[1], (demb, demb)),
            "wv": nrm(lk[2], (demb, demb)), "wo": nrm(lk[3], (demb, demb)),
            "bq": nrm(lk[6], (1, demb)), "bk": nrm(lk[7], (1, demb)),
            "bv": nrm(lk[8], (1, demb)), "bo": nrm(lk[9], (1, demb)),
            "ln1_g": jnp.ones((1, demb), jnp.float32), "ln1_b": jnp.zeros((1, demb), jnp.float32),
            "w1": nrm(lk[4], (demb, dff)), "b1": nrm(lk[10], (1, dff)),
            "w2": nrm(lk[5], (dff, demb)), "b2": nrm(lk[11], (1, demb)),
            "ln2_g": jnp.ones((1, demb), jnp.float32), "ln2_b": jnp.zeros((1, demb), jnp.float32),
        })
    return params


def prepare_kernel_params(params, num_heads):
    """Stack per-layer weights [L, ...], fuse QKV across heads into [L, D, 3D], fold
    1/sqrt(hd) into wq/bq, and cast matmul weights to bf16 (biases/LN stay f32)."""
    demb = params["enc_ln_g"].shape[-1]
    hd = demb // num_heads
    scale = 1.0 / float(hd) ** 0.5

    wqkv, bqkv, wo, bo = [], [], [], []
    ln1g, ln1b, w1, b1, w2, b2, ln2g, ln2b = [], [], [], [], [], [], [], []
    for lp in params["layers"]:
        wqkv.append(jnp.concatenate([lp["wq"] * scale, lp["wk"], lp["wv"]], axis=-1))  # [D, 3D]
        bqkv.append(jnp.concatenate([lp["bq"] * scale, lp["bk"], lp["bv"]], axis=-1))  # [1, 3D]
        wo.append(lp["wo"])                                                            # [D, D]
        bo.append(lp["bo"])
        ln1g.append(lp["ln1_g"]); ln1b.append(lp["ln1_b"])
        w1.append(lp["w1"]); b1.append(lp["b1"])
        w2.append(lp["w2"]); b2.append(lp["b2"])
        ln2g.append(lp["ln2_g"]); ln2b.append(lp["ln2_b"])

    stk = lambda xs: jnp.stack(xs, axis=0)
    return {
        "enc_ln_g": params["enc_ln_g"], "enc_ln_b": params["enc_ln_b"],
        "wqkv": stk(wqkv).astype(jnp.bfloat16), "bqkv": stk(bqkv).astype(jnp.float32),
        "wo": stk(wo).astype(jnp.bfloat16), "bo": stk(bo).astype(jnp.float32),
        "ln1_g": stk(ln1g), "ln1_b": stk(ln1b),
        "w1": stk(w1).astype(jnp.bfloat16), "b1": stk(b1),
        "w2": stk(w2).astype(jnp.bfloat16), "b2": stk(b2),
        "ln2_g": stk(ln2g), "ln2_b": stk(ln2b),
    }


# ----------------------------------------------------------------------------
# Forward pass mirroring MultiModalTransformer.forward
# ----------------------------------------------------------------------------
def multimodal_transformer_forward(params, kparams, input_embeddings, input_lengths,
                                   input_orderings, num_heads, num_layers):
    # (1) modality encoding + concat (XLA glue)
    emb_inputs = []
    for modality_name, emb in input_embeddings:
        mod_id = MODALITY_MAPPING[modality_name]
        emb_inputs.append(emb + params["modality_table"][mod_id][None, None, :])
    emb_inputs = jnp.concatenate(emb_inputs, axis=1)          # [B, T, D]

    # (2) orderings: pad idx 0 -> 1023, gather positional embeddings (row 1023 is zero)
    orderings = jnp.concatenate(input_orderings, axis=1)      # [B, T] int32
    orderings = jnp.where(orderings == PAD_IDX, ORDERING_PAD_IDX, orderings)
    pos = params["pos_table"][orderings]                      # [B, T, D]
    x0 = (emb_inputs + pos).astype(jnp.float32)

    B, T, D = x0.shape
    lengths = input_lengths.astype(jnp.int32)

    # (3) dropout(identity) + input LayerNorm + full encoder stack -> ONE fused Pallas call.
    #     Batch is folded onto the sublane axis ([B*T, D]) in the wrapper so the kernel
    #     block is full and no in-kernel reshape is needed.
    x0_flat = x0.reshape(B * T, D)
    out = fused_encoder(kparams, x0_flat, lengths, num_heads, num_layers, B, T).reshape(B, T, D)

    # (4) padding mask: True = padded position (torch src_key_padding_mask convention)
    mask_pad = jnp.arange(T)[None, :] >= lengths[:, None]     # [B, T] bool
    return out, mask_pad


# ----------------------------------------------------------------------------
# Pure-JAX reference of the fused encoder (mirrors the kernel's bf16 weight rounding
# and activation casts; exact softmax division instead of approx reciprocal).
# ----------------------------------------------------------------------------
def reference_encoder(kp, x0_flat, lengths, num_heads, num_layers, batch, seq_len):
    D = x0_flat.shape[-1]
    H, T, B, L = num_heads, seq_len, batch, num_layers
    hd = D // H
    f32 = lambda a: a.astype(jnp.float32)
    bf = lambda a: a.astype(jnp.bfloat16).astype(jnp.float32)

    x = _layernorm(x0_flat, kp["enc_ln_g"], kp["enc_ln_b"])
    col = jnp.arange(T)[None, :]
    for l in range(L):
        qkv = bf(x) @ f32(kp["wqkv"][l]) + kp["bqkv"][l]
        rows = []
        for b in range(B):
            r0 = b * T
            bias = jnp.where(col >= lengths[b], NEG_INF, 0.0).astype(jnp.float32)
            heads = []
            for h in range(H):
                c0 = h * hd
                q = qkv[r0:r0 + T, c0:c0 + hd]
                k = qkv[r0:r0 + T, D + c0:D + c0 + hd]
                v = qkv[r0:r0 + T, 2 * D + c0:2 * D + c0 + hd]
                p = jax.nn.softmax(q @ k.T + bias, axis=-1)
                heads.append(p @ v)
            rows.append(jnp.concatenate(heads, axis=-1))
        ctx = jnp.concatenate(rows, axis=0)
        attn = bf(ctx) @ f32(kp["wo"][l]) + kp["bo"][l]
        y = _layernorm(x + attn, kp["ln1_g"][l], kp["ln1_b"][l])
        h1 = jnp.maximum(bf(y) @ f32(kp["w1"][l]) + kp["b1"][l], 0.0)
        h2 = bf(h1) @ f32(kp["w2"][l]) + kp["b2"][l]
        x = _layernorm(y + h2, kp["ln2_g"][l], kp["ln2_b"][l])
    return x


# ----------------------------------------------------------------------------
# Main
# ----------------------------------------------------------------------------
if __name__ == "__main__":
    B = 2
    DEMB = 32
    HEADS = 4
    LAYERS = 2
    mod_lens = {"lang": 6, "vis": 5, "action": 4, "intent": 1}   # T = 16 total
    T = sum(mod_lens.values())

    root = jax.random.PRNGKey(0)
    pkey, dkey = jax.random.split(root)
    params = init_params(pkey, DEMB, HEADS, LAYERS)
    kparams = prepare_kernel_params(params, HEADS)

    # per-modality embeddings
    input_embeddings = []
    dkeys = jax.random.split(dkey, len(mod_lens))
    for k, (name, L) in zip(dkeys, mod_lens.items()):
        emb = jax.random.normal(k, (B, L, DEMB), dtype=jnp.float32)
        input_embeddings.append((name, emb))

    # total valid length per batch element (sample 1 has 4 padded trailing tokens)
    input_lengths = jnp.array([16, 12], dtype=jnp.int32)

    # per-modality orderings (0 = pad, replaced by 1023 inside forward)
    base = jnp.arange(1, T + 1, dtype=jnp.int32)[None, :].repeat(B, axis=0)   # [B, T]
    valid = jnp.arange(T)[None, :] < input_lengths[:, None]
    full_ord = jnp.where(valid, base, 0)
    input_orderings, off = [], 0
    for name, L in mod_lens.items():
        input_orderings.append(full_ord[:, off:off + L])
        off += L

    out, mask_pad = multimodal_transformer_forward(
        params, kparams, input_embeddings, input_lengths, input_orderings, HEADS, LAYERS)
    out = jax.block_until_ready(out)
    mask_pad = jax.block_until_ready(mask_pad)

    assert out.shape == (B, T, DEMB) and mask_pad.shape == (B, T)
    assert bool(jnp.all(jnp.isfinite(out)))

    # numerical check against a pure-JAX reference (loose tol: approx reciprocal + bf16)
    emb_cat = jnp.concatenate(
        [e + params["modality_table"][MODALITY_MAPPING[n]][None, None, :]
         for n, e in input_embeddings], axis=1)
    ords = jnp.concatenate(input_orderings, axis=1)
    ords = jnp.where(ords == PAD_IDX, ORDERING_PAD_IDX, ords)
    x0_flat = (emb_cat + params["pos_table"][ords]).astype(jnp.float32).reshape(B * T, DEMB)
    ref = reference_encoder(kparams, x0_flat, input_lengths, HEADS, LAYERS, B, T)
    ref = jax.block_until_ready(ref).reshape(B, T, DEMB)
    max_err = float(jnp.max(jnp.abs(out - ref)))
    assert max_err < 3e-2, f"kernel/reference mismatch: max abs err {max_err}"

    print("KERNEL_OK")
</pallas_src>

<mosaic_0001>
module attributes {stable_mosaic.version = 11 : i64} {
  func.func @_fused_encoder_kernel(%arg0: i32, %arg1: memref<2xi32, #tpu.memory_space<smem>>, %arg2: memref<32x32xf32, #tpu.memory_space<vmem>>, %arg3: memref<1x32xf32, #tpu.memory_space<vmem>>, %arg4: memref<1x32xf32, #tpu.memory_space<vmem>>, %arg5: memref<2x32x96xbf16, #tpu.memory_space<vmem>>, %arg6: memref<2x1x96xf32, #tpu.memory_space<vmem>>, %arg7: memref<2x32x32xbf16, #tpu.memory_space<vmem>>, %arg8: memref<2x1x32xf32, #tpu.memory_space<vmem>>, %arg9: memref<2x1x32xf32, #tpu.memory_space<vmem>>, %arg10: memref<2x1x32xf32, #tpu.memory_space<vmem>>, %arg11: memref<2x32x32xbf16, #tpu.memory_space<vmem>>, %arg12: memref<2x1x32xf32, #tpu.memory_space<vmem>>, %arg13: memref<2x32x32xbf16, #tpu.memory_space<vmem>>, %arg14: memref<2x1x32xf32, #tpu.memory_space<vmem>>, %arg15: memref<2x1x32xf32, #tpu.memory_space<vmem>>, %arg16: memref<2x1x32xf32, #tpu.memory_space<vmem>>, %arg17: memref<32x32xf32, #tpu.memory_space<vmem>>) attributes {dimension_semantics = [#tpu.dimension_semantics<arbitrary>], iteration_bounds = array<i64: 1>, scalar_prefetch = 1 : i64, scratch_operands = 0 : i64, tpu.core_type = #tpu.core_type<tc>, window_params = [{pipeline_mode = #tpu.pipeline_mode<synchronous>, transform_indices = @transform_0, window_bounds = array<i64: 32, 32>}, {pipeline_mode = #tpu.pipeline_mode<synchronous>, transform_indices = @transform_1, window_bounds = array<i64: 1, 32>}, {pipeline_mode = #tpu.pipeline_mode<synchronous>, transform_indices = @transform_2, window_bounds = array<i64: 1, 32>}, {pipeline_mode = #tpu.pipeline_mode<synchronous>, transform_indices = @transform_3, window_bounds = array<i64: 2, 32, 96>}, {pipeline_mode = #tpu.pipeline_mode<synchronous>, transform_indices = @transform_4, window_bounds = array<i64: 2, 1, 96>}, {pipeline_mode = #tpu.pipeline_mode<synchronous>, transform_indices = @transform_5, window_bounds = array<i64: 2, 32, 32>}, {pipeline_mode = #tpu.pipeline_mode<synchronous>, transform_indices = @transform_6, window_bounds = array<i64: 2, 1, 32>}, {pipeline_mode = #tpu.pipeline_mode<synchronous>, transform_indices = @transform_7, window_bounds = array<i64: 2, 1, 32>}, {pipeline_mode = #tpu.pipeline_mode<synchronous>, transform_indices = @transform_8, window_bounds = array<i64: 2, 1, 32>}, {pipeline_mode = #tpu.pipeline_mode<synchronous>, transform_indices = @transform_9, window_bounds = array<i64: 2, 32, 32>}, {pipeline_mode = #tpu.pipeline_mode<synchronous>, transform_indices = @transform_10, window_bounds = array<i64: 2, 1, 32>}, {pipeline_mode = #tpu.pipeline_mode<synchronous>, transform_indices = @transform_11, window_bounds = array<i64: 2, 32, 32>}, {pipeline_mode = #tpu.pipeline_mode<synchronous>, transform_indices = @transform_12, window_bounds = array<i64: 2, 1, 32>}, {pipeline_mode = #tpu.pipeline_mode<synchronous>, transform_indices = @transform_13, window_bounds = array<i64: 2, 1, 32>}, {pipeline_mode = #tpu.pipeline_mode<synchronous>, transform_indices = @transform_14, window_bounds = array<i64: 2, 1, 32>}, {pipeline_mode = #tpu.pipeline_mode<synchronous>, transform_indices = @transform_15, window_bounds = array<i64: 32, 32>}]} {
    %c0 = arith.constant 0 : index
    %c0_0 = arith.constant 0 : index
    %0 = vector.load %arg2[%c0, %c0_0] : memref<32x32xf32, #tpu.memory_space<vmem>>, vector<32x32xf32>
    %1 = tpu.iota {dimensions = array<i32: 1>} : vector<1x16xi32>
    %c0_1 = arith.constant 0 : index
    %2 = memref.load %arg1[%c0_1] : memref<2xi32, #tpu.memory_space<smem>>
    %3 = vector.broadcast %2 : i32 to vector<1x16xi32>
    %4 = arith.cmpi sge, %1, %3 : vector<1x16xi32>
    %cst = arith.constant -1.000000e+09 : f32
    %cst_2 = arith.constant 0.000000e+00 : f32
    %5 = vector.broadcast %cst : f32 to vector<1x16xf32>
    %6 = vector.broadcast %cst_2 : f32 to vector<1x16xf32>
    %7 = arith.select %4, %5, %6 : vector<1x16xi1>, vector<1x16xf32>
    %c1 = arith.constant 1 : index
    %8 = memref.load %arg1[%c1] : memref<2xi32, #tpu.memory_space<smem>>
    %9 = vector.broadcast %8 : i32 to vector<1x16xi32>
    %10 = arith.cmpi sge, %1, %9 : vector<1x16xi32>
    %cst_3 = arith.constant -1.000000e+09 : f32
    %cst_4 = arith.constant 0.000000e+00 : f32
    %11 = vector.broadcast %cst_3 : f32 to vector<1x16xf32>
    %12 = vector.broadcast %cst_4 : f32 to vector<1x16xf32>
    %13 = arith.select %10, %11, %12 : vector<1x16xi1>, vector<1x16xf32>
    %c0_5 = arith.constant 0 : index
    %c0_6 = arith.constant 0 : index
    %14 = vector.load %arg3[%c0_5, %c0_6] : memref<1x32xf32, #tpu.memory_space<vmem>>, vector<1x32xf32>
    %c0_7 = arith.constant 0 : index
    %c0_8 = arith.constant 0 : index
    %15 = vector.load %arg4[%c0_7, %c0_8] : memref<1x32xf32, #tpu.memory_space<vmem>>, vector<1x32xf32>
    %cst_9 = arith.constant dense<0.000000e+00> : vector<32xf32>
    %16 = vector.multi_reduction <add>, %0, %cst_9 [1] : vector<32x32xf32> to vector<32xf32>
    %17 = vector.shape_cast %16 : vector<32xf32> to vector<32x1xf32>
    %cst_10 = arith.constant 3.200000e+01 : f32
    %18 = vector.broadcast %cst_10 : f32 to vector<32x1xf32>
    %19 = arith.divf %17, %18 : vector<32x1xf32>
    %20 = vector.broadcast %19 : vector<32x1xf32> to vector<32x32xf32>
    %21 = arith.subf %0, %20 : vector<32x32xf32>
    %22 = arith.mulf %21, %21 : vector<32x32xf32>
    %cst_11 = arith.constant dense<0.000000e+00> : vector<32xf32>
    %23 = vector.multi_reduction <add>, %22, %cst_11 [1] : vector<32x32xf32> to vector<32xf32>
    %24 = vector.shape_cast %23 : vector<32xf32> to vector<32x1xf32>
    %cst_12 = arith.constant 3.200000e+01 : f32
    %25 = vector.broadcast %cst_12 : f32 to vector<32x1xf32>
    %26 = arith.divf %24, %25 : vector<32x1xf32>
    %27 = vector.broadcast %19 : vector<32x1xf32> to vector<32x32xf32>
    %28 = arith.subf %0, %27 : vector<32x32xf32>
    %cst_13 = arith.constant 9.99999974E-6 : f32
    %29 = vector.broadcast %cst_13 : f32 to vector<32x1xf32>
    %30 = arith.addf %26, %29 : vector<32x1xf32>
    %31 = math.rsqrt %30 : vector<32x1xf32>
    %32 = vector.broadcast %31 : vector<32x1xf32> to vector<32x32xf32>
    %33 = arith.mulf %28, %32 : vector<32x32xf32>
    %34 = vector.broadcast %14 : vector<1x32xf32> to vector<32x32xf32>
    %35 = arith.mulf %33, %34 : vector<32x32xf32>
    %36 = vector.broadcast %15 : vector<1x32xf32> to vector<32x32xf32>
    %37 = arith.addf %35, %36 : vector<32x32xf32>
    %38 = arith.truncf %37 : vector<32x32xf32> to vector<32x32xbf16>
    %c0_14 = arith.constant 0 : index
    %c0_15 = arith.constant 0 : index
    %c0_16 = arith.constant 0 : index
    %39 = vector.load %arg5[%c0_14, %c0_15, %c0_16] : memref<2x32x96xbf16, #tpu.memory_space<vmem>>, vector<1x32x96xbf16>
    %40 = vector.shape_cast %39 : vector<1x32x96xbf16> to vector<32x96xbf16>
    %cst_17 = arith.constant dense<0.000000e+00> : vector<32x96xf32>
    %41 = tpu.matmul %38, %40, %cst_17 {dimension_numbers = #tpu.dot_dimension_numbers<[1], [0], [0], [1], [0, 0, 1, 1], [], []>} : vector<32x32xbf16>, vector<32x96xbf16>, vector<32x96xf32> -> vector<32x96xf32>
    %c0_18 = arith.constant 0 : index
    %c0_19 = arith.constant 0 : index
    %c0_20 = arith.constant 0 : index
    %42 = vector.load %arg6[%c0_18, %c0_19, %c0_20] : memref<2x1x96xf32, #tpu.memory_space<vmem>>, vector<1x1x96xf32>
    %43 = vector.shape_cast %42 : vector<1x1x96xf32> to vector<1x96xf32>
    %44 = vector.broadcast %43 : vector<1x96xf32> to vector<32x96xf32>
    %45 = arith.addf %41, %44 : vector<32x96xf32>
    %46 = vector.extract_strided_slice %45 {offsets = [0, 0], sizes = [16, 8], strides = [1, 1]} : vector<32x96xf32> to vector<16x8xf32>
    %47 = vector.extract_strided_slice %45 {offsets = [0, 32], sizes = [16, 8], strides = [1, 1]} : vector<32x96xf32> to vector<16x8xf32>
    %48 = vector.extract_strided_slice %45 {offsets = [0, 64], sizes = [16, 8], strides = [1, 1]} : vector<32x96xf32> to vector<16x8xf32>
    %cst_21 = arith.constant dense<0.000000e+00> : vector<16x16xf32>
    %49 = tpu.matmul %46, %47, %cst_21 {dimension_numbers = #tpu.dot_dimension_numbers<[1], [1], [0], [0], [0, 0, 1, 0], [], []>} : vector<16x8xf32>, vector<16x8xf32>, vector<16x16xf32> -> vector<16x16xf32>
    %50 = vector.broadcast %7 : vector<1x16xf32> to vector<16x16xf32>
    %51 = arith.addf %49, %50 : vector<16x16xf32>
    %cst_22 = arith.constant dense<0xFF800000> : vector<16xf32>
    %52 = vector.multi_reduction <maximumf>, %51, %cst_22 [1] : vector<16x16xf32> to vector<16xf32>
    %53 = vector.shape_cast %52 : vector<16xf32> to vector<16x1xf32>
    %54 = vector.broadcast %53 : vector<16x1xf32> to vector<16x16xf32>
    %55 = arith.subf %51, %54 : vector<16x16xf32>
    %56 = math.exp %55 : vector<16x16xf32>
    %cst_23 = arith.constant dense<0.000000e+00> : vector<16xf32>
    %57 = vector.multi_reduction <add>, %56, %cst_23 [1] : vector<16x16xf32> to vector<16xf32>
    %58 = vector.shape_cast %57 : vector<16xf32> to vector<16x1xf32>
    %59 = tpu.reciprocal %58 {approx = true} : vector<16x1xf32> -> vector<16x1xf32>
    %60 = vector.broadcast %59 : vector<16x1xf32> to vector<16x16xf32>
    %61 = arith.mulf %56, %60 : vector<16x16xf32>
    %cst_24 = arith.constant dense<0.000000e+00> : vector<16x8xf32>
    %62 = tpu.matmul %61, %48, %cst_24 {dimension_numbers = #tpu.dot_dimension_numbers<[1], [0], [0], [1], [0, 0, 1, 1], [], []>} : vector<16x16xf32>, vector<16x8xf32>, vector<16x8xf32> -> vector<16x8xf32>
    %63 = vector.extract_strided_slice %45 {offsets = [0, 8], sizes = [16, 8], strides = [1, 1]} : vector<32x96xf32> to vector<16x8xf32>
    %64 = vector.extract_strided_slice %45 {offsets = [0, 40], sizes = [16, 8], strides = [1, 1]} : vector<32x96xf32> to vector<16x8xf32>
    %65 = vector.extract_strided_slice %45 {offsets = [0, 72], sizes = [16, 8], strides = [1, 1]} : vector<32x96xf32> to vector<16x8xf32>
    %cst_25 = arith.constant dense<0.000000e+00> : vector<16x16xf32>
    %66 = tpu.matmul %63, %64, %cst_25 {dimension_numbers = #tpu.dot_dimension_numbers<[1], [1], [0], [0], [0, 0, 1, 0], [], []>} : vector<16x8xf32>, vector<16x8xf32>, vector<16x16xf32> -> vector<16x16xf32>
    %67 = vector.broadcast %7 : vector<1x16xf32> to vector<16x16xf32>
    %68 = arith.addf %66, %67 : vector<16x16xf32>
    %cst_26 = arith.constant dense<0xFF800000> : vector<16xf32>
    %69 = vector.multi_reduction <maximumf>, %68, %cst_26 [1] : vector<16x16xf32> to vector<16xf32>
    %70 = vector.shape_cast %69 : vector<16xf32> to vector<16x1xf32>
    %71 = vector.broadcast %70 : vector<16x1xf32> to vector<16x16xf32>
    %72 = arith.subf %68, %71 : vector<16x16xf32>
    %73 = math.exp %72 : vector<16x16xf32>
    %cst_27 = arith.constant dense<0.000000e+00> : vector<16xf32>
    %74 = vector.multi_reduction <add>, %73, %cst_27 [1] : vector<16x16xf32> to vector<16xf32>
    %75 = vector.shape_cast %74 : vector<16xf32> to vector<16x1xf32>
    %76 = tpu.reciprocal %75 {approx = true} : vector<16x1xf32> -> vector<16x1xf32>
    %77 = vector.broadcast %76 : vector<16x1xf32> to vector<16x16xf32>
    %78 = arith.mulf %73, %77 : vector<16x16xf32>
    %cst_28 = arith.constant dense<0.000000e+00> : vector<16x8xf32>
    %79 = tpu.matmul %78, %65, %cst_28 {dimension_numbers = #tpu.dot_dimension_numbers<[1], [0], [0], [1], [0, 0, 1, 1], [], []>} : vector<16x16xf32>, vector<16x8xf32>, vector<16x8xf32> -> vector<16x8xf32>
    %80 = vector.extract_strided_slice %45 {offsets = [0, 16], sizes = [16, 8], strides = [1, 1]} : vector<32x96xf32> to vector<16x8xf32>
    %81 = vector.extract_strided_slice %45 {offsets = [0, 48], sizes = [16, 8], strides = [1, 1]} : vector<32x96xf32> to vector<16x8xf32>
    %82 = vector.extract_strided_slice %45 {offsets = [0, 80], sizes = [16, 8], strides = [1, 1]} : vector<32x96xf32> to vector<16x8xf32>
    %cst_29 = arith.constant dense<0.000000e+00> : vector<16x16xf32>
    %83 = tpu.matmul %80, %81, %cst_29 {dimension_numbers = #tpu.dot_dimension_numbers<[1], [1], [0], [0], [0, 0, 1, 0], [], []>} : vector<16x8xf32>, vector<16x8xf32>, vector<16x16xf32> -> vector<16x16xf32>
    %84 = vector.broadcast %7 : vector<1x16xf32> to vector<16x16xf32>
    %85 = arith.addf %83, %84 : vector<16x16xf32>
    %cst_30 = arith.constant dense<0xFF800000> : vector<16xf32>
    %86 = vector.multi_reduction <maximumf>, %85, %cst_30 [1] : vector<16x16xf32> to vector<16xf32>
    %87 = vector.shape_cast %86 : vector<16xf32> to vector<16x1xf32>
    %88 = vector.broadcast %87 : vector<16x1xf32> to vector<16x16xf32>
    %89 = arith.subf %85, %88 : vector<16x16xf32>
    %90 = math.exp %89 : vector<16x16xf32>
    %cst_31 = arith.constant dense<0.000000e+00> : vector<16xf32>
    %91 = vector.multi_reduction <add>, %90, %cst_31 [1] : vector<16x16xf32> to vector<16xf32>
    %92 = vector.shape_cast %91 : vector<16xf32> to vector<16x1xf32>
    %93 = tpu.reciprocal %92 {approx = true} : vector<16x1xf32> -> vector<16x1xf32>
    %94 = vector.broadcast %93 : vector<16x1xf32> to vector<16x16xf32>
    %95 = arith.mulf %90, %94 : vector<16x16xf32>
    %cst_32 = arith.constant dense<0.000000e+00> : vector<16x8xf32>
    %96 = tpu.matmul %95, %82, %cst_32 {dimension_numbers = #tpu.dot_dimension_numbers<[1], [0], [0], [1], [0, 0, 1, 1], [], []>} : vector<16x16xf32>, vector<16x8xf32>, vector<16x8xf32> -> vector<16x8xf32>
    %97 = vector.extract_strided_slice %45 {offsets = [0, 24], sizes = [16, 8], strides = [1, 1]} : vector<32x96xf32> to vector<16x8xf32>
    %98 = vector.extract_strided_slice %45 {offsets = [0, 56], sizes = [16, 8], strides = [1, 1]} : vector<32x96xf32> to vector<16x8xf32>
    %99 = vector.extract_strided_slice %45 {offsets = [0, 88], sizes = [16, 8], strides = [1, 1]} : vector<32x96xf32> to vector<16x8xf32>
    %cst_33 = arith.constant dense<0.000000e+00> : vector<16x16xf32>
    %100 = tpu.matmul %97, %98, %cst_33 {dimension_numbers = #tpu.dot_dimension_numbers<[1], [1], [0], [0], [0, 0, 1, 0], [], []>} : vector<16x8xf32>, vector<16x8xf32>, vector<16x16xf32> -> vector<16x16xf32>
    %101 = vector.broadcast %7 : vector<1x16xf32> to vector<16x16xf32>
    %102 = arith.addf %100, %101 : vector<16x16xf32>
    %cst_34 = arith.constant dense<0xFF800000> : vector<16xf32>
    %103 = vector.multi_reduction <maximumf>, %102, %cst_34 [1] : vector<16x16xf32> to vector<16xf32>
    %104 = vector.shape_cast %103 : vector<16xf32> to vector<16x1xf32>
    %105 = vector.broadcast %104 : vector<16x1xf32> to vector<16x16xf32>
    %106 = arith.subf %102, %105 : vector<16x16xf32>
    %107 = math.exp %106 : vector<16x16xf32>
    %cst_35 = arith.constant dense<0.000000e+00> : vector<16xf32>
    %108 = vector.multi_reduction <add>, %107, %cst_35 [1] : vector<16x16xf32> to vector<16xf32>
    %109 = vector.shape_cast %108 : vector<16xf32> to vector<16x1xf32>
    %110 = tpu.reciprocal %109 {approx = true} : vector<16x1xf32> -> vector<16x1xf32>
    %111 = vector.broadcast %110 : vector<16x1xf32> to vector<16x16xf32>
    %112 = arith.mulf %107, %111 : vector<16x16xf32>
    %cst_36 = arith.constant dense<0.000000e+00> : vector<16x8xf32>
    %113 = tpu.matmul %112, %99, %cst_36 {dimension_numbers = #tpu.dot_dimension_numbers<[1], [0], [0], [1], [0, 0, 1, 1], [], []>} : vector<16x16xf32>, vector<16x8xf32>, vector<16x8xf32> -> vector<16x8xf32>
    %114 = tpu.concatenate %62, %79, %96, %113 in 1 : vector<16x8xf32>, vector<16x8xf32>, vector<16x8xf32>, vector<16x8xf32> -> vector<16x32xf32>
    %115 = vector.extract_strided_slice %45 {offsets = [16, 0], sizes = [16, 8], strides = [1, 1]} : vector<32x96xf32> to vector<16x8xf32>
    %116 = vector.extract_strided_slice %45 {offsets = [16, 32], sizes = [16, 8], strides = [1, 1]} : vector<32x96xf32> to vector<16x8xf32>
    %117 = vector.extract_strided_slice %45 {offsets = [16, 64], sizes = [16, 8], strides = [1, 1]} : vector<32x96xf32> to vector<16x8xf32>
    %cst_37 = arith.constant dense<0.000000e+00> : vector<16x16xf32>
    %118 = tpu.matmul %115, %116, %cst_37 {dimension_numbers = #tpu.dot_dimension_numbers<[1], [1], [0], [0], [0, 0, 1, 0], [], []>} : vector<16x8xf32>, vector<16x8xf32>, vector<16x16xf32> -> vector<16x16xf32>
    %119 = vector.broadcast %13 : vector<1x16xf32> to vector<16x16xf32>
    %120 = arith.addf %118, %119 : vector<16x16xf32>
    %cst_38 = arith.constant dense<0xFF800000> : vector<16xf32>
    %121 = vector.multi_reduction <maximumf>, %120, %cst_38 [1] : vector<16x16xf32> to vector<16xf32>
    %122 = vector.shape_cast %121 : vector<16xf32> to vector<16x1xf32>
    %123 = vector.broadcast %122 : vector<16x1xf32> to vector<16x16xf32>
    %124 = arith.subf %120, %123 : vector<16x16xf32>
    %125 = math.exp %124 : vector<16x16xf32>
    %cst_39 = arith.constant dense<0.000000e+00> : vector<16xf32>
    %126 = vector.multi_reduction <add>, %125, %cst_39 [1] : vector<16x16xf32> to vector<16xf32>
    %127 = vector.shape_cast %126 : vector<16xf32> to vector<16x1xf32>
    %128 = tpu.reciprocal %127 {approx = true} : vector<16x1xf32> -> vector<16x1xf32>
    %129 = vector.broadcast %128 : vector<16x1xf32> to vector<16x16xf32>
    %130 = arith.mulf %125, %129 : vector<16x16xf32>
    %cst_40 = arith.constant dense<0.000000e+00> : vector<16x8xf32>
    %131 = tpu.matmul %130, %117, %cst_40 {dimension_numbers = #tpu.dot_dimension_numbers<[1], [0], [0], [1], [0, 0, 1, 1], [], []>} : vector<16x16xf32>, vector<16x8xf32>, vector<16x8xf32> -> vector<16x8xf32>
    %132 = vector.extract_strided_slice %45 {offsets = [16, 8], sizes = [16, 8], strides = [1, 1]} : vector<32x96xf32> to vector<16x8xf32>
    %133 = vector.extract_strided_slice %45 {offsets = [16, 40], sizes = [16, 8], strides = [1, 1]} : vector<32x96xf32> to vector<16x8xf32>
    %134 = vector.extract_strided_slice %45 {offsets = [16, 72], sizes = [16, 8], strides = [1, 1]} : vector<32x96xf32> to vector<16x8xf32>
    %cst_41 = arith.constant dense<0.000000e+00> : vector<16x16xf32>
    %135 = tpu.matmul %132, %133, %cst_41 {dimension_numbers = #tpu.dot_dimension_numbers<[1], [1], [0], [0], [0, 0, 1, 0], [], []>} : vector<16x8xf32>, vector<16x8xf32>, vector<16x16xf32> -> vector<16x16xf32>
    %136 = vector.broadcast %13 : vector<1x16xf32> to vector<16x16xf32>
    %137 = arith.addf %135, %136 : vector<16x16xf32>
    %cst_42 = arith.constant dense<0xFF800000> : vector<16xf32>
    %138 = vector.multi_reduction <maximumf>, %137, %cst_42 [1] : vector<16x16xf32> to vector<16xf32>
    %139 = vector.shape_cast %138 : vector<16xf32> to vector<16x1xf32>
    %140 = vector.broadcast %139 : vector<16x1xf32> to vector<16x16xf32>
    %141 = arith.subf %137, %140 : vector<16x16xf32>
    %142 = math.exp %141 : vector<16x16xf32>
    %cst_43 = arith.constant dense<0.000000e+00> : vector<16xf32>
    %143 = vector.multi_reduction <add>, %142, %cst_43 [1] : vector<16x16xf32> to vector<16xf32>
    %144 = vector.shape_cast %143 : vector<16xf32> to vector<16x1xf32>
    %145 = tpu.reciprocal %144 {approx = true} : vector<16x1xf32> -> vector<16x1xf32>
    %146 = vector.broadcast %145 : vector<16x1xf32> to vector<16x16xf32>
    %147 = arith.mulf %142, %146 : vector<16x16xf32>
    %cst_44 = arith.constant dense<0.000000e+00> : vector<16x8xf32>
    %148 = tpu.matmul %147, %134, %cst_44 {dimension_numbers = #tpu.dot_dimension_numbers<[1], [0], [0], [1], [0, 0, 1, 1], [], []>} : vector<16x16xf32>, vector<16x8xf32>, vector<16x8xf32> -> vector<16x8xf32>
    %149 = vector.extract_strided_slice %45 {offsets = [16, 16], sizes = [16, 8], strides = [1, 1]} : vector<32x96xf32> to vector<16x8xf32>
    %150 = vector.extract_strided_slice %45 {offsets = [16, 48], sizes = [16, 8], strides = [1, 1]} : vector<32x96xf32> to vector<16x8xf32>
    %151 = vector.extract_strided_slice %45 {offsets = [16, 80], sizes = [16, 8], strides = [1, 1]} : vector<32x96xf32> to vector<16x8xf32>
    %cst_45 = arith.constant dense<0.000000e+00> : vector<16x16xf32>
    %152 = tpu.matmul %149, %150, %cst_45 {dimension_numbers = #tpu.dot_dimension_numbers<[1], [1], [0], [0], [0, 0, 1, 0], [], []>} : vector<16x8xf32>, vector<16x8xf32>, vector<16x16xf32> -> vector<16x16xf32>
    %153 = vector.broadcast %13 : vector<1x16xf32> to vector<16x16xf32>
    %154 = arith.addf %152, %153 : vector<16x16xf32>
    %cst_46 = arith.constant dense<0xFF800000> : vector<16xf32>
    %155 = vector.multi_reduction <maximumf>, %154, %cst_46 [1] : vector<16x16xf32> to vector<16xf32>
    %156 = vector.shape_cast %155 : vector<16xf32> to vector<16x1xf32>
    %157 = vector.broadcast %156 : vector<16x1xf32> to vector<16x16xf32>
    %158 = arith.subf %154, %157 : vector<16x16xf32>
    %159 = math.exp %158 : vector<16x16xf32>
    %cst_47 = arith.constant dense<0.000000e+00> : vector<16xf32>
    %160 = vector.multi_reduction <add>, %159, %cst_47 [1] : vector<16x16xf32> to vector<16xf32>
    %161 = vector.shape_cast %160 : vector<16xf32> to vector<16x1xf32>
    %162 = tpu.reciprocal %161 {approx = true} : vector<16x1xf32> -> vector<16x1xf32>
    %163 = vector.broadcast %162 : vector<16x1xf32> to vector<16x16xf32>
    %164 = arith.mulf %159, %163 : vector<16x16xf32>
    %cst_48 = arith.constant dense<0.000000e+00> : vector<16x8xf32>
    %165 = tpu.matmul %164, %151, %cst_48 {dimension_numbers = #tpu.dot_dimension_numbers<[1], [0], [0], [1], [0, 0, 1, 1], [], []>} : vector<16x16xf32>, vector<16x8xf32>, vector<16x8xf32> -> vector<16x8xf32>
    %166 = vector.extract_strided_slice %45 {offsets = [16, 24], sizes = [16, 8], strides = [1, 1]} : vector<32x96xf32> to vector<16x8xf32>
    %167 = vector.extract_strided_slice %45 {offsets = [16, 56], sizes = [16, 8], strides = [1, 1]} : vector<32x96xf32> to vector<16x8xf32>
    %168 = vector.extract_strided_slice %45 {offsets = [16, 88], sizes = [16, 8], strides = [1, 1]} : vector<32x96xf32> to vector<16x8xf32>
    %cst_49 = arith.constant dense<0.000000e+00> : vector<16x16xf32>
    %169 = tpu.matmul %166, %167, %cst_49 {dimension_numbers = #tpu.dot_dimension_numbers<[1], [1], [0], [0], [0, 0, 1, 0], [], []>} : vector<16x8xf32>, vector<16x8xf32>, vector<16x16xf32> -> vector<16x16xf32>
    %170 = vector.broadcast %13 : vector<1x16xf32> to vector<16x16xf32>
    %171 = arith.addf %169, %170 : vector<16x16xf32>
    %cst_50 = arith.constant dense<0xFF800000> : vector<16xf32>
    %172 = vector.multi_reduction <maximumf>, %171, %cst_50 [1] : vector<16x16xf32> to vector<16xf32>
    %173 = vector.shape_cast %172 : vector<16xf32> to vector<16x1xf32>
    %174 = vector.broadcast %173 : vector<16x1xf32> to vector<16x16xf32>
    %175 = arith.subf %171, %174 : vector<16x16xf32>
    %176 = math.exp %175 : vector<16x16xf32>
    %cst_51 = arith.constant dense<0.000000e+00> : vector<16xf32>
    %177 = vector.multi_reduction <add>, %176, %cst_51 [1] : vector<16x16xf32> to vector<16xf32>
    %178 = vector.shape_cast %177 : vector<16xf32> to vector<16x1xf32>
    %179 = tpu.reciprocal %178 {approx = true} : vector<16x1xf32> -> vector<16x1xf32>
    %180 = vector.broadcast %179 : vector<16x1xf32> to vector<16x16xf32>
    %181 = arith.mulf %176, %180 : vector<16x16xf32>
    %cst_52 = arith.constant dense<0.000000e+00> : vector<16x8xf32>
    %182 = tpu.matmul %181, %168, %cst_52 {dimension_numbers = #tpu.dot_dimension_numbers<[1], [0], [0], [1], [0, 0, 1, 1], [], []>} : vector<16x16xf32>, vector<16x8xf32>, vector<16x8xf32> -> vector<16x8xf32>
    %183 = tpu.concatenate %131, %148, %165, %182 in 1 : vector<16x8xf32>, vector<16x8xf32>, vector<16x8xf32>, vector<16x8xf32> -> vector<16x32xf32>
    %184 = tpu.concatenate %114, %183 in 0 : vector<16x32xf32>, vector<16x32xf32> -> vector<32x32xf32>
    %185 = arith.truncf %184 : vector<32x32xf32> to vector<32x32xbf16>
    %c0_53 = arith.constant 0 : index
    %c0_54 = arith.constant 0 : index
    %c0_55 = arith.constant 0 : index
    %186 = vector.load %arg7[%c0_53, %c0_54, %c0_55] : memref<2x32x32xbf16, #tpu.memory_space<vmem>>, vector<1x32x32xbf16>
    %187 = vector.shape_cast %186 : vector<1x32x32xbf16> to vector<32x32xbf16>
    %cst_56 = arith.constant dense<0.000000e+00> : vector<32x32xf32>
    %188 = tpu.matmul %185, %187, %cst_56 {dimension_numbers = #tpu.dot_dimension_numbers<[1], [0], [0], [1], [0, 0, 1, 1], [], []>} : vector<32x32xbf16>, vector<32x32xbf16>, vector<32x32xf32> -> vector<32x32xf32>
    %c0_57 = arith.constant 0 : index
    %c0_58 = arith.constant 0 : index
    %c0_59 = arith.constant 0 : index
    %189 = vector.load %arg8[%c0_57, %c0_58, %c0_59] : memref<2x1x32xf32, #tpu.memory_space<vmem>>, vector<1x1x32xf32>
    %190 = vector.shape_cast %189 : vector<1x1x32xf32> to vector<1x32xf32>
    %191 = vector.broadcast %190 : vector<1x32xf32> to vector<32x32xf32>
    %192 = arith.addf %188, %191 : vector<32x32xf32>
    %193 = arith.addf %37, %192 : vector<32x32xf32>
    %c0_60 = arith.constant 0 : index
    %c0_61 = arith.constant 0 : index
    %c0_62 = arith.constant 0 : index
    %194 = vector.load %arg9[%c0_60, %c0_61, %c0_62] : memref<2x1x32xf32, #tpu.memory_space<vmem>>, vector<1x1x32xf32>
    %195 = vector.shape_cast %194 : vector<1x1x32xf32> to vector<1x32xf32>
    %c0_63 = arith.constant 0 : index
    %c0_64 = arith.constant 0 : index
    %c0_65 = arith.constant 0 : index
    %196 = vector.load %arg10[%c0_63, %c0_64, %c0_65] : memref<2x1x32xf32, #tpu.memory_space<vmem>>, vector<1x1x32xf32>
    %197 = vector.shape_cast %196 : vector<1x1x32xf32> to vector<1x32xf32>
    %cst_66 = arith.constant dense<0.000000e+00> : vector<32xf32>
    %198 = vector.multi_reduction <add>, %193, %cst_66 [1] : vector<32x32xf32> to vector<32xf32>
    %199 = vector.shape_cast %198 : vector<32xf32> to vector<32x1xf32>
    %cst_67 = arith.constant 3.200000e+01 : f32
    %200 = vector.broadcast %cst_67 : f32 to vector<32x1xf32>
    %201 = arith.divf %199, %200 : vector<32x1xf32>
    %202 = vector.broadcast %201 : vector<32x1xf32> to vector<32x32xf32>
    %203 = arith.subf %193, %202 : vector<32x32xf32>
    %204 = arith.mulf %203, %203 : vector<32x32xf32>
    %cst_68 = arith.constant dense<0.000000e+00> : vector<32xf32>
    %205 = vector.multi_reduction <add>, %204, %cst_68 [1] : vector<32x32xf32> to vector<32xf32>
    %206 = vector.shape_cast %205 : vector<32xf32> to vector<32x1xf32>
    %cst_69 = arith.constant 3.200000e+01 : f32
    %207 = vector.broadcast %cst_69 : f32 to vector<32x1xf32>
    %208 = arith.divf %206, %207 : vector<32x1xf32>
    %209 = vector.broadcast %201 : vector<32x1xf32> to vector<32x32xf32>
    %210 = arith.subf %193, %209 : vector<32x32xf32>
    %cst_70 = arith.constant 9.99999974E-6 : f32
    %211 = vector.broadcast %cst_70 : f32 to vector<32x1xf32>
    %212 = arith.addf %208, %211 : vector<32x1xf32>
    %213 = math.rsqrt %212 : vector<32x1xf32>
    %214 = vector.broadcast %213 : vector<32x1xf32> to vector<32x32xf32>
    %215 = arith.mulf %210, %214 : vector<32x32xf32>
    %216 = vector.broadcast %195 : vector<1x32xf32> to vector<32x32xf32>
    %217 = arith.mulf %215, %216 : vector<32x32xf32>
    %218 = vector.broadcast %197 : vector<1x32xf32> to vector<32x32xf32>
    %219 = arith.addf %217, %218 : vector<32x32xf32>
    %220 = arith.truncf %219 : vector<32x32xf32> to vector<32x32xbf16>
    %c0_71 = arith.constant 0 : index
    %c0_72 = arith.constant 0 : index
    %c0_73 = arith.constant 0 : index
    %221 = vector.load %arg11[%c0_71, %c0_72, %c0_73] : memref<2x32x32xbf16, #tpu.memory_space<vmem>>, vector<1x32x32xbf16>
    %222 = vector.shape_cast %221 : vector<1x32x32xbf16> to vector<32x32xbf16>
    %cst_74 = arith.constant dense<0.000000e+00> : vector<32x32xf32>
    %223 = tpu.matmul %220, %222, %cst_74 {dimension_numbers = #tpu.dot_dimension_numbers<[1], [0], [0], [1], [0, 0, 1, 1], [], []>} : vector<32x32xbf16>, vector<32x32xbf16>, vector<32x32xf32> -> vector<32x32xf32>
    %c0_75 = arith.constant 0 : index
    %c0_76 = arith.constant 0 : index
    %c0_77 = arith.constant 0 : index
    %224 = vector.load %arg12[%c0_75, %c0_76, %c0_77] : memref<2x1x32xf32, #tpu.memory_space<vmem>>, vector<1x1x32xf32>
    %225 = vector.shape_cast %224 : vector<1x1x32xf32> to vector<1x32xf32>
    %226 = vector.broadcast %225 : vector<1x32xf32> to vector<32x32xf32>
    %227 = arith.addf %223, %226 : vector<32x32xf32>
    %cst_78 = arith.constant 0.000000e+00 : f32
    %228 = vector.broadcast %cst_78 : f32 to vector<32x32xf32>
    %229 = arith.maximumf %227, %228 : vector<32x32xf32>
    %230 = arith.truncf %229 : vector<32x32xf32> to vector<32x32xbf16>
    %c0_79 = arith.constant 0 : index
    %c0_80 = arith.constant 0 : index
    %c0_81 = arith.constant 0 : index
    %231 = vector.load %arg13[%c0_79, %c0_80, %c0_81] : memref<2x32x32xbf16, #tpu.memory_space<vmem>>, vector<1x32x32xbf16>
    %232 = vector.shape_cast %231 : vector<1x32x32xbf16> to vector<32x32xbf16>
    %cst_82 = arith.constant dense<0.000000e+00> : vector<32x32xf32>
    %233 = tpu.matmul %230, %232, %cst_82 {dimension_numbers = #tpu.dot_dimension_numbers<[1], [0], [0], [1], [0, 0, 1, 1], [], []>} : vector<32x32xbf16>, vector<32x32xbf16>, vector<32x32xf32> -> vector<32x32xf32>
    %c0_83 = arith.constant 0 : index
    %c0_84 = arith.constant 0 : index
    %c0_85 = arith.constant 0 : index
    %234 = vector.load %arg14[%c0_83, %c0_84, %c0_85] : memref<2x1x32xf32, #tpu.memory_space<vmem>>, vector<1x1x32xf32>
    %235 = vector.shape_cast %234 : vector<1x1x32xf32> to vector<1x32xf32>
    %236 = vector.broadcast %235 : vector<1x32xf32> to vector<32x32xf32>
    %237 = arith.addf %233, %236 : vector<32x32xf32>
    %238 = arith.addf %219, %237 : vector<32x32xf32>
    %c0_86 = arith.constant 0 : index
    %c0_87 = arith.constant 0 : index
    %c0_88 = arith.constant 0 : index
    %239 = vector.load %arg15[%c0_86, %c0_87, %c0_88] : memref<2x1x32xf32, #tpu.memory_space<vmem>>, vector<1x1x32xf32>
    %240 = vector.shape_cast %239 : vector<1x1x32xf32> to vector<1x32xf32>
    %c0_89 = arith.constant 0 : index
    %c0_90 = arith.constant 0 : index
    %c0_91 = arith.constant 0 : index
    %241 = vector.load %arg16[%c0_89, %c0_90, %c0_91] : memref<2x1x32xf32, #tpu.memory_space<vmem>>, vector<1x1x32xf32>
    %242 = vector.shape_cast %241 : vector<1x1x32xf32> to vector<1x32xf32>
    %cst_92 = arith.constant dense<0.000000e+00> : vector<32xf32>
    %243 = vector.multi_reduction <add>, %238, %cst_92 [1] : vector<32x32xf32> to vector<32xf32>
    %244 = vector.shape_cast %243 : vector<32xf32> to vector<32x1xf32>
    %cst_93 = arith.constant 3.200000e+01 : f32
    %245 = vector.broadcast %cst_93 : f32 to vector<32x1xf32>
    %246 = arith.divf %244, %245 : vector<32x1xf32>
    %247 = vector.broadcast %246 : vector<32x1xf32> to vector<32x32xf32>
    %248 = arith.subf %238, %247 : vector<32x32xf32>
    %249 = arith.mulf %248, %248 : vector<32x32xf32>
    %cst_94 = arith.constant dense<0.000000e+00> : vector<32xf32>
    %250 = vector.multi_reduction <add>, %249, %cst_94 [1] : vector<32x32xf32> to vector<32xf32>
    %251 = vector.shape_cast %250 : vector<32xf32> to vector<32x1xf32>
    %cst_95 = arith.constant 3.200000e+01 : f32
    %252 = vector.broadcast %cst_95 : f32 to vector<32x1xf32>
    %253 = arith.divf %251, %252 : vector<32x1xf32>
    %254 = vector.broadcast %246 : vector<32x1xf32> to vector<32x32xf32>
    %255 = arith.subf %238, %254 : vector<32x32xf32>
    %cst_96 = arith.constant 9.99999974E-6 : f32
    %256 = vector.broadcast %cst_96 : f32 to vector<32x1xf32>
    %257 = arith.addf %253, %256 : vector<32x1xf32>
    %258 = math.rsqrt %257 : vector<32x1xf32>
    %259 = vector.broadcast %258 : vector<32x1xf32> to vector<32x32xf32>
    %260 = arith.mulf %255, %259 : vector<32x32xf32>
    %261 = vector.broadcast %240 : vector<1x32xf32> to vector<32x32xf32>
    %262 = arith.mulf %260, %261 : vector<32x32xf32>
    %263 = vector.broadcast %242 : vector<1x32xf32> to vector<32x32xf32>
    %264 = arith.addf %262, %263 : vector<32x32xf32>
    %265 = arith.truncf %264 : vector<32x32xf32> to vector<32x32xbf16>
    %c1_97 = arith.constant 1 : index
    %c0_98 = arith.constant 0 : index
    %c0_99 = arith.constant 0 : index
    %266 = vector.load %arg5[%c1_97, %c0_98, %c0_99] : memref<2x32x96xbf16, #tpu.memory_space<vmem>>, vector<1x32x96xbf16>
    %267 = vector.shape_cast %266 : vector<1x32x96xbf16> to vector<32x96xbf16>
    %cst_100 = arith.constant dense<0.000000e+00> : vector<32x96xf32>
    %268 = tpu.matmul %265, %267, %cst_100 {dimension_numbers = #tpu.dot_dimension_numbers<[1], [0], [0], [1], [0, 0, 1, 1], [], []>} : vector<32x32xbf16>, vector<32x96xbf16>, vector<32x96xf32> -> vector<32x96xf32>
    %c1_101 = arith.constant 1 : index
    %c0_102 = arith.constant 0 : index
    %c0_103 = arith.constant 0 : index
    %269 = vector.load %arg6[%c1_101, %c0_102, %c0_103] : memref<2x1x96xf32, #tpu.memory_space<vmem>>, vector<1x1x96xf32>
    %270 = vector.shape_cast %269 : vector<1x1x96xf32> to vector<1x96xf32>
    %271 = vector.broadcast %270 : vector<1x96xf32> to vector<32x96xf32>
    %272 = arith.addf %268, %271 : vector<32x96xf32>
    %273 = vector.extract_strided_slice %272 {offsets = [0, 0], sizes = [16, 8], strides = [1, 1]} : vector<32x96xf32> to vector<16x8xf32>
    %274 = vector.extract_strided_slice %272 {offsets = [0, 32], sizes = [16, 8], strides = [1, 1]} : vector<32x96xf32> to vector<16x8xf32>
    %275 = vector.extract_strided_slice %272 {offsets = [0, 64], sizes = [16, 8], strides = [1, 1]} : vector<32x96xf32> to vector<16x8xf32>
    %cst_104 = arith.constant dense<0.000000e+00> : vector<16x16xf32>
    %276 = tpu.matmul %273, %274, %cst_104 {dimension_numbers = #tpu.dot_dimension_numbers<[1], [1], [0], [0], [0, 0, 1, 0], [], []>} : vector<16x8xf32>, vector<16x8xf32>, vector<16x16xf32> -> vector<16x16xf32>
    %277 = vector.broadcast %7 : vector<1x16xf32> to vector<16x16xf32>
    %278 = arith.addf %276, %277 : vector<16x16xf32>
    %cst_105 = arith.constant dense<0xFF800000> : vector<16xf32>
    %279 = vector.multi_reduction <maximumf>, %278, %cst_105 [1] : vector<16x16xf32> to vector<16xf32>
    %280 = vector.shape_cast %279 : vector<16xf32> to vector<16x1xf32>
    %281 = vector.broadcast %280 : vector<16x1xf32> to vector<16x16xf32>
    %282 = arith.subf %278, %281 : vector<16x16xf32>
    %283 = math.exp %282 : vector<16x16xf32>
    %cst_106 = arith.constant dense<0.000000e+00> : vector<16xf32>
    %284 = vector.multi_reduction <add>, %283, %cst_106 [1] : vector<16x16xf32> to vector<16xf32>
    %285 = vector.shape_cast %284 : vector<16xf32> to vector<16x1xf32>
    %286 = tpu.reciprocal %285 {approx = true} : vector<16x1xf32> -> vector<16x1xf32>
    %287 = vector.broadcast %286 : vector<16x1xf32> to vector<16x16xf32>
    %288 = arith.mulf %283, %287 : vector<16x16xf32>
    %cst_107 = arith.constant dense<0.000000e+00> : vector<16x8xf32>
    %289 = tpu.matmul %288, %275, %cst_107 {dimension_numbers = #tpu.dot_dimension_numbers<[1], [0], [0], [1], [0, 0, 1, 1], [], []>} : vector<16x16xf32>, vector<16x8xf32>, vector<16x8xf32> -> vector<16x8xf32>
    %290 = vector.extract_strided_slice %272 {offsets = [0, 8], sizes = [16, 8], strides = [1, 1]} : vector<32x96xf32> to vector<16x8xf32>
    %291 = vector.extract_strided_slice %272 {offsets = [0, 40], sizes = [16, 8], strides = [1, 1]} : vector<32x96xf32> to vector<16x8xf32>
    %292 = vector.extract_strided_slice %272 {offsets = [0, 72], sizes = [16, 8], strides = [1, 1]} : vector<32x96xf32> to vector<16x8xf32>
    %cst_108 = arith.constant dense<0.000000e+00> : vector<16x16xf32>
    %293 = tpu.matmul %290, %291, %cst_108 {dimension_numbers = #tpu.dot_dimension_numbers<[1], [1], [0], [0], [0, 0, 1, 0], [], []>} : vector<16x8xf32>, vector<16x8xf32>, vector<16x16xf32> -> vector<16x16xf32>
    %294 = vector.broadcast %7 : vector<1x16xf32> to vector<16x16xf32>
    %295 = arith.addf %293, %294 : vector<16x16xf32>
    %cst_109 = arith.constant dense<0xFF800000> : vector<16xf32>
    %296 = vector.multi_reduction <maximumf>, %295, %cst_109 [1] : vector<16x16xf32> to vector<16xf32>
    %297 = vector.shape_cast %296 : vector<16xf32> to vector<16x1xf32>
    %298 = vector.broadcast %297 : vector<16x1xf32> to vector<16x16xf32>
    %299 = arith.subf %295, %298 : vector<16x16xf32>
    %300 = math.exp %299 : vector<16x16xf32>
    %cst_110 = arith.constant dense<0.000000e+00> : vector<16xf32>
    %301 = vector.multi_reduction <add>, %300, %cst_110 [1] : vector<16x16xf32> to vector<16xf32>
    %302 = vector.shape_cast %301 : vector<16xf32> to vector<16x1xf32>
    %303 = tpu.reciprocal %302 {approx = true} : vector<16x1xf32> -> vector<16x1xf32>
    %304 = vector.broadcast %303 : vector<16x1xf32> to vector<16x16xf32>
    %305 = arith.mulf %300, %304 : vector<16x16xf32>
    %cst_111 = arith.constant dense<0.000000e+00> : vector<16x8xf32>
    %306 = tpu.matmul %305, %292, %cst_111 {dimension_numbers = #tpu.dot_dimension_numbers<[1], [0], [0], [1], [0, 0, 1, 1], [], []>} : vector<16x16xf32>, vector<16x8xf32>, vector<16x8xf32> -> vector<16x8xf32>
    %307 = vector.extract_strided_slice %272 {offsets = [0, 16], sizes = [16, 8], strides = [1, 1]} : vector<32x96xf32> to vector<16x8xf32>
    %308 = vector.extract_strided_slice %272 {offsets = [0, 48], sizes = [16, 8], strides = [1, 1]} : vector<32x96xf32> to vector<16x8xf32>
    %309 = vector.extract_strided_slice %272 {offsets = [0, 80], sizes = [16, 8], strides = [1, 1]} : vector<32x96xf32> to vector<16x8xf32>
    %cst_112 = arith.constant dense<0.000000e+00> : vector<16x16xf32>
    %310 = tpu.matmul %307, %308, %cst_112 {dimension_numbers = #tpu.dot_dimension_numbers<[1], [1], [0], [0], [0, 0, 1, 0], [], []>} : vector<16x8xf32>, vector<16x8xf32>, vector<16x16xf32> -> vector<16x16xf32>
    %311 = vector.broadcast %7 : vector<1x16xf32> to vector<16x16xf32>
    %312 = arith.addf %310, %311 : vector<16x16xf32>
    %cst_113 = arith.constant dense<0xFF800000> : vector<16xf32>
    %313 = vector.multi_reduction <maximumf>, %312, %cst_113 [1] : vector<16x16xf32> to vector<16xf32>
    %314 = vector.shape_cast %313 : vector<16xf32> to vector<16x1xf32>
    %315 = vector.broadcast %314 : vector<16x1xf32> to vector<16x16xf32>
    %316 = arith.subf %312, %315 : vector<16x16xf32>
    %317 = math.exp %316 : vector<16x16xf32>
    %cst_114 = arith.constant dense<0.000000e+00> : vector<16xf32>
    %318 = vector.multi_reduction <add>, %317, %cst_114 [1] : vector<16x16xf32> to vector<16xf32>
    %319 = vector.shape_cast %318 : vector<16xf32> to vector<16x1xf32>
    %320 = tpu.reciprocal %319 {approx = true} : vector<16x1xf32> -> vector<16x1xf32>
    %321 = vector.broadcast %320 : vector<16x1xf32> to vector<16x16xf32>
    %322 = arith.mulf %317, %321 : vector<16x16xf32>
    %cst_115 = arith.constant dense<0.000000e+00> : vector<16x8xf32>
    %323 = tpu.matmul %322, %309, %cst_115 {dimension_numbers = #tpu.dot_dimension_numbers<[1], [0], [0], [1], [0, 0, 1, 1], [], []>} : vector<16x16xf32>, vector<16x8xf32>, vector<16x8xf32> -> vector<16x8xf32>
    %324 = vector.extract_strided_slice %272 {offsets = [0, 24], sizes = [16, 8], strides = [1, 1]} : vector<32x96xf32> to vector<16x8xf32>
    %325 = vector.extract_strided_slice %272 {offsets = [0, 56], sizes = [16, 8], strides = [1, 1]} : vector<32x96xf32> to vector<16x8xf32>
    %326 = vector.extract_strided_slice %272 {offsets = [0, 88], sizes = [16, 8], strides = [1, 1]} : vector<32x96xf32> to vector<16x8xf32>
    %cst_116 = arith.constant dense<0.000000e+00> : vector<16x16xf32>
    %327 = tpu.matmul %324, %325, %cst_116 {dimension_numbers = #tpu.dot_dimension_numbers<[1], [1], [0], [0], [0, 0, 1, 0], [], []>} : vector<16x8xf32>, vector<16x8xf32>, vector<16x16xf32> -> vector<16x16xf32>
    %328 = vector.broadcast %7 : vector<1x16xf32> to vector<16x16xf32>
    %329 = arith.addf %327, %328 : vector<16x16xf32>
    %cst_117 = arith.constant dense<0xFF800000> : vector<16xf32>
    %330 = vector.multi_reduction <maximumf>, %329, %cst_117 [1] : vector<16x16xf32> to vector<16xf32>
    %331 = vector.shape_cast %330 : vector<16xf32> to vector<16x1xf32>
    %332 = vector.broadcast %331 : vector<16x1xf32> to vector<16x16xf32>
    %333 = arith.subf %329, %332 : vector<16x16xf32>
    %334 = math.exp %333 : vector<16x16xf32>
    %cst_118 = arith.constant dense<0.000000e+00> : vector<16xf32>
    %335 = vector.multi_reduction <add>, %334, %cst_118 [1] : vector<16x16xf32> to vector<16xf32>
    %336 = vector.shape_cast %335 : vector<16xf32> to vector<16x1xf32>
    %337 = tpu.reciprocal %336 {approx = true} : vector<16x1xf32> -> vector<16x1xf32>
    %338 = vector.broadcast %337 : vector<16x1xf32> to vector<16x16xf32>
    %339 = arith.mulf %334, %338 : vector<16x16xf32>
    %cst_119 = arith.constant dense<0.000000e+00> : vector<16x8xf32>
    %340 = tpu.matmul %339, %326, %cst_119 {dimension_numbers = #tpu.dot_dimension_numbers<[1], [0], [0], [1], [0, 0, 1, 1], [], []>} : vector<16x16xf32>, vector<16x8xf32>, vector<16x8xf32> -> vector<16x8xf32>
    %341 = tpu.concatenate %289, %306, %323, %340 in 1 : vector<16x8xf32>, vector<16x8xf32>, vector<16x8xf32>, vector<16x8xf32> -> vector<16x32xf32>
    %342 = vector.extract_strided_slice %272 {offsets = [16, 0], sizes = [16, 8], strides = [1, 1]} : vector<32x96xf32> to vector<16x8xf32>
    %343 = vector.extract_strided_slice %272 {offsets = [16, 32], sizes = [16, 8], strides = [1, 1]} : vector<32x96xf32> to vector<16x8xf32>
    %344 = vector.extract_strided_slice %272 {offsets = [16, 64], sizes = [16, 8], strides = [1, 1]} : vector<32x96xf32> to vector<16x8xf32>
    %cst_120 = arith.constant dense<0.000000e+00> : vector<16x16xf32>
    %345 = tpu.matmul %342, %343, %cst_120 {dimension_numbers = #tpu.dot_dimension_numbers<[1], [1], [0], [0], [0, 0, 1, 0], [], []>} : vector<16x8xf32>, vector<16x8xf32>, vector<16x16xf32> -> vector<16x16xf32>
    %346 = vector.broadcast %13 : vector<1x16xf32> to vector<16x16xf32>
    %347 = arith.addf %345, %346 : vector<16x16xf32>
    %cst_121 = arith.constant dense<0xFF800000> : vector<16xf32>
    %348 = vector.multi_reduction <maximumf>, %347, %cst_121 [1] : vector<16x16xf32> to vector<16xf32>
    %349 = vector.shape_cast %348 : vector<16xf32> to vector<16x1xf32>
    %350 = vector.broadcast %349 : vector<16x1xf32> to vector<16x16xf32>
    %351 = arith.subf %347, %350 : vector<16x16xf32>
    %352 = math.exp %351 : vector<16x16xf32>
    %cst_122 = arith.constant dense<0.000000e+00> : vector<16xf32>
    %353 = vector.multi_reduction <add>, %352, %cst_122 [1] : vector<16x16xf32> to vector<16xf32>
    %354 = vector.shape_cast %353 : vector<16xf32> to vector<16x1xf32>
    %355 = tpu.reciprocal %354 {approx = true} : vector<16x1xf32> -> vector<16x1xf32>
    %356 = vector.broadcast %355 : vector<16x1xf32> to vector<16x16xf32>
    %357 = arith.mulf %352, %356 : vector<16x16xf32>
    %cst_123 = arith.constant dense<0.000000e+00> : vector<16x8xf32>
    %358 = tpu.matmul %357, %344, %cst_123 {dimension_numbers = #tpu.dot_dimension_numbers<[1], [0], [0], [1], [0, 0, 1, 1], [], []>} : vector<16x16xf32>, vector<16x8xf32>, vector<16x8xf32> -> vector<16x8xf32>
    %359 = vector.extract_strided_slice %272 {offsets = [16, 8], sizes = [16, 8], strides = [1, 1]} : vector<32x96xf32> to vector<16x8xf32>
    %360 = vector.extract_strided_slice %272 {offsets = [16, 40], sizes = [16, 8], strides = [1, 1]} : vector<32x96xf32> to vector<16x8xf32>
    %361 = vector.extract_strided_slice %272 {offsets = [16, 72], sizes = [16, 8], strides = [1, 1]} : vector<32x96xf32> to vector<16x8xf32>
    %cst_124 = arith.constant dense<0.000000e+00> : vector<16x16xf32>
    %362 = tpu.matmul %359, %360, %cst_124 {dimension_numbers = #tpu.dot_dimension_numbers<[1], [1], [0], [0], [0, 0, 1, 0], [], []>} : vector<16x8xf32>, vector<16x8xf32>, vector<16x16xf32> -> vector<16x16xf32>
    %363 = vector.broadcast %13 : vector<1x16xf32> to vector<16x16xf32>
    %364 = arith.addf %362, %363 : vector<16x16xf32>
    %cst_125 = arith.constant dense<0xFF800000> : vector<16xf32>
    %365 = vector.multi_reduction <maximumf>, %364, %cst_125 [1] : vector<16x16xf32> to vector<16xf32>
    %366 = vector.shape_cast %365 : vector<16xf32> to vector<16x1xf32>
    %367 = vector.broadcast %366 : vector<16x1xf32> to vector<16x16xf32>
    %368 = arith.subf %364, %367 : vector<16x16xf32>
    %369 = math.exp %368 : vector<16x16xf32>
    %cst_126 = arith.constant dense<0.000000e+00> : vector<16xf32>
    %370 = vector.multi_reduction <add>, %369, %cst_126 [1] : vector<16x16xf32> to vector<16xf32>
    %371 = vector.shape_cast %370 : vector<16xf32> to vector<16x1xf32>
    %372 = tpu.reciprocal %371 {approx = true} : vector<16x1xf32> -> vector<16x1xf32>
    %373 = vector.broadcast %372 : vector<16x1xf32> to vector<16x16xf32>
    %374 = arith.mulf %369, %373 : vector<16x16xf32>
    %cst_127 = arith.constant dense<0.000000e+00> : vector<16x8xf32>
    %375 = tpu.matmul %374, %361, %cst_127 {dimension_numbers = #tpu.dot_dimension_numbers<[1], [0], [0], [1], [0, 0, 1, 1], [], []>} : vector<16x16xf32>, vector<16x8xf32>, vector<16x8xf32> -> vector<16x8xf32>
    %376 = vector.extract_strided_slice %272 {offsets = [16, 16], sizes = [16, 8], strides = [1, 1]} : vector<32x96xf32> to vector<16x8xf32>
    %377 = vector.extract_strided_slice %272 {offsets = [16, 48], sizes = [16, 8], strides = [1, 1]} : vector<32x96xf32> to vector<16x8xf32>
    %378 = vector.extract_strided_slice %272 {offsets = [16, 80], sizes = [16, 8], strides = [1, 1]} : vector<32x96xf32> to vector<16x8xf32>
    %cst_128 = arith.constant dense<0.000000e+00> : vector<16x16xf32>
    %379 = tpu.matmul %376, %377, %cst_128 {dimension_numbers = #tpu.dot_dimension_numbers<[1], [1], [0], [0], [0, 0, 1, 0], [], []>} : vector<16x8xf32>, vector<16x8xf32>, vector<16x16xf32> -> vector<16x16xf32>
    %380 = vector.broadcast %13 : vector<1x16xf32> to vector<16x16xf32>
    %381 = arith.addf %379, %380 : vector<16x16xf32>
    %cst_129 = arith.constant dense<0xFF800000> : vector<16xf32>
    %382 = vector.multi_reduction <maximumf>, %381, %cst_129 [1] : vector<16x16xf32> to vector<16xf32>
    %383 = vector.shape_cast %382 : vector<16xf32> to vector<16x1xf32>
    %384 = vector.broadcast %383 : vector<16x1xf32> to vector<16x16xf32>
    %385 = arith.subf %381, %384 : vector<16x16xf32>
    %386 = math.exp %385 : vector<16x16xf32>
    %cst_130 = arith.constant dense<0.000000e+00> : vector<16xf32>
    %387 = vector.multi_reduction <add>, %386, %cst_130 [1] : vector<16x16xf32> to vector<16xf32>
    %388 = vector.shape_cast %387 : vector<16xf32> to vector<16x1xf32>
    %389 = tpu.reciprocal %388 {approx = true} : vector<16x1xf32> -> vector<16x1xf32>
    %390 = vector.broadcast %389 : vector<16x1xf32> to vector<16x16xf32>
    %391 = arith.mulf %386, %390 : vector<16x16xf32>
    %cst_131 = arith.constant dense<0.000000e+00> : vector<16x8xf32>
    %392 = tpu.matmul %391, %378, %cst_131 {dimension_numbers = #tpu.dot_dimension_numbers<[1], [0], [0], [1], [0, 0, 1, 1], [], []>} : vector<16x16xf32>, vector<16x8xf32>, vector<16x8xf32> -> vector<16x8xf32>
    %393 = vector.extract_strided_slice %272 {offsets = [16, 24], sizes = [16, 8], strides = [1, 1]} : vector<32x96xf32> to vector<16x8xf32>
    %394 = vector.extract_strided_slice %272 {offsets = [16, 56], sizes = [16, 8], strides = [1, 1]} : vector<32x96xf32> to vector<16x8xf32>
    %395 = vector.extract_strided_slice %272 {offsets = [16, 88], sizes = [16, 8], strides = [1, 1]} : vector<32x96xf32> to vector<16x8xf32>
    %cst_132 = arith.constant dense<0.000000e+00> : vector<16x16xf32>
    %396 = tpu.matmul %393, %394, %cst_132 {dimension_numbers = #tpu.dot_dimension_numbers<[1], [1], [0], [0], [0, 0, 1, 0], [], []>} : vector<16x8xf32>, vector<16x8xf32>, vector<16x16xf32> -> vector<16x16xf32>
    %397 = vector.broadcast %13 : vector<1x16xf32> to vector<16x16xf32>
    %398 = arith.addf %396, %397 : vector<16x16xf32>
    %cst_133 = arith.constant dense<0xFF800000> : vector<16xf32>
    %399 = vector.multi_reduction <maximumf>, %398, %cst_133 [1] : vector<16x16xf32> to vector<16xf32>
    %400 = vector.shape_cast %399 : vector<16xf32> to vector<16x1xf32>
    %401 = vector.broadcast %400 : vector<16x1xf32> to vector<16x16xf32>
    %402 = arith.subf %398, %401 : vector<16x16xf32>
    %403 = math.exp %402 : vector<16x16xf32>
    %cst_134 = arith.constant dense<0.000000e+00> : vector<16xf32>
    %404 = vector.multi_reduction <add>, %403, %cst_134 [1] : vector<16x16xf32> to vector<16xf32>
    %405 = vector.shape_cast %404 : vector<16xf32> to vector<16x1xf32>
    %406 = tpu.reciprocal %405 {approx = true} : vector<16x1xf32> -> vector<16x1xf32>
    %407 = vector.broadcast %406 : vector<16x1xf32> to vector<16x16xf32>
    %408 = arith.mulf %403, %407 : vector<16x16xf32>
    %cst_135 = arith.constant dense<0.000000e+00> : vector<16x8xf32>
    %409 = tpu.matmul %408, %395, %cst_135 {dimension_numbers = #tpu.dot_dimension_numbers<[1], [0], [0], [1], [0, 0, 1, 1], [], []>} : vector<16x16xf32>, vector<16x8xf32>, vector<16x8xf32> -> vector<16x8xf32>
    %410 = tpu.concatenate %358, %375, %392, %409 in 1 : vector<16x8xf32>, vector<16x8xf32>, vector<16x8xf32>, vector<16x8xf32> -> vector<16x32xf32>
    %411 = tpu.concatenate %341, %410 in 0 : vector<16x32xf32>, vector<16x32xf32> -> vector<32x32xf32>
    %412 = arith.truncf %411 : vector<32x32xf32> to vector<32x32xbf16>
    %c1_136 = arith.constant 1 : index
    %c0_137 = arith.constant 0 : index
    %c0_138 = arith.constant 0 : index
    %413 = vector.load %arg7[%c1_136, %c0_137, %c0_138] : memref<2x32x32xbf16, #tpu.memory_space<vmem>>, vector<1x32x32xbf16>
    %414 = vector.shape_cast %413 : vector<1x32x32xbf16> to vector<32x32xbf16>
    %cst_139 = arith.constant dense<0.000000e+00> : vector<32x32xf32>
    %415 = tpu.matmul %412, %414, %cst_139 {dimension_numbers = #tpu.dot_dimension_numbers<[1], [0], [0], [1], [0, 0, 1, 1], [], []>} : vector<32x32xbf16>, vector<32x32xbf16>, vector<32x32xf32> -> vector<32x32xf32>
    %c1_140 = arith.constant 1 : index
    %c0_141 = arith.constant 0 : index
    %c0_142 = arith.constant 0 : index
    %416 = vector.load %arg8[%c1_140, %c0_141, %c0_142] : memref<2x1x32xf32, #tpu.memory_space<vmem>>, vector<1x1x32xf32>
    %417 = vector.shape_cast %416 : vector<1x1x32xf32> to vector<1x32xf32>
    %418 = vector.broadcast %417 : vector<1x32xf32> to vector<32x32xf32>
    %419 = arith.addf %415, %418 : vector<32x32xf32>
    %420 = arith.addf %264, %419 : vector<32x32xf32>
    %c1_143 = arith.constant 1 : index
    %c0_144 = arith.constant 0 : index
    %c0_145 = arith.constant 0 : index
    %421 = vector.load %arg9[%c1_143, %c0_144, %c0_145] : memref<2x1x32xf32, #tpu.memory_space<vmem>>, vector<1x1x32xf32>
    %422 = vector.shape_cast %421 : vector<1x1x32xf32> to vector<1x32xf32>
    %c1_146 = arith.constant 1 : index
    %c0_147 = arith.constant 0 : index
    %c0_148 = arith.constant 0 : index
    %423 = vector.load %arg10[%c1_146, %c0_147, %c0_148] : memref<2x1x32xf32, #tpu.memory_space<vmem>>, vector<1x1x32xf32>
    %424 = vector.shape_cast %423 : vector<1x1x32xf32> to vector<1x32xf32>
    %cst_149 = arith.constant dense<0.000000e+00> : vector<32xf32>
    %425 = vector.multi_reduction <add>, %420, %cst_149 [1] : vector<32x32xf32> to vector<32xf32>
    %426 = vector.shape_cast %425 : vector<32xf32> to vector<32x1xf32>
    %cst_150 = arith.constant 3.200000e+01 : f32
    %427 = vector.broadcast %cst_150 : f32 to vector<32x1xf32>
    %428 = arith.divf %426, %427 : vector<32x1xf32>
    %429 = vector.broadcast %428 : vector<32x1xf32> to vector<32x32xf32>
    %430 = arith.subf %420, %429 : vector<32x32xf32>
    %431 = arith.mulf %430, %430 : vector<32x32xf32>
    %cst_151 = arith.constant dense<0.000000e+00> : vector<32xf32>
    %432 = vector.multi_reduction <add>, %431, %cst_151 [1] : vector<32x32xf32> to vector<32xf32>
    %433 = vector.shape_cast %432 : vector<32xf32> to vector<32x1xf32>
    %cst_152 = arith.constant 3.200000e+01 : f32
    %434 = vector.broadcast %cst_152 : f32 to vector<32x1xf32>
    %435 = arith.divf %433, %434 : vector<32x1xf32>
    %436 = vector.broadcast %428 : vector<32x1xf32> to vector<32x32xf32>
    %437 = arith.subf %420, %436 : vector<32x32xf32>
    %cst_153 = arith.constant 9.99999974E-6 : f32
    %438 = vector.broadcast %cst_153 : f32 to vector<32x1xf32>
    %439 = arith.addf %435, %438 : vector<32x1xf32>
    %440 = math.rsqrt %439 : vector<32x1xf32>
    %441 = vector.broadcast %440 : vector<32x1xf32> to vector<32x32xf32>
    %442 = arith.mulf %437, %441 : vector<32x32xf32>
    %443 = vector.broadcast %422 : vector<1x32xf32> to vector<32x32xf32>
    %444 = arith.mulf %442, %443 : vector<32x32xf32>
    %445 = vector.broadcast %424 : vector<1x32xf32> to vector<32x32xf32>
    %446 = arith.addf %444, %445 : vector<32x32xf32>
    %447 = arith.truncf %446 : vector<32x32xf32> to vector<32x32xbf16>
    %c1_154 = arith.constant 1 : index
    %c0_155 = arith.constant 0 : index
    %c0_156 = arith.constant 0 : index
    %448 = vector.load %arg11[%c1_154, %c0_155, %c0_156] : memref<2x32x32xbf16, #tpu.memory_space<vmem>>, vector<1x32x32xbf16>
    %449 = vector.shape_cast %448 : vector<1x32x32xbf16> to vector<32x32xbf16>
    %cst_157 = arith.constant dense<0.000000e+00> : vector<32x32xf32>
    %450 = tpu.matmul %447, %449, %cst_157 {dimension_numbers = #tpu.dot_dimension_numbers<[1], [0], [0], [1], [0, 0, 1, 1], [], []>} : vector<32x32xbf16>, vector<32x32xbf16>, vector<32x32xf32> -> vector<32x32xf32>
    %c1_158 = arith.constant 1 : index
    %c0_159 = arith.constant 0 : index
    %c0_160 = arith.constant 0 : index
    %451 = vector.load %arg12[%c1_158, %c0_159, %c0_160] : memref<2x1x32xf32, #tpu.memory_space<vmem>>, vector<1x1x32xf32>
    %452 = vector.shape_cast %451 : vector<1x1x32xf32> to vector<1x32xf32>
    %453 = vector.broadcast %452 : vector<1x32xf32> to vector<32x32xf32>
    %454 = arith.addf %450, %453 : vector<32x32xf32>
    %cst_161 = arith.constant 0.000000e+00 : f32
    %455 = vector.broadcast %cst_161 : f32 to vector<32x32xf32>
    %456 = arith.maximumf %454, %455 : vector<32x32xf32>
    %457 = arith.truncf %456 : vector<32x32xf32> to vector<32x32xbf16>
    %c1_162 = arith.constant 1 : index
    %c0_163 = arith.constant 0 : index
    %c0_164 = arith.constant 0 : index
    %458 = vector.load %arg13[%c1_162, %c0_163, %c0_164] : memref<2x32x32xbf16, #tpu.memory_space<vmem>>, vector<1x32x32xbf16>
    %459 = vector.shape_cast %458 : vector<1x32x32xbf16> to vector<32x32xbf16>
    %cst_165 = arith.constant dense<0.000000e+00> : vector<32x32xf32>
    %460 = tpu.matmul %457, %459, %cst_165 {dimension_numbers = #tpu.dot_dimension_numbers<[1], [0], [0], [1], [0, 0, 1, 1], [], []>} : vector<32x32xbf16>, vector<32x32xbf16>, vector<32x32xf32> -> vector<32x32xf32>
    %c1_166 = arith.constant 1 : index
    %c0_167 = arith.constant 0 : index
    %c0_168 = arith.constant 0 : index
    %461 = vector.load %arg14[%c1_166, %c0_167, %c0_168] : memref<2x1x32xf32, #tpu.memory_space<vmem>>, vector<1x1x32xf32>
    %462 = vector.shape_cast %461 : vector<1x1x32xf32> to vector<1x32xf32>
    %463 = vector.broadcast %462 : vector<1x32xf32> to vector<32x32xf32>
    %464 = arith.addf %460, %463 : vector<32x32xf32>
    %465 = arith.addf %446, %464 : vector<32x32xf32>
    %c1_169 = arith.constant 1 : index
    %c0_170 = arith.constant 0 : index
    %c0_171 = arith.constant 0 : index
    %466 = vector.load %arg15[%c1_169, %c0_170, %c0_171] : memref<2x1x32xf32, #tpu.memory_space<vmem>>, vector<1x1x32xf32>
    %467 = vector.shape_cast %466 : vector<1x1x32xf32> to vector<1x32xf32>
    %c1_172 = arith.constant 1 : index
    %c0_173 = arith.constant 0 : index
    %c0_174 = arith.constant 0 : index
    %468 = vector.load %arg16[%c1_172, %c0_173, %c0_174] : memref<2x1x32xf32, #tpu.memory_space<vmem>>, vector<1x1x32xf32>
    %469 = vector.shape_cast %468 : vector<1x1x32xf32> to vector<1x32xf32>
    %cst_175 = arith.constant dense<0.000000e+00> : vector<32xf32>
    %470 = vector.multi_reduction <add>, %465, %cst_175 [1] : vector<32x32xf32> to vector<32xf32>
    %471 = vector.shape_cast %470 : vector<32xf32> to vector<32x1xf32>
    %cst_176 = arith.constant 3.200000e+01 : f32
    %472 = vector.broadcast %cst_176 : f32 to vector<32x1xf32>
    %473 = arith.divf %471, %472 : vector<32x1xf32>
    %474 = vector.broadcast %473 : vector<32x1xf32> to vector<32x32xf32>
    %475 = arith.subf %465, %474 : vector<32x32xf32>
    %476 = arith.mulf %475, %475 : vector<32x32xf32>
    %cst_177 = arith.constant dense<0.000000e+00> : vector<32xf32>
    %477 = vector.multi_reduction <add>, %476, %cst_177 [1] : vector<32x32xf32> to vector<32xf32>
    %478 = vector.shape_cast %477 : vector<32xf32> to vector<32x1xf32>
    %cst_178 = arith.constant 3.200000e+01 : f32
    %479 = vector.broadcast %cst_178 : f32 to vector<32x1xf32>
    %480 = arith.divf %478, %479 : vector<32x1xf32>
    %481 = vector.broadcast %473 : vector<32x1xf32> to vector<32x32xf32>
    %482 = arith.subf %465, %481 : vector<32x32xf32>
    %cst_179 = arith.constant 9.99999974E-6 : f32
    %483 = vector.broadcast %cst_179 : f32 to vector<32x1xf32>
    %484 = arith.addf %480, %483 : vector<32x1xf32>
    %485 = math.rsqrt %484 : vector<32x1xf32>
    %486 = vector.broadcast %485 : vector<32x1xf32> to vector<32x32xf32>
    %487 = arith.mulf %482, %486 : vector<32x32xf32>
    %488 = vector.broadcast %467 : vector<1x32xf32> to vector<32x32xf32>
    %489 = arith.mulf %487, %488 : vector<32x32xf32>
    %490 = vector.broadcast %469 : vector<1x32xf32> to vector<32x32xf32>
    %491 = arith.addf %489, %490 : vector<32x32xf32>
    %c0_180 = arith.constant 0 : index
    %c0_181 = arith.constant 0 : index
    %492 = vector.load %arg17[%c0_180, %c0_181] : memref<32x32xf32, #tpu.memory_space<vmem>>, vector<32x32xf32>
    tpu.vector_store %arg17[%c0_180, %c0_181], %491 {strides = array<i32>} : memref<32x32xf32, #tpu.memory_space<vmem>>, vector<32x32xf32>,
    return
  }
  func.func @transform_0(%arg0: i32, %arg1: memref<2xi32, #tpu.memory_space<smem>>) -> (i32, i32) {
    %c0_i32 = arith.constant 0 : i32
    %c0_i32_0 = arith.constant 0 : i32
    %c0_i32_1 = arith.constant 0 : i32
    return %c0_i32, %c0_i32_0 : i32, i32
  }
  func.func @transform_1(%arg0: i32, %arg1: memref<2xi32, #tpu.memory_space<smem>>) -> (i32, i32) {
    %c0_i32 = arith.constant 0 : i32
    %c0_i32_0 = arith.constant 0 : i32
    %c0_i32_1 = arith.constant 0 : i32
    return %c0_i32, %c0_i32_0 : i32, i32
  }
  func.func @transform_2(%arg0: i32, %arg1: memref<2xi32, #tpu.memory_space<smem>>) -> (i32, i32) {
    %c0_i32 = arith.constant 0 : i32
    %c0_i32_0 = arith.constant 0 : i32
    %c0_i32_1 = arith.constant 0 : i32
    return %c0_i32, %c0_i32_0 : i32, i32
  }
  func.func @transform_3(%arg0: i32, %arg1: memref<2xi32, #tpu.memory_space<smem>>) -> (i32, i32, i32) {
    %c0_i32 = arith.constant 0 : i32
    %c0_i32_0 = arith.constant 0 : i32
    %c0_i32_1 = arith.constant 0 : i32
    %c0_i32_2 = arith.constant 0 : i32
    return %c0_i32, %c0_i32_0, %c0_i32_1 : i32, i32, i32
  }
  func.func @transform_4(%arg0: i32, %arg1: memref<2xi32, #tpu.memory_space<smem>>) -> (i32, i32, i32) {
    %c0_i32 = arith.constant 0 : i32
    %c0_i32_0 = arith.constant 0 : i32
    %c0_i32_1 = arith.constant 0 : i32
    %c0_i32_2 = arith.constant 0 : i32
    return %c0_i32, %c0_i32_0, %c0_i32_1 : i32, i32, i32
  }
  func.func @transform_5(%arg0: i32, %arg1: memref<2xi32, #tpu.memory_space<smem>>) -> (i32, i32, i32) {
    %c0_i32 = arith.constant 0 : i32
    %c0_i32_0 = arith.constant 0 : i32
    %c0_i32_1 = arith.constant 0 : i32
    %c0_i32_2 = arith.constant 0 : i32
    return %c0_i32, %c0_i32_0, %c0_i32_1 : i32, i32, i32
  }
  func.func @transform_6(%arg0: i32, %arg1: memref<2xi32, #tpu.memory_space<smem>>) -> (i32, i32, i32) {
    %c0_i32 = arith.constant 0 : i32
    %c0_i32_0 = arith.constant 0 : i32
    %c0_i32_1 = arith.constant 0 : i32
    %c0_i32_2 = arith.constant 0 : i32
    return %c0_i32, %c0_i32_0, %c0_i32_1 : i32, i32, i32
  }
  func.func @transform_7(%arg0: i32, %arg1: memref<2xi32, #tpu.memory_space<smem>>) -> (i32, i32, i32) {
    %c0_i32 = arith.constant 0 : i32
    %c0_i32_0 = arith.constant 0 : i32
    %c0_i32_1 = arith.constant 0 : i32
    %c0_i32_2 = arith.constant 0 : i32
    return %c0_i32, %c0_i32_0, %c0_i32_1 : i32, i32, i32
  }
  func.func @transform_8(%arg0: i32, %arg1: memref<2xi32, #tpu.memory_space<smem>>) -> (i32, i32, i32) {
    %c0_i32 = arith.constant 0 : i32
    %c0_i32_0 = arith.constant 0 : i32
    %c0_i32_1 = arith.constant 0 : i32
    %c0_i32_2 = arith.constant 0 : i32
    return %c0_i32, %c0_i32_0, %c0_i32_1 : i32, i32, i32
  }
  func.func @transform_9(%arg0: i32, %arg1: memref<2xi32, #tpu.memory_space<smem>>) -> (i32, i32, i32) {
    %c0_i32 = arith.constant 0 : i32
    %c0_i32_0 = arith.constant 0 : i32
    %c0_i32_1 = arith.constant 0 : i32
    %c0_i32_2 = arith.constant 0 : i32
    return %c0_i32, %c0_i32_0, %c0_i32_1 : i32, i32, i32
  }
  func.func @transform_10(%arg0: i32, %arg1: memref<2xi32, #tpu.memory_space<smem>>) -> (i32, i32, i32) {
    %c0_i32 = arith.constant 0 : i32
    %c0_i32_0 = arith.constant 0 : i32
    %c0_i32_1 = arith.constant 0 : i32
    %c0_i32_2 = arith.constant 0 : i32
    return %c0_i32, %c0_i32_0, %c0_i32_1 : i32, i32, i32
  }
  func.func @transform_11(%arg0: i32, %arg1: memref<2xi32, #tpu.memory_space<smem>>) -> (i32, i32, i32) {
    %c0_i32 = arith.constant 0 : i32
    %c0_i32_0 = arith.constant 0 : i32
    %c0_i32_1 = arith.constant 0 : i32
    %c0_i32_2 = arith.constant 0 : i32
    return %c0_i32, %c0_i32_0, %c0_i32_1 : i32, i32, i32
  }
  func.func @transform_12(%arg0: i32, %arg1: memref<2xi32, #tpu.memory_space<smem>>) -> (i32, i32, i32) {
    %c0_i32 = arith.constant 0 : i32
    %c0_i32_0 = arith.constant 0 : i32
    %c0_i32_1 = arith.constant 0 : i32
    %c0_i32_2 = arith.constant 0 : i32
    return %c0_i32, %c0_i32_0, %c0_i32_1 : i32, i32, i32
  }
  func.func @transform_13(%arg0: i32, %arg1: memref<2xi32, #tpu.memory_space<smem>>) -> (i32, i32, i32) {
    %c0_i32 = arith.constant 0 : i32
    %c0_i32_0 = arith.constant 0 : i32
    %c0_i32_1 = arith.constant 0 : i32
    %c0_i32_2 = arith.constant 0 : i32
    return %c0_i32, %c0_i32_0, %c0_i32_1 : i32, i32, i32
  }
  func.func @transform_14(%arg0: i32, %arg1: memref<2xi32, #tpu.memory_space<smem>>) -> (i32, i32, i32) {
    %c0_i32 = arith.constant 0 : i32
    %c0_i32_0 = arith.constant 0 : i32
    %c0_i32_1 = arith.constant 0 : i32
    %c0_i32_2 = arith.constant 0 : i32
    return %c0_i32, %c0_i32_0, %c0_i32_1 : i32, i32, i32
  }
  func.func @transform_15(%arg0: i32, %arg1: memref<2xi32, #tpu.memory_space<smem>>) -> (i32, i32) {
    %c0_i32 = arith.constant 0 : i32
    %c0_i32_0 = arith.constant 0 : i32
    %c0_i32_1 = arith.constant 0 : i32
    return %c0_i32, %c0_i32_0 : i32, i32
  }
}

</mosaic_0001>

<bundles_post_ra>
// kernel: tpu_custom_call.1
= control target key start
LH: loop header
LB: loop body
LE: loop exit
PB: predicated region body
PF: predicated region fallthrough
CT: control target
= control target key end

     0   :  { %s3613_s24 = smov [#allocation3]   ;;  %s4656_s0 = inlined_call_operand.hbm [shape: s32[2], index: 0, kind: input, shape index: {}]   ;;  %s4657_s1 = inlined_call_operand.hbm [shape: f32[32,32], index: 1, kind: input, shape index: {}]   ;;  %s4658_s2 = inlined_call_operand.hbm [shape: f32[1,32], index: 2, kind: input, shape index: {}]   ;;  %s4659_s3 = inlined_call_operand.hbm [shape: f32[1,32], index: 3, kind: input, shape index: {}]   ;;  %s4660_s4 = inlined_call_operand.hbm [shape: bf16[2,32,96], index: 4, kind: input, shape index: {}]   ;;  %s4661_s5 = inlined_call_operand.vmem [shape: f32[2,1,96], index: 5, kind: input, shape index: {}]   ;;  %s4662_s6 = inlined_call_operand.hbm [shape: bf16[2,32,32], index: 6, kind: input, shape index: {}]   ;;  %s4663_s7 = inlined_call_operand.vmem [shape: f32[2,1,32], index: 7, kind: input, shape index: {}]   ;;  %s4664_s8 = inlined_call_operand.vmem [shape: f32[2,1,32], index: 8, kind: input, shape index: {}]   ;;  %s4665_s9 = inlined_call_operand.vmem [shape: f32[2,1,32], index: 9, kind: input, shape index: {}]   ;;  %s4666_s10 = inlined_call_operand.hbm [shape: bf16[2,32,32], index: 10, kind: input, shape index: {}]   ;;  %s4667_s11 = inlined_call_operand.vmem [shape: f32[2,1,32], index: 11, kind: input, shape index: {}]   ;;  %s4668_s12 = inlined_call_operand.hbm [shape: bf16[2,32,32], index: 12, kind: input, shape index: {}]   ;;  %s4669_s13 = inlined_call_operand.vmem [shape: f32[2,1,32], index: 13, kind: input, shape index: {}]   ;;  %s4670_s14 = inlined_call_operand.hbm [shape: f32[2,1,32], index: 14, kind: input, shape index: {}]   ;;  %s4671_s15 = inlined_call_operand.vmem [shape: f32[2,1,32], index: 15, kind: input, shape index: {}]   ;;  %s4672_s16 = inlined_call_operand.hbm [shape: f32[32,32], index: 16, kind: output, shape index: {}]  }
   0x1   :  { %4674 = sst [smem:[#allocation26_spill]] %s4656_s0 }
   0x2   :  { %4675 = sst [smem:[#allocation27_spill]] %s4665_s9 }
   0x3   :  { %s4676_s23 = sld [smem:[#allocation26_spill]] }
   0x9   :  { %s22_s9 = sshll.u32 %s4676_s23, 4  ;;  %s23_s9 = int_to_ptr.hbm [resolvable:$true] %s22_s9 }
   0xa   :  { %25 = dma.hbm_to_smem %s23_s9, 16, %s3613_s24, [#allocation2] }
   0xb   :  { %3599 = dma.done.wait [#allocation2], 16 }
   0xc   :  { %3600 = vsyncadd [#allocation2], 4294967280 }
   0xd   :  { %28 = sfence }
   0xe   :  { %29 = vsyncpa [#allocation5], 0 }
   0xf   :  { %30 = vsyncpa [#allocation8], 0 }
  0x10   :  { %31 = vsyncpa [#allocation11], 0 }
  0x11   :  { %32 = vsyncpa [#allocation14], 0 }
  0x12   :  { %33 = vsyncpa [#allocation17], 0  ;;  %s53_s27 = sshll.u32 %s4658_s2, 4  ;;  %s54_s27 = int_to_ptr.hbm [resolvable:$true] %s53_s27 }
  0x13   :  { %34 = vsyncpa [#allocation6], 0  ;;  %s3614_s28 = smov [#allocation7]   ;;  %s74_s9 = sshll.u32 %s4660_s4, 4  ;;  %s75_s9 = int_to_ptr.hbm [resolvable:$true] %s74_s9 }
  0x14   :  { %s55_s29 = sshll.u32 %s3614_s28, 4  ;;  %s3615_s17 = smov [#allocation10]   ;;  %s56_s29 = int_to_ptr.vmem [resolvable:$true] %s55_s29 }
  0x15   :  { %58 = dma.hbm_to_vmem [thread:$0]  %s54_s27, 16, %s56_s29, [#allocation8]  }
  0x16   :  { %s76_s18 = sshll.u32 %s3615_s17, 4  ;;  %s3616_s19 = smov 64   ;;  %s77_s18 = int_to_ptr.vmem [resolvable:$true] %s76_s18 }
  0x17   :  { %s3617_s20 = smov 4   ;;  %s108_s22 = sshll.u32 %s4666_s10, 4  ;;  %s109_s22 = int_to_ptr.hbm [resolvable:$true] %s108_s22 }
  0x18   :  { %82 = dma.hbm_to_vmem [thread:$0]  %s75_s9, 512, %s77_s18, [#allocation11], %s3616_s19, %s3616_s19, %s3617_s20  }
  0x19   :  { %s3618_s23 = smov [#allocation13]   ;;  %s39_s26 = sshll.u32 %s4657_s1, 4  ;;  %s40_s26 = int_to_ptr.hbm [resolvable:$true] %s39_s26 }
  0x1a   :  { %s110_s24 = sshll.u32 %s3618_s23, 4  ;;  %s3619_s27 = smov [#allocation4]   ;;  %s111_s24 = int_to_ptr.vmem [resolvable:$true] %s110_s24 }
  0x1b   :  { %116 = dma.hbm_to_vmem [thread:$0]  %s109_s22, 512, %s111_s24, [#allocation14], %s3616_s19, %s3616_s19, %s3617_s20  }
  0x1c   :  { %s41_s28 = sshll.u32 %s3619_s27, 4  ;;  %s3620_s29 = smov 128   ;;  %s42_s28 = int_to_ptr.vmem [resolvable:$true] %s41_s28 }
  0x1d   :  { %s3621_s30 = smov 8   ;;  %s64_s9 = sshll.u32 %s4659_s3, 4  ;;  %s65_s9 = int_to_ptr.hbm [resolvable:$true] %s64_s9 }
  0x1e   :  { %47 = dma.hbm_to_vmem [thread:$0]  %s40_s26, 512, %s42_s28, [#allocation5], %s3620_s29, %s3620_s29, %s3621_s30  }
  0x1f   :  { %s3622_s1 = smov [#allocation9]   ;;  %s89_s21 = sshll.u32 %s4662_s6, 4  ;;  %s90_s21 = int_to_ptr.hbm [resolvable:$true] %s89_s21 }
  0x20   :  { %s66_s17 = sshll.u32 %s3622_s1, 4  ;;  %s3623_s22 = smov [#allocation12]   ;;  %s67_s17 = int_to_ptr.vmem [resolvable:$true] %s66_s17 }
  0x21   :  { %69 = dma.hbm_to_vmem [thread:$0]  %s65_s9, 16, %s67_s17, [#allocation8]  }
  0x22   :  { %s91_s23 = sshll.u32 %s3623_s22, 4  ;;  %s123_s25 = sshll.u32 %s4668_s12, 4  ;;  %s92_s23 = int_to_ptr.vmem [resolvable:$true] %s91_s23  ;;  %s124_s25 = int_to_ptr.hbm [resolvable:$true] %s123_s25 }
  0x23   :  { %97 = dma.hbm_to_vmem [thread:$0]  %s90_s21, 512, %s92_s23, [#allocation11], %s3616_s19, %s3616_s19, %s3617_s20  }
  0x24   :  { %s138_s27 = sshll.u32 %s4670_s14, 4  ;;  %s3624_s28 = smov [#allocation15]   ;;  %s139_s27 = int_to_ptr.hbm [resolvable:$true] %s138_s27 }
  0x25   :  { %s125_s6 = sshll.u32 %s3624_s28, 4  ;;  %s3625_s10 = smov [#allocation16]   ;;  %s126_s6 = int_to_ptr.vmem [resolvable:$true] %s125_s6 }
  0x26   :  { %131 = dma.hbm_to_vmem [thread:$0]  %s124_s25, 512, %s126_s6, [#allocation14], %s3616_s19, %s3616_s19, %s3617_s20  }
  0x27   :  { %s140_s12 = sshll.u32 %s3625_s10, 4  ;;  %s3626_s0 = smov 16   ;;  %s141_s12 = int_to_ptr.vmem [resolvable:$true] %s140_s12 }
  0x28   :  { %s3627_s9 = smov 1  }
  0x29   :  { %146 = dma.hbm_to_vmem [thread:$0]  %s139_s27, 32, %s141_s12, [#allocation17], %s3626_s0, %s3626_s0, %s3627_s9  }
  0x2a   :  { %3601 = dma.done.wait [#allocation5], 512  }
  0x2b   :  { %3602 = vsyncadd [#allocation5], 4294966784 }
  0x2c   :  { %3603 = dma.done.wait [#allocation8], 32  }
  0x2d   :  { %3604 = vsyncadd [#allocation8], 4294967264 }
  0x2e   :  { %3605 = dma.done.wait [#allocation11], 1024  }
  0x2f   :  { %3606 = vsyncadd [#allocation11], 4294966272 }
  0x30   :  { %3607 = dma.done.wait [#allocation14], 1024  }
  0x31   :  { %3608 = vsyncadd [#allocation14], 4294966272 }
  0x32   :  { %3609 = dma.done.wait [#allocation17], 32  }
  0x33   :  { %3610 = vsyncadd [#allocation17], 4294967264  ;;  %vm198_vm0 = vcmask 261120   ;;  %v182_v0 = vld [vmem:[#allocation4] sm:$0xff]  ;;  %v183_v2 = vld [vmem:[#allocation4 + $0x8] sm:$0xff]  ;;  %v3628_v4 = vmov 32.0  }
  0x34   :  { %v199_v1 = vsel %vm198_vm0, %v182_v0, 0.0  ;;  %v202_v3 = vsel %vm198_vm0, %v183_v2, 0.0  ;;  %3201 = vrcp.f32 %v3628_v4  ;;  %v2999_v21 = vld [vmem:[#allocation10 + $0x8] sm:$0xff]  ;;  %v2998_v23 = vld [vmem:[#allocation10] sm:$0xff]  ;;  %v3782_v44 = vld [vmem:[#allocation7] ss:$0 sm:$0xff] }
  0x35   :  { %200 = vadd.xlane.f32.xlu0 %v199_v1  ;;  %342 = vmatpush.bf16.msra.mxu0 %v2999_v21  ;;  %v184_v26 = vld [vmem:[#allocation4 + $0x10] sm:$0xff]  ;;  %v3785_v49 = vld [vmem:[#allocation9] ss:$0 sm:$0xff]  ;;  %v3800_v54 = vld [vmem:[%s4661_s5] ss:$0 sm:$0xff]  ;;  %s3629_s1 = smov 120  }
  0x36   :  { %v205_v28 = vsel %vm198_vm0, %v184_v26, 0.0  ;;  %s3630_s17 = smov 88   ;;  %s3631_s18 = smov 96   ;;  %vm361_vm8 = vcmask 64512   ;;  %vm393_vm10 = vcmask 130048  }
  0x37   :  { %s3632_s2 = smov 72   ;;  %s3633_s21 = smov 104  }
  0x38   :  { %s3634_s22 = smov 80   ;;  %s3635_s23 = smov 112  }
  0x39   :  { %343 = vmatpush.bf16.msra.mxu0 %v2998_v23  ;;  %s3636_s24 = smov 56   ;;  %s188_s4 = sld [smem:[#allocation3]] }
  0x3a   :  { %v3202_v5 = vpop.eup %3201  ;;  %s2814_s25 = sld [smem:[#allocation3 + $0x1]]  ;;  %s3638_s3 = smov 48  }
  0x3b   :  { %v212_v6 = vmul.f32 32.0, %v3202_v5  ;;  %vm216_vm1 = vweird.f32 %v3202_v5  ;;  %s3639_s26 = smov 40   ;;  %s3640_s27 = smov 24  }
  0x3c   :  { %s4677_s20 = sld [smem:[#allocation27_spill]] }
  0x3d   :  { %203 = vadd.xlane.f32.xlu0 %v202_v3  ;;  %v213_v7 = vsub.f32 1.0, %v212_v6 }
  0x3f   :  { %v214_v8 = vmul.f32 %v3202_v5, %v213_v7  ;;  %v189_v21 = vstv %s188_s4 }
  0x41   :  { %v215_v9 = vadd.f32 %v3202_v5, %v214_v8 }
  0x43   :  { %v3773_v10 = vsel %vm216_vm1, %v3202_v5, %v215_v9 }
  0xa8   :  { %v201_v11 = vpop.xlane.xlu0 %200 }
  0xa9   :  { %v218_v12 = vmul.f32 %v3773_v10, %v201_v11 }
  0xab   :  { %v222_v13 = vsub.f32 %v182_v0, %v218_v12  ;;  %v185_v0 = vld [vmem:[#allocation4 + $0x18] sm:$0xff] }
  0xac   :  { %v208_v1 = vsel %vm198_vm0, %v185_v0, 0.0 }
  0xad   :  { %v226_v14 = vmul.f32 %v222_v13, %v222_v13 }
  0xaf   :  { %v230_v15 = vsel %vm198_vm0, %v226_v14, 0.0 }
  0xb0   :  { %231 = vadd.xlane.f32.xlu1 %v230_v15  ;;  %v204_v16 = vpop.xlane.xlu0 %203 }
  0xb1   :  { %v219_v17 = vmul.f32 %v3773_v10, %v204_v16 }
  0xb3   :  { %v223_v18 = vsub.f32 %v183_v2, %v219_v17 }
  0xb5   :  { %v227_v19 = vmul.f32 %v223_v18, %v223_v18 }
  0xb7   :  { %v233_v20 = vsel %vm198_vm0, %v227_v19, 0.0  ;;  %v186_v19 = vlaneseq }
  0xb8   :  { %234 = vadd.xlane.f32.xlu1 %v233_v20 }
  0xb9   :  { %v3848_v20 = vand.u32 127, %v186_v19 }
  0xbb   :  { %vm190_vm9 = vcmp.ge.s32.totalorder %v3848_v20, %v189_v21 }
  0xc0   :  { %206 = vadd.xlane.f32.xlu1 %v205_v28 }
 0x123   :  { %v232_v22 = vpop.xlane.xlu1 %231 }
 0x124   :  { %v242_v24 = vmul.f32 %v232_v22, %v3773_v10  ;;  %v3637_v22 = vmov 0.0  }
 0x125   :  { %v3852_v23 = vsel %vm190_vm9, -1e+09, %v3637_v22 }
 0x126   :  { %v246_v25 = vadd.f32 1e-05, %v242_v24 }
 0x128   :  { %3203 = vrsqrt.f32 %v246_v25  ;;  %vm256_vm3 = vweird.f32 %v246_v25 }
 0x12b   :  { %v235_v27 = vpop.xlane.xlu1 %234 }
 0x12c   :  { %v243_v29 = vmul.f32 %v235_v27, %v3773_v10 }
 0x12e   :  { %v3204_v30 = vpop.eup %3203  ;;  %v247_v31 = vadd.f32 1e-05, %v243_v29 }
 0x12f   :  { %v251_v32 = vmul.f32 %v3204_v30, %v246_v25  ;;  %vm257_vm2 = vweird.f32 %v3204_v30 }
 0x130   :  { %3205 = vrsqrt.f32 %v247_v31  ;;  %vm258_vm4 = vmor %vm256_vm3, %vm257_vm2  ;;  %vm266_vm6 = vweird.f32 %v247_v31  ;;  %vm767_vm3 = vcmask 195584  }
 0x131   :  { %v252_v33 = vmul.f32 %v3204_v30, %v251_v32 }
 0x133   :  { %v253_v34 = vmul.f32 0.5, %v252_v33  ;;  %v207_v59 = vpop.xlane.xlu1 %206 }
 0x134   :  { %v220_v60 = vmul.f32 %v3773_v10, %v207_v59 }
 0x135   :  { %v254_v35 = vsub.f32 1.5, %v253_v34 }
 0x136   :  { %v3206_v36 = vpop.eup %3205  ;;  %v3809_v61 = vsub.f32 %v184_v26, %v220_v60 }
 0x137   :  { %v255_v37 = vmul.f32 %v3204_v30, %v254_v35  ;;  %v261_v38 = vmul.f32 %v3206_v36, %v247_v31  ;;  %vm267_vm5 = vweird.f32 %v3206_v36 }
 0x138   :  { %vm268_vm7 = vmor %vm266_vm6, %vm267_vm5  ;;  %v228_v62 = vmul.f32 %v3809_v61, %v3809_v61 }
 0x139   :  { %v262_v39 = vmul.f32 %v3206_v36, %v261_v38  ;;  %v259_v40 = vsel %vm258_vm4, %v3204_v30, %v255_v37 }
 0x13a   :  { %v290_v43 = vmul.f32 %v259_v40, %v222_v13  ;;  %v236_v63 = vsel %vm198_vm0, %v228_v62, 0.0 }
 0x13b   :  { %v263_v41 = vmul.f32 0.5, %v262_v39 }
 0x13c   :  { %v297_v48 = vmul.f32 %v3782_v44, %v290_v43 }
 0x13d   :  { %v264_v42 = vsub.f32 1.5, %v263_v41 }
 0x13e   :  { %v3789_v51 = vadd.f32 %v3785_v49, %v297_v48 }
 0x13f   :  { %v265_v45 = vmul.f32 %v3206_v36, %v264_v42 }
 0x141   :  { %v269_v46 = vsel %vm268_vm7, %v3206_v36, %v265_v45 }
 0x142   :  { %v291_v47 = vmul.f32 %v269_v46, %v223_v18 }
 0x144   :  { %v298_v50 = vmul.f32 %v3782_v44, %v291_v47 }
 0x146   :  { %v3792_v52 = vadd.f32 %v3785_v49, %v298_v50 }
 0x148   :  { %v308_v53 = vpack.c.bf16 %v3792_v52, %v3789_v51 }
 0x14a   :  { %2823 = vmatmul.msk.bf16.vlgmr.msra.gmra.mxu0 %vm198_vm0, %v308_v53 }
 0x1c7   :  { %v345_v55 = vpop.f32.mrf.mxu0 }
 0x1c8   :  { %v346_v56 = vadd.f32 %v3800_v54, %v345_v55 }
 0x1ca   :  { %451 = vrot.lane.b32.xlu0 %v346_v56, %s3629_s1  ;;  %455 = vrot.lane.b32.xlu2 %v346_v56, %s3630_s17 }
 0x1cf   :  { %v347_v57 = vpop.f32.mrf.mxu0 }
 0x1d0   :  { %v348_v58 = vadd.f32 %v3800_v54, %v347_v57 }
 0x1d2   :  { %453 = vrot.lane.b32.xlu1 %v348_v58, %s3629_s1  ;;  %457 = vrot.lane.b32.xlu2 %v348_v58, %s3630_s17  ;;  %v3843_v18 = vpack.i.bf16 %v346_v56, %v348_v58 }
 0x1f4   :  { %237 = vadd.xlane.f32.xlu0 %v236_v63 }
 0x1fb   :  { %209 = vadd.xlane.f32.xlu2 %v208_v1 }
 0x208   :  { %359 = vrot.lane.b32.xlu0 %v348_v58, %s3631_s18 }
 0x213   :  { %357 = vrot.lane.b32.xlu2 %v346_v56, %s3631_s18 }
 0x21b   :  { %647 = vrot.lane.b32.xlu2 %v346_v56, %s3632_s2 }
 0x223   :  { %643 = vrot.lane.b32.xlu2 %v346_v56, %s3633_s21 }
 0x224   :  { %v456_v2 = vpop.permute.xlu2 %455 }
 0x22b   :  { %553 = vrot.lane.b32.xlu2 %v348_v58, %s3634_s22 }
 0x22c   :  { %v458_v3 = vpop.permute.xlu2 %457 }
 0x22d   :  { %2831 = vmatpush.xpose.msk.msra.mxu3 %vm361_vm8, %v458_v3 }
 0x231   :  { %2832 = vmatpush.xpose.msk.msra.mxu3 %vm361_vm8, %v456_v2 }
 0x233   :  { %649 = vrot.lane.b32.xlu2 %v348_v58, %s3632_s2 }
 0x23b   :  { %645 = vrot.lane.b32.xlu2 %v348_v58, %s3633_s21 }
 0x23c   :  { %v452_v4 = vpop.permute.xlu0 %451 }
 0x23d   :  { %2833 = vmatmul.msk.f32.vlgmr.msra.gmra.mxu3 %vm361_vm8, %v452_v4 }
 0x244   :  { %v454_v5 = vpop.permute.xlu1 %453 }
 0x245   :  { %2834 = vmatmul.msk.f32.gmra.mxu3 %vm361_vm8, %v454_v5 }
 0x267   :  { %v238_v9 = vpop.xlane.xlu0 %237 }
 0x268   :  { %v244_v30 = vmul.f32 %v238_v9, %v3773_v10 }
 0x26a   :  { %v248_v31 = vadd.f32 1e-05, %v244_v30 }
 0x26c   :  { %3207 = vrsqrt.f32 %v248_v31  ;;  %vm276_vm11 = vweird.f32 %v248_v31 }
 0x26e   :  { %v210_v6 = vpop.xlane.xlu2 %209 }
 0x26f   :  { %v221_v7 = vmul.f32 %v3773_v10, %v210_v6 }
 0x271   :  { %v3827_v8 = vsub.f32 %v185_v0, %v221_v7 }
 0x272   :  { %v3208_v32 = vpop.eup %3207 }
 0x273   :  { %v229_v11 = vmul.f32 %v3827_v8, %v3827_v8  ;;  %v271_v33 = vmul.f32 %v3208_v32, %v248_v31  ;;  %vm277_vm12 = vweird.f32 %v3208_v32 }
 0x274   :  { %vm278_vm13 = vmor %vm276_vm11, %vm277_vm12 }
 0x275   :  { %v239_v12 = vsel %vm198_vm0, %v229_v11, 0.0  ;;  %v272_v34 = vmul.f32 %v3208_v32, %v271_v33 }
 0x276   :  { %240 = vadd.xlane.f32.xlu1 %v239_v12  ;;  %v358_v13 = vpop.permute.xlu2 %357 }
 0x277   :  { %v273_v38 = vmul.f32 0.5, %v272_v34 }
 0x279   :  { %v274_v39 = vsub.f32 1.5, %v273_v38 }
 0x27a   :  { %v360_v14 = vpop.permute.xlu0 %359 }
 0x27b   :  { %2825 = vmatpush.xpose.msk.msra.mxu1 %vm361_vm8, %v360_v14  ;;  %v275_v41 = vmul.f32 %v3208_v32, %v274_v39 }
 0x27d   :  { %v279_v45 = vsel %vm278_vm13, %v3208_v32, %v275_v41 }
 0x27e   :  { %v3833_v15 = vpop.permute.xlu2 %647  ;;  %v292_v48 = vmul.f32 %v279_v45, %v3809_v61 }
 0x27f   :  { %2826 = vmatpush.xpose.msk.msra.mxu1 %vm361_vm8, %v358_v13 }
 0x282   :  { %2827 = vmatmul.msk.f32.vlgmr.msra.gmra.mxu1 %vm361_vm8, %v346_v56 }
 0x286   :  { %v3837_v16 = vpop.permute.xlu2 %643 }
 0x28a   :  { %2828 = vmatmul.msk.f32.gmra.mxu1 %vm361_vm8, %v348_v58 }
 0x28e   :  { %v554_v17 = vpop.permute.xlu2 %553 }
 0x28f   :  { %551 = vrot.lane.b32.xlu1 %v346_v56, %s3634_s22  ;;  %2837 = vmatpush.xpose.msk.msrb.mxu1 %vm361_vm8, %v554_v17 }
 0x296   :  { %v650_v2 = vpop.permute.xlu2 %649 }
 0x297   :  { %547 = vrot.lane.b32.xlu1 %v346_v56, %s3635_s23  ;;  %v299_v56 = vmul.f32 %v3782_v44, %v292_v48 }
 0x299   :  { %v3872_v59 = vadd.f32 %v3785_v49, %v299_v56 }
 0x29e   :  { %v3897_v6 = vpop.permute.xlu2 %645 }
 0x29f   :  { %3044 = vrot.lane.b32.xlu1 %v3843_v18, %s3636_s24 }
 0x2a7   :  { %549 = vrot.lane.b32.xlu1 %v348_v58, %s3635_s23 }
 0x2c0   :  { %v484_v24 = vpop.f32.mrf.mxu3 }
 0x2c1   :  { %v3855_v25 = vadd.f32 %v484_v24, %v3852_v23 }
 0x2c3   :  { %v490_v26 = vsel %vm393_vm10, %v3855_v25, -inf }
 0x2c4   :  { %491 = vmax.xlane.f32.xlu2 %v490_v26 }
 0x2c8   :  { %v487_v27 = vpop.f32.mrf.mxu3 }
 0x2c9   :  { %v3860_v28 = vadd.f32 %v487_v27, %v3852_v23 }
 0x2cb   :  { %v493_v29 = vsel %vm393_vm10, %v3860_v28, -inf }
 0x2cc   :  { %494 = vmax.xlane.f32.xlu2 %v493_v29 }
 0x2e9   :  { %v241_v35 = vpop.xlane.xlu1 %240 }
 0x2ea   :  { %v245_v36 = vmul.f32 %v241_v35, %v3773_v10 }
 0x2ec   :  { %v249_v37 = vadd.f32 1e-05, %v245_v36 }
 0x2ee   :  { %3209 = vrsqrt.f32 %v249_v37  ;;  %vm286_vm15 = vweird.f32 %v249_v37 }
 0x2f4   :  { %v3210_v40 = vpop.eup %3209 }
 0x2f5   :  { %v281_v42 = vmul.f32 %v3210_v40, %v249_v37  ;;  %vm287_vm14 = vweird.f32 %v3210_v40 }
 0x2f6   :  { %vm288_vm1 = vmor %vm286_vm15, %vm287_vm14 }
 0x2f7   :  { %v282_v43 = vmul.f32 %v3210_v40, %v281_v42 }
 0x2f9   :  { %v283_v46 = vmul.f32 0.5, %v282_v43 }
 0x2fb   :  { %v284_v47 = vsub.f32 1.5, %v283_v46 }
 0x2fd   :  { %v285_v50 = vmul.f32 %v3210_v40, %v284_v47 }
 0x2ff   :  { %v289_v53 = vsel %vm288_vm1, %v3210_v40, %v285_v50  ;;  %v387_v19 = vpop.f32.mrf.mxu1 }
 0x300   :  { %v293_v55 = vmul.f32 %v289_v53, %v3827_v8  ;;  %v3918_v21 = vadd.f32 %v387_v19, %v3852_v23 }
 0x301   :  { %v552_v57 = vpop.permute.xlu1 %551 }
 0x302   :  { %2838 = vmatpush.xpose.msk.msrb.mxu1 %vm361_vm8, %v552_v57  ;;  %v300_v58 = vmul.f32 %v3782_v44, %v293_v55  ;;  %v394_v24 = vsel %vm393_vm10, %v3918_v21, -inf }
 0x304   :  { %v3875_v60 = vadd.f32 %v3785_v49, %v300_v58  ;;  %v193_v58 = vstv %s2814_s25 }
 0x305   :  { %vm194_vm2 = vcmp.ge.s32.totalorder %v3848_v20, %v193_v58 }
 0x306   :  { %v309_v61 = vpack.c.bf16 %v3875_v60, %v3872_v59 }
 0x308   :  { %2824 = vmatmul.msk.bf16.gmra.mxu0 %vm198_vm0, %v309_v61 }
 0x309   :  { %v548_v62 = vpop.permute.xlu1 %547 }
 0x30a   :  { %2839 = vmatmul.msk.f32.vlgmr.msrb.gmra.mxu1 %vm361_vm8, %v548_v62  ;;  %v3965_v62 = vsel %vm194_vm2, -1e+09, %v3637_v22 }
 0x311   :  { %v3045_v63 = vpop.permute.xlu1 %3044 }
 0x312   :  { %v3046_v0 = vunpack.i.l.bf16 %v3045_v63  ;;  %v3047_v1 = vunpack.i.h.bf16 %v3045_v63 }
 0x314   :  { %538 = vmatpush.msra.mxu2 %v3046_v0 }
 0x316   :  { %539 = vmatpush.msra.mxu2 %v3047_v1 }
 0x318   :  { %2843 = vmatpush.xpose.msk.msrb.mxu2 %vm361_vm8, %v650_v2 }
 0x319   :  { %v550_v44 = vpop.permute.xlu1 %549 }
 0x31a   :  { %2840 = vmatmul.msk.f32.gmra.mxu1 %vm361_vm8, %v550_v44 }
 0x31c   :  { %2844 = vmatpush.xpose.msk.msrb.mxu2 %vm361_vm8, %v3833_v15 }
 0x337   :  { %v492_v7 = vpop.xlane.xlu2 %491 }
 0x338   :  { %v496_v8 = vsub.f32 %v3855_v25, %v492_v7  ;;  %v390_v25 = vpop.f32.mrf.mxu1 }
 0x33a   :  { %v498_v9 = vmul.f32 1.442695, %v496_v8 }
 0x33c   :  { %3211 = vpow2.f32 %v498_v9 }
 0x342   :  { %v3212_v13 = vpop.eup %3211 }
 0x343   :  { %v502_v14 = vsel %vm393_vm10, %v3212_v13, 0.0 }
 0x385   :  { %v350_v49 = vpop.f32.mrf.mxu0 }
 0x386   :  { %v3886_v3 = vadd.f32 %v3800_v54, %v350_v49 }
 0x387   :  { %v580_v26 = vpop.f32.mrf.mxu1 }
 0x388   :  { %772 = vrot.lane.b32.xlu2 %v3886_v3, %s3631_s18  ;;  %v581_v29 = vadd.f32 %v580_v26, %v3852_v23 }
 0x38a   :  { %v586_v33 = vsel %vm393_vm10, %v581_v29, -inf }
 0x38d   :  { %v352_v4 = vpop.f32.mrf.mxu0 }
 0x38e   :  { %v3891_v5 = vadd.f32 %v3800_v54, %v352_v4  ;;  %v495_v54 = vpop.xlane.xlu2 %494 }
 0x38f   :  { %v497_v11 = vsub.f32 %v3860_v28, %v495_v54  ;;  %v3931_v28 = vadd.f32 %v390_v25, %v3852_v23 }
 0x390   :  { %870 = vrot.lane.b32.xlu1 %v3891_v5, %s3630_s17  ;;  %774 = vrot.lane.b32.xlu0 %v3891_v5, %s3631_s18 }
 0x391   :  { %v500_v12 = vmul.f32 1.442695, %v497_v11  ;;  %v397_v31 = vsel %vm393_vm10, %v3931_v28, -inf }
 0x393   :  { %3213 = vpow2.f32 %v500_v12 }
 0x397   :  { %v583_v32 = vpop.f32.mrf.mxu1 }
 0x398   :  { %868 = vrot.lane.b32.xlu1 %v3886_v3, %s3630_s17  ;;  %v584_v34 = vadd.f32 %v583_v32, %v3852_v23 }
 0x399   :  { %v3214_v15 = vpop.eup %3213 }
 0x39a   :  { %v505_v17 = vsel %vm393_vm10, %v3214_v15, 0.0  ;;  %v589_v35 = vsel %vm393_vm10, %v584_v34, -inf }
 0x3a0   :  { %866 = vrot.lane.b32.xlu1 %v3891_v5, %s3629_s1 }
 0x3a8   :  { %964 = vrot.lane.b32.xlu1 %v3886_v3, %s3634_s22 }
 0x3b0   :  { %1056 = vrot.lane.b32.xlu1 %v3886_v3, %s3633_s21 }
 0x3b1   :  { %503 = vadd.xlane.f32.xlu2 %v502_v14 }
 0x3ba   :  { %506 = vadd.xlane.f32.xlu0 %v505_v17 }
 0x3c9   :  { %864 = vrot.lane.b32.xlu2 %v3886_v3, %s3629_s1 }
 0x3ce   :  { %966 = vrot.lane.b32.xlu0 %v3891_v5, %s3634_s22 }
 0x3d1   :  { %1062 = vrot.lane.b32.xlu2 %v3891_v5, %s3632_s2 }
 0x3d6   :  { %1060 = vrot.lane.b32.xlu0 %v3886_v3, %s3632_s2 }
 0x3d9   :  { %960 = vrot.lane.b32.xlu2 %v3886_v3, %s3635_s23 }
 0x3da   :  { %395 = vmax.xlane.f32.xlu1 %v394_v24 }
 0x3de   :  { %962 = vrot.lane.b32.xlu0 %v3891_v5, %s3635_s23 }
 0x3e1   :  { %1058 = vrot.lane.b32.xlu2 %v3891_v5, %s3633_s21 }
 0x3e2   :  { %v773_v30 = vpop.permute.xlu2 %772 }
 0x402   :  { %v775_v27 = vpop.permute.xlu0 %774  ;;  %v871_v37 = vpop.permute.xlu1 %870 }
 0x403   :  { %2849 = vmatpush.xpose.msk.msra.mxu1 %vm361_vm8, %v775_v27 }
 0x407   :  { %2850 = vmatpush.xpose.msk.msra.mxu1 %vm361_vm8, %v773_v30 }
 0x408   :  { %398 = vmax.xlane.f32.xlu0 %v397_v31 }
 0x40a   :  { %587 = vmax.xlane.f32.xlu2 %v586_v33  ;;  %2851 = vmatmul.msk.f32.vlgmr.msra.gmra.mxu1 %vm361_vm8, %v3886_v3  ;;  %v869_v41 = vpop.permute.xlu1 %868 }
 0x410   :  { %590 = vmax.xlane.f32.xlu0 %v589_v35 }
 0x412   :  { %2852 = vmatmul.msk.f32.gmra.mxu1 %vm361_vm8, %v3891_v5  ;;  %v867_v46 = vpop.permute.xlu1 %866 }
 0x41a   :  { %v965_v50 = vpop.permute.xlu1 %964 }
 0x422   :  { %v1057_v56 = vpop.permute.xlu1 %1056 }
 0x424   :  { %v504_v36 = vpop.xlane.xlu2 %503 }
 0x425   :  { %3215 = vrcp.f32 %v504_v36 }
 0x42b   :  { %v3216_v38 = vpop.eup %3215 }
 0x42c   :  { %v510_v39 = vmul.f32 %v3216_v38, %v3212_v13  ;;  %v865_v42 = vpop.permute.xlu2 %864 }
 0x42d   :  { %v507_v40 = vpop.xlane.xlu0 %506 }
 0x42e   :  { %3217 = vrcp.f32 %v507_v40  ;;  %2835 = vmatmul.msk.f32.vlgmr.msra.gmra.mxu2 %vm393_vm10, %v510_v39 }
 0x42f   :  { %2855 = vmatpush.xpose.msk.msra.mxu2 %vm361_vm8, %v871_v37 }
 0x433   :  { %2856 = vmatpush.xpose.msk.msra.mxu2 %vm361_vm8, %v869_v41 }
 0x434   :  { %v3218_v43 = vpop.eup %3217  ;;  %v1063_v47 = vpop.permute.xlu2 %1062 }
 0x435   :  { %v511_v45 = vmul.f32 %v3218_v43, %v3214_v15 }
 0x437   :  { %2836 = vmatmul.msk.f32.gmra.mxu2 %vm393_vm10, %v511_v45 }
 0x43c   :  { %v961_v53 = vpop.permute.xlu2 %960 }
 0x43f   :  { %2845 = vmatmul.msk.f32.vlgmr.msrb.gmra.mxu2 %vm361_vm8, %v3837_v16 }
 0x440   :  { %2867 = vmatpush.xpose.msk.msrb.mxu2 %vm361_vm8, %v1063_v47  ;;  %v967_v48 = vpop.permute.xlu0 %966 }
 0x441   :  { %2861 = vmatpush.xpose.msk.msrb.mxu1 %vm361_vm8, %v967_v48 }
 0x444   :  { %v1059_v57 = vpop.permute.xlu2 %1058 }
 0x445   :  { %2862 = vmatpush.xpose.msk.msrb.mxu1 %vm361_vm8, %v965_v50  ;;  %v4031_v50 = vpack.i.bf16 %v3886_v3, %v3891_v5 }
 0x447   :  { %2846 = vmatmul.msk.f32.gmra.mxu2 %vm361_vm8, %v3897_v6 }
 0x448   :  { %v1061_v55 = vpop.permute.xlu0 %1060  ;;  %2863 = vmatmul.msk.f32.vlgmr.msrb.gmra.mxu1 %vm361_vm8, %v961_v53 }
 0x449   :  { %2868 = vmatpush.xpose.msk.msrb.mxu2 %vm361_vm8, %v1061_v55 }
 0x44d   :  { %v396_v17 = vpop.xlane.xlu1 %395 }
 0x44e   :  { %v400_v19 = vsub.f32 %v3918_v21, %v396_v17 }
 0x44f   :  { %2857 = vmatmul.msk.f32.vlgmr.msra.gmra.mxu2 %vm361_vm8, %v865_v42 }
 0x450   :  { %v963_v16 = vpop.permute.xlu0 %962  ;;  %v402_v25 = vmul.f32 1.442695, %v400_v19 }
 0x451   :  { %2864 = vmatmul.msk.f32.gmra.mxu1 %vm361_vm8, %v963_v16 }
 0x457   :  { %2858 = vmatmul.msk.f32.gmra.mxu2 %vm361_vm8, %v867_v46 }
 0x45f   :  { %2869 = vmatmul.msk.f32.vlgmr.msrb.gmra.mxu2 %vm361_vm8, %v1057_v56 }
 0x467   :  { %2870 = vmatmul.msk.f32.gmra.mxu2 %vm361_vm8, %v1059_v57 }
 0x47b   :  { %v399_v61 = vpop.xlane.xlu0 %398 }
 0x47d   :  { %v588_v63 = vpop.xlane.xlu2 %587 }
 0x47e   :  { %v592_v2 = vsub.f32 %v581_v29, %v588_v63  ;;  %v401_v29 = vsub.f32 %v3931_v28, %v399_v61 }
 0x480   :  { %v594_v49 = vmul.f32 1.442695, %v592_v2  ;;  %v404_v32 = vmul.f32 1.442695, %v401_v29 }
 0x482   :  { %3219 = vpow2.f32 %v594_v49 }
 0x483   :  { %v591_v4 = vpop.xlane.xlu0 %590 }
 0x484   :  { %v593_v20 = vsub.f32 %v584_v34, %v591_v4 }
 0x486   :  { %v596_v8 = vmul.f32 1.442695, %v593_v20 }
 0x487   :  { %v801_v0 = vpop.f32.mrf.mxu1 }
 0x488   :  { %v3968_v1 = vadd.f32 %v801_v0, %v3965_v62  ;;  %v3977_v9 = vpop.eup %3219  ;;  %3221 = vpow2.f32 %v596_v8 }
 0x489   :  { %v598_v54 = vsel %vm393_vm10, %v3977_v9, 0.0  ;;  %3223 = vpow2.f32 %v402_v25 }
 0x48a   :  { %v807_v44 = vsel %vm393_vm10, %v3968_v1, -inf  ;;  %3225 = vpow2.f32 %v404_v32 }
 0x48b   :  { %808 = vmax.xlane.f32.xlu1 %v807_v44 }
 0x48e   :  { %v3981_v11 = vpop.eup %3221 }
 0x48f   :  { %v804_v6 = vpop.f32.mrf.mxu1  ;;  %v601_v12 = vsel %vm393_vm10, %v3981_v11, 0.0  ;;  %v3998_v34 = vpop.eup %3223 }
 0x490   :  { %v3973_v7 = vadd.f32 %v804_v6, %v3965_v62  ;;  %v406_v28 = vsel %vm393_vm10, %v3998_v34, 0.0  ;;  %v4009_v39 = vpop.eup %3225 }
 0x491   :  { %v409_v40 = vsel %vm393_vm10, %v4009_v39, 0.0 }
 0x492   :  { %v810_v22 = vsel %vm393_vm10, %v3973_v7, -inf }
 0x493   :  { %811 = vmax.xlane.f32.xlu2 %v810_v22 }
 0x49b   :  { %599 = vadd.xlane.f32.xlu2 %v598_v54 }
 0x4a3   :  { %602 = vadd.xlane.f32.xlu2 %v601_v12 }
 0x4b1   :  { %v3985_v13 = vpop.f32.mrf.mxu2 }
 0x4ba   :  { %v3987_v14 = vpop.f32.mrf.mxu2 }
 0x4bb   :  { %v3083_v15 = vpack.i.bf16 %v3987_v14, %v3985_v13 }
 0x4c2   :  { %v676_v24 = vpop.f32.mrf.mxu2 }
 0x4c5   :  { %v993_v26 = vpop.f32.mrf.mxu1 }
 0x4c6   :  { %v994_v27 = vadd.f32 %v993_v26, %v3965_v62 }
 0x4c8   :  { %v999_v30 = vsel %vm393_vm10, %v994_v27, -inf }
 0x4c9   :  { %1000 = vmax.xlane.f32.xlu0 %v999_v30 }
 0x4ca   :  { %v679_v31 = vpop.f32.mrf.mxu2 }
 0x4cb   :  { %v3996_v33 = vadd.f32 %v679_v31, %v3852_v23 }
 0x4cd   :  { %v685_v21 = vsel %vm393_vm10, %v3996_v33, -inf }
 0x4ce   :  { %v996_v35 = vpop.f32.mrf.mxu1  ;;  %686 = vmax.xlane.f32.xlu2 %v685_v21 }
 0x4cf   :  { %v4003_v36 = vadd.f32 %v996_v35, %v3965_v62 }
 0x4d1   :  { %407 = vadd.xlane.f32.xlu0 %v406_v28  ;;  %v1002_v37 = vsel %vm393_vm10, %v4003_v36, -inf }
 0x4d2   :  { %1003 = vmax.xlane.f32.xlu1 %v1002_v37  ;;  %v897_v38 = vpop.f32.mrf.mxu2 }
 0x4d3   :  { %v4037_v56 = vadd.f32 %v897_v38, %v3965_v62 }
 0x4d5   :  { %v903_v57 = vsel %vm393_vm10, %v4037_v56, -inf }
 0x4d9   :  { %410 = vadd.xlane.f32.xlu0 %v409_v40 }
 0x4da   :  { %v900_v41 = vpop.f32.mrf.mxu2 }
 0x4db   :  { %v4051_v61 = vadd.f32 %v900_v41, %v3965_v62 }
 0x4dd   :  { %v906_v63 = vsel %vm393_vm10, %v4051_v61, -inf }
 0x4e2   :  { %v1089_v42 = vpop.f32.mrf.mxu2 }
 0x4e3   :  { %v4014_v43 = vadd.f32 %v1089_v42, %v3965_v62 }
 0x4e5   :  { %v1095_v45 = vsel %vm393_vm10, %v4014_v43, -inf }
 0x4e6   :  { %1096 = vmax.xlane.f32.xlu2 %v1095_v45 }
 0x4ea   :  { %v1092_v46 = vpop.f32.mrf.mxu2 }
 0x4eb   :  { %v4019_v47 = vadd.f32 %v1092_v46, %v3965_v62  ;;  %3049 = vrot.lane.b32.xlu1 %v3843_v18, %s3616_s19 }
 0x4ed   :  { %3054 = vrot.lane.b32.xlu0 %v3843_v18, %s3638_s3  ;;  %v1098_v48 = vsel %vm393_vm10, %v4019_v47, -inf }
 0x4ee   :  { %1099 = vmax.xlane.f32.xlu2 %v1098_v48 }
 0x4f3   :  { %3059 = vrot.lane.b32.xlu1 %v3843_v18, %s3639_s26  ;;  %v4042_v18 = vadd.f32 %v676_v24, %v3852_v23 }
 0x4f5   :  { %v682_v5 = vsel %vm393_vm10, %v4042_v18, -inf }
 0x4fe   :  { %v809_v53 = vpop.xlane.xlu1 %808 }
 0x4ff   :  { %v813_v55 = vsub.f32 %v3968_v1, %v809_v53 }
 0x501   :  { %v815_v16 = vmul.f32 1.442695, %v813_v55 }
 0x503   :  { %3227 = vpow2.f32 %v815_v16 }
 0x506   :  { %3069 = vrot.lane.b32.xlu2 %v4031_v50, %s3636_s24  ;;  %v812_v0 = vpop.xlane.xlu2 %811 }
 0x507   :  { %v814_v12 = vsub.f32 %v3973_v7, %v812_v0 }
 0x509   :  { %v4044_v3 = vpop.eup %3227  ;;  %v817_v24 = vmul.f32 1.442695, %v814_v12 }
 0x50a   :  { %v819_v58 = vsel %vm393_vm10, %v4044_v3, 0.0 }
 0x50e   :  { %v600_v44 = vpop.xlane.xlu2 %599 }
 0x516   :  { %v603_v20 = vpop.xlane.xlu2 %602 }
 0x517   :  { %904 = vmax.xlane.f32.xlu0 %v903_v57 }
 0x51d   :  { %683 = vmax.xlane.f32.xlu1 %v682_v5 }
 0x51f   :  { %820 = vadd.xlane.f32.xlu0 %v819_v58 }
 0x525   :  { %907 = vmax.xlane.f32.xlu1 %v906_v63 }
 0x53c   :  { %v1001_v1 = vpop.xlane.xlu0 %1000 }
 0x53d   :  { %v1005_v2 = vsub.f32 %v994_v27, %v1001_v1 }
 0x53e   :  { %3064 = vrot.lane.b32.xlu1 %v4031_v50, %s3616_s19 }
 0x53f   :  { %v1007_v49 = vmul.f32 1.442695, %v1005_v2 }
 0x541   :  { %3229 = vpow2.f32 %v1007_v49  ;;  %v4061_v8 = vpop.xlane.xlu2 %686 }
 0x544   :  { %v408_v22 = vpop.xlane.xlu0 %407 }
 0x545   :  { %v1004_v54 = vpop.xlane.xlu1 %1003  ;;  %3231 = vrcp.f32 %v408_v22 }
 0x546   :  { %3233 = vrcp.f32 %v600_v44  ;;  %v1006_v27 = vsub.f32 %v4003_v36, %v1004_v54 }
 0x547   :  { %v4057_v4 = vpop.eup %3229  ;;  %3235 = vpow2.f32 %v817_v24 }
 0x548   :  { %v1011_v6 = vsel %vm393_vm10, %v4057_v4, 0.0  ;;  %v1009_v28 = vmul.f32 1.442695, %v1006_v27 }
 0x549   :  { %1012 = vadd.xlane.f32.xlu0 %v1011_v6 }
 0x54b   :  { %v3232_v26 = vpop.eup %3231 }
 0x54c   :  { %v411_v17 = vpop.xlane.xlu0 %410  ;;  %v3234_v31 = vpop.eup %3233  ;;  %v414_v35 = vmul.f32 %v3232_v26, %v3998_v34 }
 0x54d   :  { %3237 = vrcp.f32 %v411_v17  ;;  %v606_v38 = vmul.f32 %v3234_v31, %v3977_v9  ;;  %v4070_v36 = vpop.eup %3235 }
 0x54e   :  { %3239 = vrcp.f32 %v603_v20  ;;  %v822_v45 = vsel %vm393_vm10, %v4070_v36, 0.0 }
 0x54f   :  { %3241 = vpow2.f32 %v1009_v28 }
 0x553   :  { %v3238_v41 = vpop.eup %3237 }
 0x554   :  { %v3240_v46 = vpop.eup %3239  ;;  %v415_v9 = vmul.f32 %v3238_v41, %v4009_v39 }
 0x555   :  { %v607_v57 = vmul.f32 %v3240_v46, %v3981_v11  ;;  %v4079_v5 = vpop.eup %3241 }
 0x556   :  { %v1014_v58 = vsel %vm393_vm10, %v4079_v5, 0.0 }
 0x559   :  { %v1097_v19 = vpop.xlane.xlu2 %1096 }
 0x55a   :  { %v1101_v42 = vsub.f32 %v4014_v43, %v1097_v19 }
 0x55c   :  { %v1103_v55 = vmul.f32 1.442695, %v1101_v42 }
 0x55d   :  { %v3050_v25 = vpop.permute.xlu1 %3049  ;;  %3074 = vrot.lane.b32.xlu0 %v4031_v50, %s3638_s3 }
 0x55e   :  { %v3051_v29 = vunpack.i.l.bf16 %v3050_v25  ;;  %v3052_v32 = vunpack.i.h.bf16 %v3050_v25  ;;  %3243 = vpow2.f32 %v1103_v55 }
 0x55f   :  { %v3055_v30 = vpop.permute.xlu0 %3054 }
 0x560   :  { %442 = vmatpush.msrb.mxu0 %v3051_v29  ;;  %v3056_v7 = vunpack.i.l.bf16 %v3055_v30  ;;  %v3057_v37 = vunpack.i.h.bf16 %v3055_v30 }
 0x561   :  { %v1100_v21 = vpop.xlane.xlu2 %1099 }
 0x562   :  { %443 = vmatpush.msrb.mxu0 %v3052_v32  ;;  %634 = vmatpush.msrb.mxu3 %v3056_v7  ;;  %v1102_v63 = vsub.f32 %v4019_v47, %v1100_v21  ;;  %v689_v47 = vsub.f32 %v3996_v33, %v4061_v8 }
 0x563   :  { %2829 = vmatmul.msk.f32.vlgmr.msrb.gmra.mxu0 %vm393_vm10, %v414_v35 }
 0x564   :  { %635 = vmatpush.msrb.mxu3 %v3057_v37  ;;  %v4084_v39 = vpop.eup %3243  ;;  %v1105_v11 = vmul.f32 1.442695, %v1102_v63  ;;  %v692_v20 = vmul.f32 1.442695, %v689_v47 }
 0x565   :  { %2841 = vmatmul.msk.f32.vlgmr.msrb.gmra.mxu3 %vm393_vm10, %v606_v38  ;;  %v3060_v40 = vpop.permute.xlu1 %3059  ;;  %v1107_v0 = vsel %vm393_vm10, %v4084_v39, 0.0 }
 0x566   :  { %v3061_v34 = vunpack.i.l.bf16 %v3060_v40  ;;  %v3062_v48 = vunpack.i.h.bf16 %v3060_v40  ;;  %3245 = vpow2.f32 %v1105_v11 }
 0x568   :  { %730 = vmatpush.msra.mxu0 %v3061_v34  ;;  %823 = vadd.xlane.f32.xlu1 %v822_v45 }
 0x569   :  { %v3070_v53 = vpop.permute.xlu2 %3069 }
 0x56a   :  { %v3071_v16 = vunpack.i.l.bf16 %v3070_v53  ;;  %731 = vmatpush.msra.mxu0 %v3062_v48  ;;  %v3072_v43 = vunpack.i.h.bf16 %v3070_v53 }
 0x56b   :  { %2830 = vmatmul.msk.f32.gmra.mxu0 %vm393_vm10, %v415_v9 }
 0x56c   :  { %951 = vmatpush.msrb.mxu0 %v3071_v16  ;;  %v4089_v1 = vpop.eup %3245 }
 0x56d   :  { %2842 = vmatmul.msk.f32.gmra.mxu3 %vm393_vm10, %v607_v57  ;;  %v1110_v2 = vsel %vm393_vm10, %v4089_v1, 0.0 }
 0x56e   :  { %952 = vmatpush.msrb.mxu0 %v3072_v43 }
 0x570   :  { %1015 = vadd.xlane.f32.xlu1 %v1014_v58 }
 0x578   :  { %1108 = vadd.xlane.f32.xlu1 %v1107_v0 }
 0x587   :  { %1111 = vadd.xlane.f32.xlu0 %v1110_v2 }
 0x58a   :  { %v905_v22 = vpop.xlane.xlu0 %904 }
 0x58b   :  { %v909_v12 = vsub.f32 %v4037_v56, %v905_v22 }
 0x58d   :  { %v911_v19 = vmul.f32 1.442695, %v909_v12 }
 0x590   :  { %v684_v44 = vpop.xlane.xlu1 %683 }
 0x591   :  { %v688_v49 = vsub.f32 %v4042_v18, %v684_v44  ;;  %3079 = vrot.lane.b32.xlu1 %v4031_v50, %s3639_s26 }
 0x592   :  { %v821_v8 = vpop.xlane.xlu0 %820 }
 0x593   :  { %v690_v6 = vmul.f32 1.442695, %v688_v49 }
 0x595   :  { %3247 = vpow2.f32 %v690_v6 }
 0x596   :  { %3249 = vpow2.f32 %v692_v20 }
 0x597   :  { %3251 = vpow2.f32 %v911_v19 }
 0x598   :  { %v908_v24 = vpop.xlane.xlu1 %907  ;;  %3253 = vrcp.f32 %v821_v8 }
 0x599   :  { %v910_v50 = vsub.f32 %v4051_v61, %v908_v24 }
 0x59b   :  { %v3248_v54 = vpop.eup %3247  ;;  %v913_v25 = vmul.f32 1.442695, %v910_v50 }
 0x59c   :  { %v694_v17 = vsel %vm393_vm10, %v3248_v54, 0.0  ;;  %v4100_v18 = vpop.eup %3249 }
 0x59d   :  { %695 = vadd.xlane.f32.xlu2 %v694_v17  ;;  %v697_v33 = vsel %vm393_vm10, %v4100_v18, 0.0  ;;  %v3252_v26 = vpop.eup %3251  ;;  %3255 = vpow2.f32 %v913_v25 }
 0x59e   :  { %v915_v56 = vsel %vm393_vm10, %v3252_v26, 0.0  ;;  %v3254_v27 = vpop.eup %3253 }
 0x59f   :  { %v827_v61 = vmul.f32 %v3254_v27, %v4044_v3 }
 0x5a3   :  { %v3256_v30 = vpop.eup %3255 }
 0x5a4   :  { %v918_v7 = vsel %vm393_vm10, %v3256_v30, 0.0 }
 0x5a5   :  { %698 = vadd.xlane.f32.xlu2 %v697_v33 }
 0x5ad   :  { %916 = vadd.xlane.f32.xlu2 %v915_v56 }
 0x5b0   :  { %v3065_v29 = vpop.permute.xlu1 %3064 }
 0x5b1   :  { %v3066_v31 = vunpack.i.l.bf16 %v3065_v29  ;;  %v3067_v32 = vunpack.i.h.bf16 %v3065_v29 }
 0x5b3   :  { %855 = vmatpush.msra.mxu3 %v3066_v31  ;;  %v3000_v31 = vld [vmem:[#allocation12] sm:$0xff] }
 0x5b5   :  { %919 = vadd.xlane.f32.xlu2 %v918_v7  ;;  %856 = vmatpush.msra.mxu3 %v3067_v32 }
 0x5b6   :  { %2853 = vmatmul.msk.f32.vlgmr.msra.gmra.mxu3 %vm393_vm10, %v827_v61 }
 0x5bc   :  { %v1013_v21 = vpop.xlane.xlu0 %1012 }
 0x5cd   :  { %3084 = vrot.lane.b32.xlu2 %v3083_v15, %s3621_s30 }
 0x5cf   :  { %v3075_v35 = vpop.permute.xlu0 %3074 }
 0x5d0   :  { %v3076_v28 = vunpack.i.l.bf16 %v3075_v35  ;;  %v3077_v37 = vunpack.i.h.bf16 %v3075_v35 }
 0x5d2   :  { %1047 = vmatpush.msrb.mxu3 %v3076_v28 }
 0x5d4   :  { %1048 = vmatpush.msrb.mxu3 %v3077_v37 }
 0x5db   :  { %v824_v38 = vpop.xlane.xlu1 %823 }
 0x5dc   :  { %3257 = vrcp.f32 %v824_v38 }
 0x5dd   :  { %3259 = vrcp.f32 %v1013_v21 }
 0x5e2   :  { %v3258_v3 = vpop.eup %3257 }
 0x5e3   :  { %v828_v40 = vmul.f32 %v3258_v3, %v4070_v36  ;;  %v1016_v41 = vpop.xlane.xlu1 %1015  ;;  %v3260_v42 = vpop.eup %3259 }
 0x5e4   :  { %3261 = vrcp.f32 %v1016_v41  ;;  %v1019_v13 = vmul.f32 %v3260_v42, %v4057_v4 }
 0x5e5   :  { %2854 = vmatmul.msk.f32.gmra.mxu3 %vm393_vm10, %v828_v40 }
 0x5e8   :  { %v637_v34 = vpop.f32.mrf.mxu3 }
 0x5ea   :  { %v3262_v14 = vpop.eup %3261 }
 0x5eb   :  { %v1020_v46 = vmul.f32 %v3262_v14, %v4079_v5  ;;  %v1109_v36 = vpop.xlane.xlu1 %1108 }
 0x5ed   :  { %2865 = vmatmul.msk.f32.vlgmr.msrb.gmra.mxu3 %vm393_vm10, %v1019_v13 }
 0x5f0   :  { %v640_v15 = vpop.f32.mrf.mxu3 }
 0x5f1   :  { %v3088_v45 = vpack.i.bf16 %v640_v15, %v637_v34 }
 0x5f3   :  { %3089 = vrot.lane.b32.xlu1 %v3088_v45, %s3626_s0 }
 0x5f5   :  { %2866 = vmatmul.msk.f32.gmra.mxu3 %vm393_vm10, %v1020_v46 }
 0x5fa   :  { %v1112_v49 = vpop.xlane.xlu0 %1111 }
 0x603   :  { %v3080_v53 = vpop.permute.xlu1 %3079 }
 0x604   :  { %v3081_v57 = vunpack.i.l.bf16 %v3080_v53  ;;  %v3082_v4 = vunpack.i.h.bf16 %v3080_v53 }
 0x610   :  { %v696_v48 = vpop.xlane.xlu2 %695 }
 0x611   :  { %3263 = vrcp.f32 %v696_v48 }
 0x617   :  { %v3264_v9 = vpop.eup %3263 }
 0x618   :  { %v702_v55 = vmul.f32 %v3264_v9, %v3248_v54  ;;  %v699_v16 = vpop.xlane.xlu2 %698  ;;  %v445_v54 = vpop.f32.mrf.mxu0 }
 0x619   :  { %3265 = vrcp.f32 %v699_v16 }
 0x61a   :  { %2847 = vmatmul.msk.f32.vlgmr.msra.gmra.mxu0 %vm393_vm10, %v702_v55 }
 0x61b   :  { %1143 = vmatpush.msra.mxu0 %v3081_v57 }
 0x61d   :  { %1144 = vmatpush.msra.mxu0 %v3082_v4 }
 0x61f   :  { %v3266_v43 = vpop.eup %3265 }
 0x620   :  { %v917_v58 = vpop.xlane.xlu2 %916  ;;  %v703_v5 = vmul.f32 %v3266_v43, %v4100_v18  ;;  %v448_v17 = vpop.f32.mrf.mxu0 }
 0x621   :  { %3267 = vrcp.f32 %v917_v58 }
 0x622   :  { %2848 = vmatmul.msk.f32.gmra.mxu0 %vm393_vm10, %v703_v5 }
 0x627   :  { %v3268_v63 = vpop.eup %3267 }
 0x628   :  { %v923_v0 = vmul.f32 %v3268_v63, %v3252_v26  ;;  %v920_v11 = vpop.xlane.xlu2 %919 }
 0x629   :  { %3269 = vrcp.f32 %v920_v11 }
 0x62a   :  { %2859 = vmatmul.msk.f32.vlgmr.msrb.gmra.mxu0 %vm393_vm10, %v923_v0  ;;  %3271 = vrcp.f32 %v1109_v36 }
 0x62b   :  { %3273 = vrcp.f32 %v1112_v49 }
 0x62f   :  { %v3270_v2 = vpop.eup %3269 }
 0x630   :  { %v924_v44 = vmul.f32 %v3270_v2, %v3256_v30  ;;  %v3272_v47 = vpop.eup %3271  ;;  %v3001_v30 = vld [vmem:[#allocation12 + $0x8] sm:$0xff]  ;;  %v3085_v61 = vpop.permute.xlu2 %3084  ;;  %v3186_v2 = vld [vmem:[%s4663_s7] ss:$0 sm:$0xff] }
 0x631   :  { %v1115_v6 = vmul.f32 %v3272_v47, %v4084_v39  ;;  %v3274_v20 = vpop.eup %3273  ;;  %1216 = vmatpush.bf16.msra.mxu1 %v3001_v30  ;;  %v3087_v7 = vunpack.i.h.bf16 %v3085_v61  ;;  %v3086_v21 = vunpack.i.l.bf16 %v3085_v61 }
 0x632   :  { %2860 = vmatmul.msk.f32.gmra.mxu0 %vm393_vm10, %v924_v44  ;;  %v1116_v22 = vmul.f32 %v3274_v20, %v4089_v1 }
 0x633   :  { %v764_v38 = vsel %vm361_vm8, %v448_v17, %v3087_v7  ;;  %v763_v3 = vsel %vm361_vm8, %v445_v54, %v3086_v21 }
 0x635   :  { %1217 = vmatpush.bf16.msra.mxu1 %v3000_v31 }
 0x639   :  { %v858_v12 = vpop.f32.mrf.mxu3 }
 0x63a   :  { %2871 = vmatmul.msk.f32.vlgmr.msra.gmra.mxu0 %vm393_vm10, %v1115_v6 }
 0x642   :  { %2872 = vmatmul.msk.f32.gmra.mxu0 %vm393_vm10, %v1116_v22 }
 0x665   :  { %v3090_v32 = vpop.permute.xlu1 %3089 }
 0x666   :  { %v3092_v35 = vunpack.i.h.bf16 %v3090_v32  ;;  %v3091_v28 = vunpack.i.l.bf16 %v3090_v32 }
 0x668   :  { %v861_v19 = vpop.f32.mrf.mxu3  ;;  %v766_v42 = vsel %vm393_vm10, %v764_v38, %v3092_v35  ;;  %v765_v34 = vsel %vm393_vm10, %v763_v3, %v3091_v28  ;;  %v3003_v3 = vld [vmem:[#allocation13 + $0x8] sm:$0xff] }
 0x669   :  { %1371 = vmatpush.bf16.msra.mxu3 %v3003_v3  ;;  %v3004_v3 = vld [vmem:[#allocation15] sm:$0xff] }
 0x670   :  { %v1050_v18 = vpop.f32.mrf.mxu3 }
 0x678   :  { %v1053_v8 = vpop.f32.mrf.mxu3 }
 0x679   :  { %v3098_v25 = vpack.i.bf16 %v1053_v8, %v1050_v18 }
 0x697   :  { %v733_v24 = vpop.f32.mrf.mxu0 }
 0x69f   :  { %v736_v50 = vpop.f32.mrf.mxu0 }
 0x6a0   :  { %v3093_v33 = vpack.i.bf16 %v736_v50, %v733_v24 }
 0x6a2   :  { %3094 = vrot.lane.b32.xlu1 %v3093_v33, %s3640_s27 }
 0x6a7   :  { %v954_v39 = vpop.f32.mrf.mxu0 }
 0x6aa   :  { %3099 = vrot.lane.b32.xlu1 %v3098_v25, %s3626_s0 }
 0x6af   :  { %v957_v26 = vpop.f32.mrf.mxu0 }
 0x6b0   :  { %v3103_v1 = vpack.i.bf16 %v957_v26, %v954_v39 }
 0x6b2   :  { %3104 = vrot.lane.b32.xlu2 %v3103_v1, %s3621_s30 }
 0x6b7   :  { %v1146_v56 = vpop.f32.mrf.mxu0 }
 0x6bf   :  { %v1149_v27 = vpop.f32.mrf.mxu0 }
 0x6c0   :  { %v3108_v29 = vpack.i.bf16 %v1149_v27, %v1146_v56 }
 0x6c2   :  { %3109 = vrot.lane.b32.xlu2 %v3108_v29, %s3640_s27 }
 0x70c   :  { %v3105_v13 = vpop.permute.xlu2 %3104 }
 0x70d   :  { %v3107_v36 = vunpack.i.h.bf16 %v3105_v13  ;;  %v3106_v48 = vunpack.i.l.bf16 %v3105_v13 }
 0x70f   :  { %v1176_v16 = vsel %vm361_vm8, %v858_v12, %v3106_v48  ;;  %v1177_v57 = vsel %vm361_vm8, %v861_v19, %v3107_v36 }
 0x714   :  { %v3095_v37 = vpop.permute.xlu1 %3094 }
 0x715   :  { %v3097_v40 = vunpack.i.h.bf16 %v3095_v37  ;;  %v3096_v41 = vunpack.i.l.bf16 %v3095_v37 }
 0x717   :  { %v768_v14 = vsel %vm767_vm3, %v765_v34, %v3096_v41  ;;  %v769_v15 = vsel %vm767_vm3, %v766_v42, %v3097_v40  ;;  %v3002_v34 = vld [vmem:[#allocation13] sm:$0xff] }
 0x718   :  { %v1182_v45 = vpack.c.bf16 %v769_v15, %v768_v14  ;;  %1372 = vmatpush.bf16.msra.mxu3 %v3002_v34 }
 0x71a   :  { %2881 = vmatmul.msk.bf16.vlgmr.msra.gmra.mxu1 %vm198_vm0, %v1182_v45 }
 0x71c   :  { %v3100_v46 = vpop.permute.xlu1 %3099  ;;  %v3110_v53 = vpop.permute.xlu2 %3109 }
 0x71d   :  { %v3102_v9 = vunpack.i.h.bf16 %v3100_v46  ;;  %v3101_v55 = vunpack.i.l.bf16 %v3100_v46  ;;  %v3112_v4 = vunpack.i.h.bf16 %v3110_v53  ;;  %v3111_v43 = vunpack.i.l.bf16 %v3110_v53 }
 0x71f   :  { %v1179_v58 = vsel %vm393_vm10, %v1177_v57, %v3102_v9  ;;  %v1178_v5 = vsel %vm393_vm10, %v1176_v16, %v3101_v55 }
 0x720   :  { %v1180_v63 = vsel %vm767_vm3, %v1178_v5, %v3111_v43  ;;  %v1181_v0 = vsel %vm767_vm3, %v1179_v58, %v3112_v4 }
 0x721   :  { %v1183_v11 = vpack.c.bf16 %v1181_v0, %v1180_v63 }
 0x72a   :  { %2882 = vmatmul.msk.bf16.gmra.mxu1 %vm198_vm0, %v1183_v11 }
 0x797   :  { %v1219_v44 = vpop.f32.mrf.mxu1 }
 0x798   :  { %v1220_v49 = vadd.f32 %v3186_v2, %v1219_v44 }
 0x79a   :  { %v1229_v47 = vadd.f32 %v1220_v49, %v3789_v51  ;;  %v3187_v49 = vld [vmem:[%s4664_s8] ss:$0 sm:$0xff] }
 0x79c   :  { %v1235_v6 = vsel %vm198_vm0, %v1229_v47, 0.0 }
 0x79d   :  { %1236 = vadd.xlane.f32.xlu0 %v1235_v6 }
 0x79f   :  { %v1221_v20 = vpop.f32.mrf.mxu1 }
 0x7a0   :  { %v1222_v22 = vadd.f32 %v3186_v2, %v1221_v20 }
 0x7a2   :  { %v1230_v54 = vadd.f32 %v1222_v22, %v3792_v52 }
 0x7a4   :  { %v1238_v12 = vsel %vm198_vm0, %v1230_v54, 0.0 }
 0x7a5   :  { %1239 = vadd.xlane.f32.xlu1 %v1238_v12 }
 0x7a7   :  { %v1224_v17 = vpop.f32.mrf.mxu1 }
 0x7a8   :  { %v1225_v19 = vadd.f32 %v3186_v2, %v1224_v17  ;;  %v3188_v17 = vld [vmem:[%s4677_s20] ss:$0 sm:$0xff] }
 0x7aa   :  { %v1231_v24 = vadd.f32 %v1225_v19, %v3872_v59 }
 0x7ac   :  { %v1241_v18 = vsel %vm198_vm0, %v1231_v24, 0.0 }
 0x7ad   :  { %1242 = vadd.xlane.f32.xlu2 %v1241_v18 }
 0x7af   :  { %v1226_v50 = vpop.f32.mrf.mxu1 }
 0x7b0   :  { %v1227_v33 = vadd.f32 %v3186_v2, %v1226_v50 }
 0x7b2   :  { %v1232_v51 = vadd.f32 %v1227_v33, %v3875_v60 }
 0x7b4   :  { %v1244_v8 = vsel %vm198_vm0, %v1232_v51, 0.0 }
 0x7b5   :  { %1245 = vadd.xlane.f32.xlu0 %v1244_v8 }
 0x810   :  { %v1237_v39 = vpop.xlane.xlu0 %1236 }
 0x811   :  { %v1247_v52 = vmul.f32 %v1237_v39, %v3773_v10 }
 0x813   :  { %v1251_v25 = vsub.f32 %v1229_v47, %v1247_v52 }
 0x815   :  { %v1255_v26 = vmul.f32 %v1251_v25, %v1251_v25 }
 0x817   :  { %v1259_v1 = vsel %vm198_vm0, %v1255_v26, 0.0 }
 0x818   :  { %v1240_v56 = vpop.xlane.xlu1 %1239  ;;  %1260 = vadd.xlane.f32.xlu0 %v1259_v1 }
 0x819   :  { %v1248_v59 = vmul.f32 %v1240_v56, %v3773_v10 }
 0x81b   :  { %v4161_v27 = vsub.f32 %v1230_v54, %v1248_v59 }
 0x81d   :  { %v1256_v29 = vmul.f32 %v4161_v27, %v4161_v27 }
 0x81f   :  { %v1262_v60 = vsel %vm198_vm0, %v1256_v29, 0.0 }
 0x820   :  { %1263 = vadd.xlane.f32.xlu0 %v1262_v60  ;;  %v1243_v30 = vpop.xlane.xlu2 %1242 }
 0x821   :  { %v1249_v31 = vmul.f32 %v1243_v30, %v3773_v10 }
 0x823   :  { %v4167_v32 = vsub.f32 %v1231_v24, %v1249_v31 }
 0x825   :  { %v1257_v61 = vmul.f32 %v4167_v32, %v4167_v32 }
 0x827   :  { %v1265_v7 = vsel %vm198_vm0, %v1257_v61, 0.0 }
 0x828   :  { %v1246_v21 = vpop.xlane.xlu0 %1245  ;;  %1266 = vadd.xlane.f32.xlu0 %v1265_v7 }
 0x829   :  { %v1250_v35 = vmul.f32 %v1246_v21, %v3773_v10 }
 0x82b   :  { %v4173_v28 = vsub.f32 %v1232_v51, %v1250_v35 }
 0x82d   :  { %v1258_v37 = vmul.f32 %v4173_v28, %v4173_v28 }
 0x82f   :  { %v1268_v38 = vsel %vm198_vm0, %v1258_v37, 0.0 }
 0x830   :  { %1269 = vadd.xlane.f32.xlu0 %v1268_v38  ;;  %v3005_v38 = vld [vmem:[#allocation15 + $0x8] sm:$0xff] }
 0x831   :  { %1422 = vmatpush.bf16.msra.mxu2 %v3005_v38 }
 0x835   :  { %1423 = vmatpush.bf16.msra.mxu2 %v3004_v3 }
 0x88b   :  { %v1261_v40 = vpop.xlane.xlu0 %1260 }
 0x88c   :  { %v1271_v41 = vmul.f32 %v1261_v40, %v3773_v10 }
 0x88e   :  { %v1275_v42 = vadd.f32 1e-05, %v1271_v41 }
 0x890   :  { %3275 = vrsqrt.f32 %v1275_v42  ;;  %vm1285_vm5 = vweird.f32 %v1275_v42 }
 0x893   :  { %v1264_v13 = vpop.xlane.xlu0 %1263 }
 0x894   :  { %v1272_v14 = vmul.f32 %v1264_v13, %v3773_v10 }
 0x896   :  { %v3276_v15 = vpop.eup %3275  ;;  %v1276_v45 = vadd.f32 1e-05, %v1272_v14 }
 0x897   :  { %v1280_v46 = vmul.f32 %v3276_v15, %v1275_v42  ;;  %vm1286_vm4 = vweird.f32 %v3276_v15 }
 0x898   :  { %3277 = vrsqrt.f32 %v1276_v45  ;;  %vm1287_vm6 = vmor %vm1285_vm5, %vm1286_vm4  ;;  %vm1295_vm9 = vweird.f32 %v1276_v45 }
 0x899   :  { %v1281_v36 = vmul.f32 %v3276_v15, %v1280_v46 }
 0x89b   :  { %v1282_v48 = vmul.f32 0.5, %v1281_v36  ;;  %v1267_v53 = vpop.xlane.xlu0 %1266 }
 0x89c   :  { %v1273_v9 = vmul.f32 %v1267_v53, %v3773_v10 }
 0x89d   :  { %v1283_v55 = vsub.f32 1.5, %v1282_v48 }
 0x89e   :  { %v3278_v16 = vpop.eup %3277  ;;  %v1277_v57 = vadd.f32 1e-05, %v1273_v9 }
 0x89f   :  { %v1284_v4 = vmul.f32 %v3276_v15, %v1283_v55  ;;  %v1290_v43 = vmul.f32 %v3278_v16, %v1276_v45  ;;  %vm1296_vm7 = vweird.f32 %v3278_v16  ;;  %v3190_v55 = vld [vmem:[%s4669_s13] ss:$0 sm:$0xff] }
 0x8a0   :  { %3279 = vrsqrt.f32 %v1277_v57  ;;  %vm1297_vm11 = vmor %vm1295_vm9, %vm1296_vm7  ;;  %vm1305_vm13 = vweird.f32 %v1277_v57 }
 0x8a1   :  { %v1291_v58 = vmul.f32 %v3278_v16, %v1290_v43  ;;  %v1288_v5 = vsel %vm1287_vm6, %v3276_v15, %v1284_v4 }
 0x8a2   :  { %v1319_v47 = vmul.f32 %v1288_v5, %v1251_v25 }
 0x8a3   :  { %v1292_v63 = vmul.f32 0.5, %v1291_v58  ;;  %v1270_v0 = vpop.xlane.xlu0 %1269 }
 0x8a4   :  { %v1274_v11 = vmul.f32 %v1270_v0, %v3773_v10  ;;  %v1326_v19 = vmul.f32 %v3187_v49, %v1319_v47 }
 0x8a5   :  { %v1293_v2 = vsub.f32 1.5, %v1292_v63 }
 0x8a6   :  { %v3280_v44 = vpop.eup %3279  ;;  %v1278_v6 = vadd.f32 1e-05, %v1274_v11  ;;  %v1333_v8 = vadd.f32 %v3188_v17, %v1326_v19 }
 0x8a7   :  { %v1294_v20 = vmul.f32 %v3278_v16, %v1293_v2  ;;  %v1300_v22 = vmul.f32 %v3280_v44, %v1277_v57  ;;  %vm1306_vm12 = vweird.f32 %v3280_v44 }
 0x8a8   :  { %3281 = vrsqrt.f32 %v1278_v6  ;;  %vm1307_vm14 = vmor %vm1305_vm13, %vm1306_vm12  ;;  %vm1315_vm1 = vweird.f32 %v1278_v6 }
 0x8a9   :  { %v1298_v54 = vsel %vm1297_vm11, %v3278_v16, %v1294_v20  ;;  %v1301_v12 = vmul.f32 %v3280_v44, %v1300_v22 }
 0x8aa   :  { %v1320_v24 = vmul.f32 %v1298_v54, %v4161_v27 }
 0x8ab   :  { %v1302_v18 = vmul.f32 0.5, %v1301_v12 }
 0x8ac   :  { %v1327_v50 = vmul.f32 %v3187_v49, %v1320_v24 }
 0x8ad   :  { %v1303_v33 = vsub.f32 1.5, %v1302_v18 }
 0x8ae   :  { %v3282_v51 = vpop.eup %3281  ;;  %v1334_v39 = vadd.f32 %v3188_v17, %v1327_v50 }
 0x8af   :  { %v1304_v52 = vmul.f32 %v3280_v44, %v1303_v33  ;;  %v1310_v25 = vmul.f32 %v3282_v51, %v1278_v6  ;;  %vm1316_vm15 = vweird.f32 %v3282_v51 }
 0x8b0   :  { %v1337_v26 = vpack.c.bf16 %v1334_v39, %v1333_v8  ;;  %vm1317_vm2 = vmor %vm1315_vm1, %vm1316_vm15 }
 0x8b1   :  { %v1311_v1 = vmul.f32 %v3282_v51, %v1310_v25  ;;  %v1308_v56 = vsel %vm1307_vm14, %v3280_v44, %v1304_v52 }
 0x8b2   :  { %2891 = vmatmul.msk.bf16.vlgmr.msra.gmra.mxu3 %vm198_vm0, %v1337_v26  ;;  %v1321_v27 = vmul.f32 %v1308_v56, %v4167_v32  ;;  %v3189_v32 = vld [vmem:[%s4667_s11] ss:$0 sm:$0xff] }
 0x8b3   :  { %v1312_v59 = vmul.f32 0.5, %v1311_v1 }
 0x8b4   :  { %v1328_v61 = vmul.f32 %v3187_v49, %v1321_v27 }
 0x8b5   :  { %v1313_v29 = vsub.f32 1.5, %v1312_v59 }
 0x8b6   :  { %v1335_v21 = vadd.f32 %v3188_v17, %v1328_v61 }
 0x8b7   :  { %v1314_v60 = vmul.f32 %v3282_v51, %v1313_v29 }
 0x8b9   :  { %v1318_v30 = vsel %vm1317_vm2, %v3282_v51, %v1314_v60 }
 0x8ba   :  { %v1322_v31 = vmul.f32 %v1318_v30, %v4173_v28  ;;  %v3007_v30 = vld [vmem:[#allocation10 + $0x18] sm:$0xff] }
 0x8bb   :  { %1579 = vmatpush.bf16.msrb.mxu0 %v3007_v30 }
 0x8bc   :  { %v1329_v7 = vmul.f32 %v3187_v49, %v1322_v31 }
 0x8be   :  { %v1336_v35 = vadd.f32 %v3188_v17, %v1329_v7 }
 0x8c0   :  { %v1338_v37 = vpack.c.bf16 %v1336_v35, %v1335_v21 }
 0x8c2   :  { %2892 = vmatmul.msk.bf16.gmra.mxu3 %vm198_vm0, %v1338_v37 }
 0x935   :  { %v1374_v40 = vpop.f32.mrf.mxu3 }
 0x936   :  { %v1375_v41 = vadd.f32 %v3189_v32, %v1374_v40 }
 0x938   :  { %v1384_v28 = vmax.f32 %v1375_v41, 0.0 }
 0x93d   :  { %v1376_v42 = vpop.f32.mrf.mxu3 }
 0x93e   :  { %v1377_v34 = vadd.f32 %v3189_v32, %v1376_v42 }
 0x940   :  { %v1385_v13 = vmax.f32 %v1377_v34, 0.0 }
 0x942   :  { %v1388_v14 = vpack.c.bf16 %v1385_v13, %v1384_v28 }
 0x944   :  { %2901 = vmatmul.msk.bf16.vlgmr.msra.gmra.mxu2 %vm198_vm0, %v1388_v14 }
 0x945   :  { %v1379_v15 = vpop.f32.mrf.mxu3 }
 0x946   :  { %v1380_v45 = vadd.f32 %v3189_v32, %v1379_v15 }
 0x948   :  { %v1386_v48 = vmax.f32 %v1380_v45, 0.0 }
 0x94d   :  { %v1381_v46 = vpop.f32.mrf.mxu3 }
 0x94e   :  { %v1382_v36 = vadd.f32 %v3189_v32, %v1381_v46 }
 0x950   :  { %v1387_v53 = vmax.f32 %v1382_v36, 0.0 }
 0x952   :  { %v1389_v9 = vpack.c.bf16 %v1387_v53, %v1386_v48 }
 0x954   :  { %2902 = vmatmul.msk.bf16.gmra.mxu2 %vm198_vm0, %v1389_v9 }
 0x9c7   :  { %v1425_v16 = vpop.f32.mrf.mxu2 }
 0x9c8   :  { %v1426_v57 = vadd.f32 %v3190_v55, %v1425_v16 }
 0x9ca   :  { %v1435_v4 = vadd.f32 %v1426_v57, %v1333_v8  ;;  %v3191_v57 = vld [vmem:[#allocation16] ss:$0 sm:$0xff] }
 0x9cc   :  { %v1441_v43 = vsel %vm198_vm0, %v1435_v4, 0.0 }
 0x9cd   :  { %1442 = vadd.xlane.f32.xlu1 %v1441_v43 }
 0x9cf   :  { %v1427_v58 = vpop.f32.mrf.mxu2 }
 0x9d0   :  { %v1428_v5 = vadd.f32 %v3190_v55, %v1427_v58 }
 0x9d2   :  { %v1436_v63 = vadd.f32 %v1428_v5, %v1334_v39 }
 0x9d4   :  { %v1444_v0 = vsel %vm198_vm0, %v1436_v63, 0.0 }
 0x9d5   :  { %1445 = vadd.xlane.f32.xlu2 %v1444_v0 }
 0x9d7   :  { %v1430_v11 = vpop.f32.mrf.mxu2 }
 0x9d8   :  { %v1431_v2 = vadd.f32 %v3190_v55, %v1430_v11  ;;  %v3192_v11 = vld [vmem:[%s4671_s15] ss:$0 sm:$0xff] }
 0x9da   :  { %v1437_v44 = vadd.f32 %v1431_v2, %v1335_v21  ;;  %v3006_v21 = vld [vmem:[#allocation10 + $0x10] sm:$0xff] }
 0x9db   :  { %1580 = vmatpush.bf16.msrb.mxu0 %v3006_v21 }
 0x9dc   :  { %v1447_v49 = vsel %vm198_vm0, %v1437_v44, 0.0 }
 0x9dd   :  { %1448 = vadd.xlane.f32.xlu0 %v1447_v49 }
 0x9df   :  { %v1432_v47 = vpop.f32.mrf.mxu2 }
 0x9e0   :  { %v1433_v6 = vadd.f32 %v3190_v55, %v1432_v47 }
 0x9e2   :  { %v1438_v20 = vadd.f32 %v1433_v6, %v1336_v35 }
 0x9e4   :  { %v1450_v22 = vsel %vm198_vm0, %v1438_v20, 0.0 }
 0x9e5   :  { %1451 = vadd.xlane.f32.xlu1 %v1450_v22 }
 0xa40   :  { %v1443_v54 = vpop.xlane.xlu1 %1442 }
 0xa41   :  { %v1453_v12 = vmul.f32 %v1443_v54, %v3773_v10 }
 0xa43   :  { %v1457_v17 = vsub.f32 %v1435_v4, %v1453_v12 }
 0xa45   :  { %v1461_v19 = vmul.f32 %v1457_v17, %v1457_v17 }
 0xa47   :  { %v1465_v24 = vsel %vm198_vm0, %v1461_v19, 0.0 }
 0xa48   :  { %1466 = vadd.xlane.f32.xlu2 %v1465_v24  ;;  %v1446_v18 = vpop.xlane.xlu2 %1445 }
 0xa49   :  { %v1454_v50 = vmul.f32 %v1446_v18, %v3773_v10 }
 0xa4b   :  { %v4208_v33 = vsub.f32 %v1436_v63, %v1454_v50 }
 0xa4d   :  { %v1462_v51 = vmul.f32 %v4208_v33, %v4208_v33 }
 0xa4f   :  { %v1468_v8 = vsel %vm198_vm0, %v1462_v51, 0.0 }
 0xa50   :  { %v1449_v39 = vpop.xlane.xlu0 %1448  ;;  %1469 = vadd.xlane.f32.xlu0 %v1468_v8 }
 0xa51   :  { %v1455_v52 = vmul.f32 %v1449_v39, %v3773_v10 }
 0xa53   :  { %v4214_v25 = vsub.f32 %v1437_v44, %v1455_v52 }
 0xa55   :  { %v1463_v26 = vmul.f32 %v4214_v25, %v4214_v25 }
 0xa57   :  { %v1471_v1 = vsel %vm198_vm0, %v1463_v26, 0.0 }
 0xa58   :  { %v1452_v56 = vpop.xlane.xlu1 %1451  ;;  %1472 = vadd.xlane.f32.xlu1 %v1471_v1 }
 0xa59   :  { %v1456_v59 = vmul.f32 %v1452_v56, %v3773_v10 }
 0xa5b   :  { %v4220_v29 = vsub.f32 %v1438_v20, %v1456_v59 }
 0xa5d   :  { %v1464_v27 = vmul.f32 %v4220_v29, %v4220_v29 }
 0xa5f   :  { %v1474_v60 = vsel %vm198_vm0, %v1464_v27, 0.0 }
 0xa60   :  { %1475 = vadd.xlane.f32.xlu2 %v1474_v60 }
 0xabb   :  { %v1467_v31 = vpop.xlane.xlu2 %1466 }
 0xabc   :  { %v1477_v61 = vmul.f32 %v1467_v31, %v3773_v10 }
 0xabe   :  { %v1481_v7 = vadd.f32 1e-05, %v1477_v61 }
 0xac0   :  { %3283 = vrsqrt.f32 %v1481_v7  ;;  %vm1491_vm5 = vweird.f32 %v1481_v7 }
 0xac3   :  { %v1470_v35 = vpop.xlane.xlu0 %1469 }
 0xac4   :  { %v1478_v37 = vmul.f32 %v1470_v35, %v3773_v10 }
 0xac6   :  { %v3284_v38 = vpop.eup %3283  ;;  %v1482_v3 = vadd.f32 1e-05, %v1478_v37 }
 0xac7   :  { %v1486_v40 = vmul.f32 %v3284_v38, %v1481_v7  ;;  %vm1492_vm4 = vweird.f32 %v3284_v38 }
 0xac8   :  { %3285 = vrsqrt.f32 %v1482_v3  ;;  %vm1493_vm6 = vmor %vm1491_vm5, %vm1492_vm4  ;;  %vm1501_vm9 = vweird.f32 %v1482_v3 }
 0xac9   :  { %v1487_v32 = vmul.f32 %v3284_v38, %v1486_v40 }
 0xacb   :  { %v1488_v41 = vmul.f32 0.5, %v1487_v32  ;;  %v1473_v42 = vpop.xlane.xlu1 %1472 }
 0xacc   :  { %v1479_v34 = vmul.f32 %v1473_v42, %v3773_v10 }
 0xacd   :  { %v1489_v28 = vsub.f32 1.5, %v1488_v41 }
 0xace   :  { %v3286_v13 = vpop.eup %3285  ;;  %v1483_v14 = vadd.f32 1e-05, %v1479_v34 }
 0xacf   :  { %v1490_v15 = vmul.f32 %v3284_v38, %v1489_v28  ;;  %v1496_v45 = vmul.f32 %v3286_v13, %v1482_v3  ;;  %vm1502_vm7 = vweird.f32 %v3286_v13 }
 0xad0   :  { %3287 = vrsqrt.f32 %v1483_v14  ;;  %vm1503_vm11 = vmor %vm1501_vm9, %vm1502_vm7  ;;  %vm1511_vm13 = vweird.f32 %v1483_v14 }
 0xad1   :  { %v1497_v46 = vmul.f32 %v3286_v13, %v1496_v45  ;;  %v1494_v36 = vsel %vm1493_vm6, %v3284_v38, %v1490_v15 }
 0xad2   :  { %v1525_v4 = vmul.f32 %v1494_v36, %v1457_v17 }
 0xad3   :  { %v1498_v48 = vmul.f32 0.5, %v1497_v46  ;;  %v1476_v53 = vpop.xlane.xlu2 %1475 }
 0xad4   :  { %v1480_v9 = vmul.f32 %v1476_v53, %v3773_v10  ;;  %v1532_v2 = vmul.f32 %v3191_v57, %v1525_v4 }
 0xad5   :  { %v1499_v55 = vsub.f32 1.5, %v1498_v48 }
 0xad6   :  { %v3288_v16 = vpop.eup %3287  ;;  %v1484_v43 = vadd.f32 1e-05, %v1480_v9  ;;  %v4233_v22 = vadd.f32 %v3192_v11, %v1532_v2 }
 0xad7   :  { %v1500_v58 = vmul.f32 %v3286_v13, %v1499_v55  ;;  %v1506_v5 = vmul.f32 %v3288_v16, %v1483_v14  ;;  %vm1512_vm12 = vweird.f32 %v3288_v16 }
 0xad8   :  { %3289 = vrsqrt.f32 %v1484_v43  ;;  %vm1513_vm14 = vmor %vm1511_vm13, %vm1512_vm12  ;;  %vm1521_vm1 = vweird.f32 %v1484_v43 }
 0xad9   :  { %v1504_v63 = vsel %vm1503_vm11, %v3286_v13, %v1500_v58  ;;  %v1507_v0 = vmul.f32 %v3288_v16, %v1506_v5 }
 0xada   :  { %v1526_v44 = vmul.f32 %v1504_v63, %v4208_v33 }
 0xadb   :  { %v1508_v49 = vmul.f32 0.5, %v1507_v0 }
 0xadc   :  { %v1533_v47 = vmul.f32 %v3191_v57, %v1526_v44 }
 0xadd   :  { %v1509_v6 = vsub.f32 1.5, %v1508_v49 }
 0xade   :  { %v3290_v20 = vpop.eup %3289  ;;  %v4235_v54 = vadd.f32 %v3192_v11, %v1533_v47 }
 0xadf   :  { %v1510_v12 = vmul.f32 %v3288_v16, %v1509_v6  ;;  %v1516_v17 = vmul.f32 %v3290_v20, %v1484_v43  ;;  %vm1522_vm15 = vweird.f32 %v3290_v20 }
 0xae0   :  { %v1543_v19 = vpack.c.bf16 %v4235_v54, %v4233_v22  ;;  %vm1523_vm2 = vmor %vm1521_vm1, %vm1522_vm15 }
 0xae1   :  { %v1517_v24 = vmul.f32 %v3290_v20, %v1516_v17  ;;  %v1514_v18 = vsel %vm1513_vm14, %v3288_v16, %v1510_v12 }
 0xae2   :  { %2912 = vmatmul.msk.bf16.vlgmr.msrb.gmra.mxu0 %vm198_vm0, %v1543_v19  ;;  %v1527_v51 = vmul.f32 %v1514_v18, %v4214_v25  ;;  %v3193_v25 = vld [vmem:[%s4661_s5 + $0x1] ss:$0 sm:$0xff] }
 0xae3   :  { %v1518_v50 = vmul.f32 0.5, %v1517_v24 }
 0xae4   :  { %v1534_v26 = vmul.f32 %v3191_v57, %v1527_v51 }
 0xae5   :  { %v1519_v33 = vsub.f32 1.5, %v1518_v50 }
 0xae6   :  { %v4242_v56 = vadd.f32 %v3192_v11, %v1534_v26 }
 0xae7   :  { %v1520_v8 = vmul.f32 %v3290_v20, %v1519_v33 }
 0xae9   :  { %v1524_v39 = vsel %vm1523_vm2, %v3290_v20, %v1520_v8 }
 0xaea   :  { %v1528_v52 = vmul.f32 %v1524_v39, %v4220_v29 }
 0xaec   :  { %v1535_v1 = vmul.f32 %v3191_v57, %v1528_v52 }
 0xaee   :  { %v4244_v59 = vadd.f32 %v3192_v11, %v1535_v1 }
 0xaf0   :  { %v1544_v27 = vpack.c.bf16 %v4244_v59, %v4242_v56 }
 0xaf2   :  { %2913 = vmatmul.msk.bf16.gmra.mxu0 %vm198_vm0, %v1544_v27 }
 0xb5f   :  { %v1582_v60 = vpop.f32.mrf.mxu0 }
 0xb60   :  { %v1583_v30 = vadd.f32 %v3193_v25, %v1582_v60 }
 0xb62   :  { %1690 = vrot.lane.b32.xlu0 %v1583_v30, %s3630_s17  ;;  %1594 = vrot.lane.b32.xlu2 %v1583_v30, %s3631_s18 }
 0xb67   :  { %v1584_v29 = vpop.f32.mrf.mxu0 }
 0xb68   :  { %v1585_v31 = vadd.f32 %v3193_v25, %v1584_v29 }
 0xb6a   :  { %1692 = vrot.lane.b32.xlu1 %v1585_v31, %s3630_s17  ;;  %1686 = vrot.lane.b32.xlu0 %v1583_v30, %s3629_s1  ;;  %v4294_v37 = vpack.i.bf16 %v1583_v30, %v1585_v31 }
 0xb6b   :  { %1786 = vrot.lane.b32.xlu2 %v1583_v30, %s3634_s22 }
 0xb6f   :  { %v1587_v61 = vpop.f32.mrf.mxu0 }
 0xb70   :  { %v4269_v35 = vadd.f32 %v3193_v25, %v1587_v61 }
 0xb72   :  { %1882 = vrot.lane.b32.xlu1 %v1583_v30, %s3632_s2  ;;  %1596 = vrot.lane.b32.xlu0 %v1585_v31, %s3631_s18 }
 0xb73   :  { %1688 = vrot.lane.b32.xlu2 %v1585_v31, %s3629_s1 }
 0xb77   :  { %v1589_v7 = vpop.f32.mrf.mxu0 }
 0xb78   :  { %v4263_v21 = vadd.f32 %v3193_v25, %v1589_v7 }
 0xb7a   :  { %1788 = vrot.lane.b32.xlu1 %v1585_v31, %s3634_s22  ;;  %1782 = vrot.lane.b32.xlu0 %v1583_v30, %s3635_s23 }
 0xb7b   :  { %1878 = vrot.lane.b32.xlu2 %v1583_v30, %s3633_s21 }
 0xb82   :  { %1784 = vrot.lane.b32.xlu1 %v1585_v31, %s3635_s23  ;;  %1884 = vrot.lane.b32.xlu0 %v1585_v31, %s3632_s2 }
 0xb83   :  { %2008 = vrot.lane.b32.xlu2 %v4263_v21, %s3631_s18 }
 0xb8a   :  { %1880 = vrot.lane.b32.xlu0 %v1585_v31, %s3633_s21  ;;  %2104 = vrot.lane.b32.xlu1 %v4263_v21, %s3630_s17 }
 0xb8b   :  { %2102 = vrot.lane.b32.xlu2 %v4269_v35, %s3630_s17 }
 0xb92   :  { %2098 = vrot.lane.b32.xlu1 %v4269_v35, %s3629_s1  ;;  %2006 = vrot.lane.b32.xlu0 %v4269_v35, %s3631_s18 }
 0xb93   :  { %2200 = vrot.lane.b32.xlu2 %v4263_v21, %s3634_s22 }
 0xb9a   :  { %2296 = vrot.lane.b32.xlu1 %v4263_v21, %s3632_s2  ;;  %2198 = vrot.lane.b32.xlu0 %v4269_v35, %s3634_s22 }
 0xb9b   :  { %2294 = vrot.lane.b32.xlu2 %v4269_v35, %s3632_s2 }
 0xba2   :  { %2194 = vrot.lane.b32.xlu1 %v4269_v35, %s3635_s23  ;;  %2100 = vrot.lane.b32.xlu0 %v4263_v21, %s3629_s1 }
 0xba3   :  { %2196 = vrot.lane.b32.xlu2 %v4263_v21, %s3635_s23 }
 0xbaa   :  { %2292 = vrot.lane.b32.xlu1 %v4263_v21, %s3633_s21  ;;  %2290 = vrot.lane.b32.xlu0 %v4269_v35, %s3633_s21 }
 0xbab   :  { %3114 = vrot.lane.b32.xlu2 %v4294_v37, %s3616_s19 }
 0xbbc   :  { %v1595_v38 = vpop.permute.xlu2 %1594 }
 0xbc5   :  { %v1787_v3 = vpop.permute.xlu2 %1786 }
 0xbcd   :  { %v1689_v40 = vpop.permute.xlu2 %1688 }
 0xbd4   :  { %v1691_v32 = vpop.permute.xlu0 %1690 }
 0xbd5   :  { %v1879_v41 = vpop.permute.xlu2 %1878 }
 0xbdc   :  { %v1693_v42 = vpop.permute.xlu1 %1692  ;;  %v1687_v34 = vpop.permute.xlu0 %1686 }
 0xbdd   :  { %v2009_v28 = vpop.permute.xlu2 %2008  ;;  %2920 = vmatpush.xpose.msk.msrb.mxu2 %vm361_vm8, %v1693_v42 }
 0xbe1   :  { %2921 = vmatpush.xpose.msk.msrb.mxu2 %vm361_vm8, %v1691_v32 }
 0xbe4   :  { %v1883_v13 = vpop.permute.xlu1 %1882  ;;  %2922 = vmatmul.msk.f32.vlgmr.msrb.gmra.mxu2 %vm361_vm8, %v1687_v34  ;;  %v1597_v14 = vpop.permute.xlu0 %1596 }
 0xbe5   :  { %v2103_v15 = vpop.permute.xlu2 %2102  ;;  %2914 = vmatpush.xpose.msk.msrb.mxu1 %vm361_vm8, %v1597_v14 }
 0xbe9   :  { %2915 = vmatpush.xpose.msk.msrb.mxu1 %vm361_vm8, %v1595_v38 }
 0xbec   :  { %v1789_v45 = vpop.permute.xlu1 %1788  ;;  %v1783_v46 = vpop.permute.xlu0 %1782  ;;  %2916 = vmatmul.msk.f32.vlgmr.msrb.gmra.mxu1 %vm361_vm8, %v1583_v30  ;;  %2923 = vmatmul.msk.f32.gmra.mxu2 %vm361_vm8, %v1689_v40 }
 0xbed   :  { %v2201_v36 = vpop.permute.xlu2 %2200  ;;  %2926 = vmatpush.xpose.msk.msra.mxu1 %vm361_vm8, %v1789_v45 }
 0xbf1   :  { %2927 = vmatpush.xpose.msk.msra.mxu1 %vm361_vm8, %v1787_v3 }
 0xbf4   :  { %v1785_v48 = vpop.permute.xlu1 %1784  ;;  %v1885_v53 = vpop.permute.xlu0 %1884  ;;  %2917 = vmatmul.msk.f32.gmra.mxu1 %vm361_vm8, %v1585_v31 }
 0xbf5   :  { %2938 = vmatpush.xpose.msk.msrb.mxu1 %vm361_vm8, %v2009_v28  ;;  %v2295_v9 = vpop.permute.xlu2 %2294  ;;  %2932 = vmatpush.xpose.msk.msra.mxu2 %vm361_vm8, %v1885_v53 }
 0xbf9   :  { %2933 = vmatpush.xpose.msk.msra.mxu2 %vm361_vm8, %v1883_v13 }
 0xbfc   :  { %v1881_v55 = vpop.permute.xlu0 %1880  ;;  %v2105_v16 = vpop.permute.xlu1 %2104  ;;  %2928 = vmatmul.msk.f32.vlgmr.msra.gmra.mxu1 %vm361_vm8, %v1783_v46  ;;  %2934 = vmatmul.msk.f32.vlgmr.msra.gmra.mxu2 %vm361_vm8, %v1879_v41 }
 0xbfd   :  { %v2197_v57 = vpop.permute.xlu2 %2196  ;;  %2944 = vmatpush.xpose.msk.msrb.mxu2 %vm361_vm8, %v2105_v16 }
 0xc01   :  { %2945 = vmatpush.xpose.msk.msrb.mxu2 %vm361_vm8, %v2103_v15 }
 0xc04   :  { %v2099_v4 = vpop.permute.xlu1 %2098  ;;  %v2007_v43 = vpop.permute.xlu0 %2006  ;;  %2929 = vmatmul.msk.f32.gmra.mxu1 %vm361_vm8, %v1785_v48  ;;  %2935 = vmatmul.msk.f32.gmra.mxu2 %vm361_vm8, %v1881_v55 }
 0xc05   :  { %v3115_v58 = vpop.permute.xlu2 %3114  ;;  %2939 = vmatpush.xpose.msk.msrb.mxu1 %vm361_vm8, %v2007_v43 }
 0xc06   :  { %v3116_v5 = vunpack.i.l.bf16 %v3115_v58  ;;  %v3117_v63 = vunpack.i.h.bf16 %v3115_v58 }
 0xc08   :  { %1677 = vmatpush.msrb.mxu3 %v3116_v5 }
 0xc09   :  { %2950 = vmatpush.xpose.msk.msra.mxu1 %vm361_vm8, %v2201_v36 }
 0xc0a   :  { %1678 = vmatpush.msrb.mxu3 %v3117_v63 }
 0xc0c   :  { %v2297_v0 = vpop.permute.xlu1 %2296  ;;  %v2199_v11 = vpop.permute.xlu0 %2198  ;;  %2940 = vmatmul.msk.f32.vlgmr.msrb.gmra.mxu1 %vm361_vm8, %v4269_v35  ;;  %2946 = vmatmul.msk.f32.vlgmr.msrb.gmra.mxu2 %vm361_vm8, %v2099_v4 }
 0xc0d   :  { %2951 = vmatpush.xpose.msk.msra.mxu1 %vm361_vm8, %v2199_v11  ;;  %2956 = vmatpush.xpose.msk.msra.mxu2 %vm361_vm8, %v2297_v0 }
 0xc11   :  { %2957 = vmatpush.xpose.msk.msra.mxu2 %vm361_vm8, %v2295_v9 }
 0xc14   :  { %v2101_v2 = vpop.permute.xlu0 %2100  ;;  %2941 = vmatmul.msk.f32.gmra.mxu1 %vm361_vm8, %v4263_v21  ;;  %v2195_v44 = vpop.permute.xlu1 %2194 }
 0xc15   :  { %2947 = vmatmul.msk.f32.gmra.mxu2 %vm361_vm8, %v2101_v2 }
 0xc1c   :  { %v2291_v49 = vpop.permute.xlu0 %2290  ;;  %2952 = vmatmul.msk.f32.vlgmr.msra.gmra.mxu1 %vm361_vm8, %v2195_v44  ;;  %v2293_v47 = vpop.permute.xlu1 %2292 }
 0xc1d   :  { %2958 = vmatmul.msk.f32.vlgmr.msra.gmra.mxu2 %vm361_vm8, %v2291_v49 }
 0xc24   :  { %2953 = vmatmul.msk.f32.gmra.mxu1 %vm361_vm8, %v2197_v57 }
 0xc25   :  { %2959 = vmatmul.msk.f32.gmra.mxu2 %vm361_vm8, %v2293_v47 }
 0xc67   :  { %v1719_v6 = vpop.f32.mrf.mxu2 }
 0xc68   :  { %v4337_v20 = vadd.f32 %v1719_v6, %v3852_v23 }
 0xc69   :  { %v1623_v12 = vpop.f32.mrf.mxu1 }
 0xc6a   :  { %v4340_v17 = vadd.f32 %v1623_v12, %v3852_v23  ;;  %v1725_v19 = vsel %vm393_vm10, %v4337_v20, -inf }
 0xc6b   :  { %1726 = vmax.xlane.f32.xlu2 %v1725_v19 }
 0xc6c   :  { %v1629_v24 = vsel %vm393_vm10, %v4340_v17, -inf }
 0xc6d   :  { %1630 = vmax.xlane.f32.xlu0 %v1629_v24 }
 0xc6f   :  { %v1722_v18 = vpop.f32.mrf.mxu2 }
 0xc70   :  { %v4347_v50 = vadd.f32 %v1722_v18, %v3852_v23 }
 0xc71   :  { %v1626_v33 = vpop.f32.mrf.mxu1 }
 0xc72   :  { %v4350_v51 = vadd.f32 %v1626_v33, %v3852_v23  ;;  %v1728_v39 = vsel %vm393_vm10, %v4347_v50, -inf }
 0xc74   :  { %v1632_v8 = vsel %vm393_vm10, %v4350_v51, -inf }
 0xc75   :  { %1633 = vmax.xlane.f32.xlu1 %v1632_v8  ;;  %1729 = vmax.xlane.f32.xlu0 %v1728_v39 }
 0xc79   :  { %v1815_v52 = vpop.f32.mrf.mxu1 }
 0xc7a   :  { %v4357_v26 = vadd.f32 %v1815_v52, %v3852_v23 }
 0xc7c   :  { %v1821_v1 = vsel %vm393_vm10, %v4357_v26, -inf }
 0xc7d   :  { %1822 = vmax.xlane.f32.xlu2 %v1821_v1 }
 0xc7f   :  { %v1911_v27 = vpop.f32.mrf.mxu2 }
 0xc80   :  { %v4362_v25 = vadd.f32 %v1911_v27, %v3852_v23 }
 0xc81   :  { %v1818_v60 = vpop.f32.mrf.mxu1 }
 0xc82   :  { %v4365_v30 = vadd.f32 %v1818_v60, %v3852_v23  ;;  %v1917_v29 = vsel %vm393_vm10, %v4362_v25, -inf }
 0xc83   :  { %1918 = vmax.xlane.f32.xlu1 %v1917_v29 }
 0xc84   :  { %v1824_v31 = vsel %vm393_vm10, %v4365_v30, -inf }
 0xc85   :  { %1825 = vmax.xlane.f32.xlu0 %v1824_v31 }
 0xc87   :  { %v1914_v61 = vpop.f32.mrf.mxu2 }
 0xc88   :  { %v4372_v7 = vadd.f32 %v1914_v61, %v3852_v23 }
 0xc89   :  { %v2035_v38 = vpop.f32.mrf.mxu1 }
 0xc8a   :  { %v4375_v3 = vadd.f32 %v2035_v38, %v3965_v62  ;;  %v1920_v40 = vsel %vm393_vm10, %v4372_v7, -inf }
 0xc8b   :  { %1921 = vmax.xlane.f32.xlu2 %v1920_v40 }
 0xc8c   :  { %v2041_v32 = vsel %vm393_vm10, %v4375_v3, -inf }
 0xc8d   :  { %2042 = vmax.xlane.f32.xlu1 %v2041_v32 }
 0xc8f   :  { %v2131_v41 = vpop.f32.mrf.mxu2 }
 0xc90   :  { %v4404_v9 = vadd.f32 %v2131_v41, %v3965_v62 }
 0xc91   :  { %v2038_v42 = vpop.f32.mrf.mxu1 }
 0xc92   :  { %v4382_v34 = vadd.f32 %v2038_v42, %v3965_v62  ;;  %v2137_v16 = vsel %vm393_vm10, %v4404_v9, -inf }
 0xc94   :  { %v2044_v23 = vsel %vm393_vm10, %v4382_v34, -inf }
 0xc95   :  { %2045 = vmax.xlane.f32.xlu2 %v2044_v23 }
 0xc98   :  { %v2134_v28 = vpop.f32.mrf.mxu2 }
 0xc99   :  { %v4387_v13 = vadd.f32 %v2134_v28, %v3965_v62  ;;  %3119 = vrot.lane.b32.xlu0 %v4294_v37, %s3636_s24  ;;  %v2227_v55 = vpop.f32.mrf.mxu1 }
 0xc9a   :  { %v4409_v57 = vadd.f32 %v2227_v55, %v3965_v62 }
 0xc9b   :  { %v2140_v14 = vsel %vm393_vm10, %v4387_v13, -inf }
 0xc9c   :  { %2141 = vmax.xlane.f32.xlu1 %v2140_v14  ;;  %v2233_v4 = vsel %vm393_vm10, %v4409_v57, -inf }
 0xca0   :  { %v2323_v15 = vpop.f32.mrf.mxu2 }
 0xca1   :  { %v4394_v45 = vadd.f32 %v2323_v15, %v3965_v62  ;;  %v2230_v43 = vpop.f32.mrf.mxu1 }
 0xca2   :  { %v4414_v58 = vadd.f32 %v2230_v43, %v3965_v62 }
 0xca3   :  { %v2329_v46 = vsel %vm393_vm10, %v4394_v45, -inf }
 0xca4   :  { %2330 = vmax.xlane.f32.xlu1 %v2329_v46  ;;  %v2236_v5 = vsel %vm393_vm10, %v4414_v58, -inf }
 0xca8   :  { %v2326_v36 = vpop.f32.mrf.mxu2 }
 0xca9   :  { %v4399_v48 = vadd.f32 %v2326_v36, %v3965_v62 }
 0xcab   :  { %v2332_v53 = vsel %vm393_vm10, %v4399_v48, -inf }
 0xcac   :  { %2333 = vmax.xlane.f32.xlu1 %v2332_v53 }
 0xcc3   :  { %2138 = vmax.xlane.f32.xlu0 %v2137_v16  ;;  %v3133_v16 = vpack.i.bf16 %v4269_v35, %v4263_v21 }
 0xccb   :  { %2234 = vmax.xlane.f32.xlu0 %v2233_v4 }
 0xcd3   :  { %2237 = vmax.xlane.f32.xlu0 %v2236_v5 }
 0xcde   :  { %v1727_v63 = vpop.xlane.xlu2 %1726 }
 0xcdf   :  { %v1731_v0 = vsub.f32 %v4337_v20, %v1727_v63 }
 0xce0   :  { %v1631_v11 = vpop.xlane.xlu0 %1630 }
 0xce1   :  { %v1733_v2 = vmul.f32 1.442695, %v1731_v0  ;;  %v1635_v44 = vsub.f32 %v4340_v17, %v1631_v11 }
 0xce3   :  { %3291 = vpow2.f32 %v1733_v2  ;;  %v1637_v49 = vmul.f32 1.442695, %v1635_v44 }
 0xce5   :  { %3293 = vpow2.f32 %v1637_v49 }
 0xce8   :  { %v1634_v47 = vpop.xlane.xlu1 %1633  ;;  %v1730_v6 = vpop.xlane.xlu0 %1729 }
 0xce9   :  { %v4420_v12 = vpop.eup %3291  ;;  %v1636_v62 = vsub.f32 %v4350_v51, %v1634_v47  ;;  %v1732_v19 = vsub.f32 %v4347_v50, %v1730_v6 }
 0xcea   :  { %v1737_v24 = vsel %vm393_vm10, %v4420_v12, 0.0 }
 0xceb   :  { %v4426_v18 = vpop.eup %3293  ;;  %v1639_v20 = vmul.f32 1.442695, %v1636_v62  ;;  %v1735_v33 = vmul.f32 1.442695, %v1732_v19  ;;  %1738 = vadd.xlane.f32.xlu1 %v1737_v24 }
 0xcec   :  { %v1641_v17 = vsel %vm393_vm10, %v4426_v18, 0.0 }
 0xced   :  { %3295 = vpow2.f32 %v1639_v20  ;;  %1642 = vadd.xlane.f32.xlu2 %v1641_v17 }
 0xcee   :  { %3297 = vpow2.f32 %v1735_v33 }
 0xcf0   :  { %v1823_v8 = vpop.xlane.xlu2 %1822 }
 0xcf1   :  { %v1827_v39 = vsub.f32 %v4357_v26, %v1823_v8 }
 0xcf3   :  { %v4431_v51 = vpop.eup %3295  ;;  %v1829_v50 = vmul.f32 1.442695, %v1827_v39 }
 0xcf4   :  { %v4433_v52 = vpop.eup %3297  ;;  %v1644_v1 = vsel %vm393_vm10, %v4431_v51, 0.0 }
 0xcf5   :  { %3299 = vpow2.f32 %v1829_v50  ;;  %1645 = vadd.xlane.f32.xlu0 %v1644_v1  ;;  %v1740_v27 = vsel %vm393_vm10, %v4433_v52, 0.0 }
 0xcf6   :  { %1741 = vadd.xlane.f32.xlu1 %v1740_v27  ;;  %v1919_v60 = vpop.xlane.xlu1 %1918 }
 0xcf7   :  { %v1923_v29 = vsub.f32 %v4362_v25, %v1919_v60 }
 0xcf8   :  { %v1826_v28 = vpop.xlane.xlu0 %1825 }
 0xcf9   :  { %v1925_v31 = vmul.f32 1.442695, %v1923_v29  ;;  %v1828_v4 = vsub.f32 %v4365_v30, %v1826_v28 }
 0xcfb   :  { %v4440_v61 = vpop.eup %3299  ;;  %3301 = vpow2.f32 %v1925_v31  ;;  %v1831_v43 = vmul.f32 1.442695, %v1828_v4 }
 0xcfc   :  { %v1833_v26 = vsel %vm393_vm10, %v4440_v61, 0.0 }
 0xcfd   :  { %1834 = vadd.xlane.f32.xlu2 %v1833_v26 }
 0xcfe   :  { %v1922_v38 = vpop.xlane.xlu2 %1921 }
 0xcff   :  { %v1924_v40 = vsub.f32 %v4372_v7, %v1922_v38 }
 0xd00   :  { %v2043_v32 = vpop.xlane.xlu1 %2042 }
 0xd01   :  { %v4445_v41 = vpop.eup %3301  ;;  %v1927_v42 = vmul.f32 1.442695, %v1924_v40  ;;  %v2047_v23 = vsub.f32 %v4375_v3, %v2043_v32 }
 0xd02   :  { %v1929_v25 = vsel %vm393_vm10, %v4445_v41, 0.0 }
 0xd03   :  { %3303 = vpow2.f32 %v1927_v42  ;;  %1930 = vadd.xlane.f32.xlu0 %v1929_v25  ;;  %v2049_v14 = vmul.f32 1.442695, %v2047_v23 }
 0xd05   :  { %3305 = vpow2.f32 %v2049_v14 }
 0xd06   :  { %3307 = vpow2.f32 %v1831_v43 }
 0xd08   :  { %v2046_v5 = vpop.xlane.xlu2 %2045 }
 0xd09   :  { %v4450_v15 = vpop.eup %3303  ;;  %v2048_v63 = vsub.f32 %v4382_v34, %v2046_v5 }
 0xd0a   :  { %v1932_v46 = vsel %vm393_vm10, %v4450_v15, 0.0 }
 0xd0b   :  { %v3120_v7 = vpop.permute.xlu0 %3119  ;;  %1933 = vadd.xlane.f32.xlu0 %v1932_v46  ;;  %v4454_v55 = vpop.eup %3305  ;;  %v2051_v11 = vmul.f32 1.442695, %v2048_v63 }
 0xd0c   :  { %v3121_v36 = vunpack.i.l.bf16 %v3120_v7  ;;  %v3122_v53 = vunpack.i.h.bf16 %v3120_v7  ;;  %v2053_v3 = vsel %vm393_vm10, %v4454_v55, 0.0  ;;  %v4469_v2 = vpop.eup %3307 }
 0xd0d   :  { %3309 = vpow2.f32 %v2051_v11 }
 0xd0e   :  { %1773 = vmatpush.msra.mxu0 %v3121_v36 }
 0xd0f   :  { %3124 = vrot.lane.b32.xlu1 %v4294_v37, %s3638_s3  ;;  %v2142_v0 = vpop.xlane.xlu1 %2141 }
 0xd10   :  { %1774 = vmatpush.msra.mxu0 %v3122_v53  ;;  %v2144_v30 = vsub.f32 %v4387_v13, %v2142_v0 }
 0xd12   :  { %v2147_v47 = vmul.f32 1.442695, %v2144_v30 }
 0xd13   :  { %2054 = vadd.xlane.f32.xlu0 %v2053_v3  ;;  %v4476_v34 = vpop.eup %3309 }
 0xd14   :  { %v2056_v19 = vsel %vm393_vm10, %v4476_v34, 0.0 }
 0xd15   :  { %3129 = vrot.lane.b32.xlu2 %v4294_v37, %s3639_s26  ;;  %v1836_v37 = vsel %vm393_vm10, %v4469_v2, 0.0 }
 0xd17   :  { %v2331_v49 = vpop.xlane.xlu1 %2330 }
 0xd1d   :  { %3134 = vrot.lane.b32.xlu2 %v3133_v16, %s3616_s19 }
 0xd1f   :  { %v2334_v17 = vpop.xlane.xlu1 %2333 }
 0xd20   :  { %v2336_v1 = vsub.f32 %v4399_v48, %v2334_v17 }
 0xd22   :  { %v2339_v29 = vmul.f32 1.442695, %v2336_v1 }
 0xd25   :  { %3139 = vrot.lane.b32.xlu2 %v3133_v16, %s3636_s24 }
 0xd2d   :  { %3144 = vrot.lane.b32.xlu2 %v3133_v16, %s3638_s3  ;;  %s2797_s3 = sshll.u32 %s4672_s16, 4  ;;  %s2798_s3 = int_to_ptr.hbm [resolvable:$true] %s2797_s3 }
 0xd35   :  { %3149 = vrot.lane.b32.xlu2 %v3133_v16, %s3639_s26 }
 0xd36   :  { %v2139_v21 = vpop.xlane.xlu0 %2138 }
 0xd37   :  { %v2143_v35 = vsub.f32 %v4404_v9, %v2139_v21  ;;  %v2335_v9 = vsub.f32 %v4394_v45, %v2331_v49 }
 0xd39   :  { %v2145_v44 = vmul.f32 1.442695, %v2143_v35  ;;  %1837 = vadd.xlane.f32.xlu1 %v1836_v37  ;;  %v2337_v33 = vmul.f32 1.442695, %v2335_v9 }
 0xd3b   :  { %3311 = vpow2.f32 %v2145_v44 }
 0xd3c   :  { %3313 = vpow2.f32 %v2147_v47 }
 0xd3e   :  { %v2235_v6 = vpop.xlane.xlu0 %2234 }
 0xd3f   :  { %v2239_v62 = vsub.f32 %v4409_v57, %v2235_v6 }
 0xd41   :  { %v4481_v24 = vpop.eup %3311  ;;  %v2241_v20 = vmul.f32 1.442695, %v2239_v62  ;;  %2057 = vadd.xlane.f32.xlu1 %v2056_v19 }
 0xd42   :  { %v2149_v13 = vsel %vm393_vm10, %v4481_v24, 0.0  ;;  %v4486_v39 = vpop.eup %3313 }
 0xd43   :  { %3315 = vpow2.f32 %v2241_v20  ;;  %2150 = vadd.xlane.f32.xlu0 %v2149_v13  ;;  %v2152_v27 = vsel %vm393_vm10, %v4486_v39, 0.0 }
 0xd44   :  { %3317 = vpow2.f32 %v2337_v33 }
 0xd46   :  { %v2238_v8 = vpop.xlane.xlu0 %2237 }
 0xd47   :  { %v2240_v57 = vsub.f32 %v4414_v58, %v2238_v8 }
 0xd49   :  { %v4489_v50 = vpop.eup %3315  ;;  %v2243_v45 = vmul.f32 1.442695, %v2240_v57 }
 0xd4a   :  { %v2245_v60 = vsel %vm393_vm10, %v4489_v50, 0.0  ;;  %v4496_v31 = vpop.eup %3317 }
 0xd4b   :  { %3319 = vpow2.f32 %v2243_v45  ;;  %2153 = vadd.xlane.f32.xlu0 %v2152_v27  ;;  %2246 = vadd.xlane.f32.xlu1 %v2245_v60  ;;  %v2341_v58 = vsel %vm393_vm10, %v4496_v31, 0.0 }
 0xd4c   :  { %3321 = vpow2.f32 %v2339_v29 }
 0xd51   :  { %v4498_v26 = vpop.eup %3319 }
 0xd52   :  { %v2248_v48 = vsel %vm393_vm10, %v4498_v26, 0.0  ;;  %v4504_v38 = vpop.eup %3321 }
 0xd53   :  { %2342 = vadd.xlane.f32.xlu0 %v2341_v58  ;;  %2249 = vadd.xlane.f32.xlu1 %v2248_v48  ;;  %v2344_v40 = vsel %vm393_vm10, %v4504_v38, 0.0 }
 0xd5b   :  { %2345 = vadd.xlane.f32.xlu0 %v2344_v40 }
 0xd5e   :  { %v1739_v32 = vpop.xlane.xlu1 %1738 }
 0xd5f   :  { %3323 = vrcp.f32 %v1739_v32 }
 0xd60   :  { %v1643_v42 = vpop.xlane.xlu2 %1642 }
 0xd61   :  { %3325 = vrcp.f32 %v1643_v42 }
 0xd65   :  { %v3324_v23 = vpop.eup %3323 }
 0xd66   :  { %v1745_v25 = vmul.f32 %v3324_v23, %v4420_v12 }
 0xd67   :  { %v3326_v28 = vpop.eup %3325 }
 0xd68   :  { %v1649_v14 = vmul.f32 %v3326_v28, %v4426_v18  ;;  %v1646_v46 = vpop.xlane.xlu0 %1645  ;;  %2924 = vmatmul.msk.f32.vlgmr.msra.gmra.mxu0 %vm393_vm10, %v1745_v25 }
 0xd69   :  { %3327 = vrcp.f32 %v1646_v46  ;;  %v1742_v7 = vpop.xlane.xlu1 %1741 }
 0xd6a   :  { %3329 = vrcp.f32 %v1742_v7  ;;  %2918 = vmatmul.msk.f32.vlgmr.msrb.gmra.mxu3 %vm393_vm10, %v1649_v14 }
 0xd6f   :  { %v3328_v36 = vpop.eup %3327 }
 0xd70   :  { %v3330_v53 = vpop.eup %3329  ;;  %v1835_v3 = vpop.xlane.xlu2 %1834  ;;  %v1650_v16 = vmul.f32 %v3328_v36, %v4431_v51 }
 0xd71   :  { %v1746_v4 = vmul.f32 %v3330_v53, %v4433_v52 }
 0xd72   :  { %2919 = vmatmul.msk.f32.gmra.mxu3 %vm393_vm10, %v1650_v16 }
 0xd73   :  { %2925 = vmatmul.msk.f32.gmra.mxu0 %vm393_vm10, %v1746_v4 }
 0xd76   :  { %v1931_v12 = vpop.xlane.xlu0 %1930 }
 0xd77   :  { %3331 = vrcp.f32 %v1931_v12 }
 0xd78   :  { %v3130_v18 = vpop.permute.xlu2 %3129  ;;  %3333 = vrcp.f32 %v1835_v3 }
 0xd79   :  { %v3131_v43 = vunpack.i.l.bf16 %v3130_v18  ;;  %v3132_v5 = vunpack.i.h.bf16 %v3130_v18 }
 0xd7b   :  { %1965 = vmatpush.msrb.mxu0 %v3131_v43 }
 0xd7d   :  { %v3332_v63 = vpop.eup %3331  ;;  %1966 = vmatpush.msrb.mxu0 %v3132_v5 }
 0xd7e   :  { %v1937_v0 = vmul.f32 %v3332_v63, %v4445_v41  ;;  %v1934_v11 = vpop.xlane.xlu0 %1933  ;;  %v3334_v21 = vpop.eup %3333 }
 0xd7f   :  { %3335 = vrcp.f32 %v1934_v11  ;;  %v1841_v44 = vmul.f32 %v3334_v21, %v4440_v61 }
 0xd80   :  { %v3135_v51 = vpop.permute.xlu2 %3134  ;;  %2936 = vmatmul.msk.f32.vlgmr.msrb.gmra.mxu0 %vm393_vm10, %v1937_v0 }
 0xd81   :  { %v3125_v52 = vpop.permute.xlu1 %3124  ;;  %v3136_v49 = vunpack.i.l.bf16 %v3135_v51  ;;  %v3137_v41 = vunpack.i.h.bf16 %v3135_v51 }
 0xd82   :  { %v3126_v35 = vunpack.i.l.bf16 %v3125_v52  ;;  %v3127_v37 = vunpack.i.h.bf16 %v3125_v52 }
 0xd84   :  { %1869 = vmatpush.msra.mxu3 %v3126_v35 }
 0xd85   :  { %v3336_v30 = vpop.eup %3335 }
 0xd86   :  { %1870 = vmatpush.msra.mxu3 %v3127_v37  ;;  %v1938_v47 = vmul.f32 %v3336_v30, %v4450_v15  ;;  %v2055_v8 = vpop.xlane.xlu0 %2054 }
 0xd87   :  { %2930 = vmatmul.msk.f32.vlgmr.msra.gmra.mxu3 %vm393_vm10, %v1841_v44 }
 0xd88   :  { %2089 = vmatpush.msrb.mxu3 %v3136_v49  ;;  %v3140_v6 = vpop.permute.xlu2 %3139  ;;  %2937 = vmatmul.msk.f32.gmra.mxu0 %vm393_vm10, %v1938_v47 }
 0xd89   :  { %v3141_v62 = vunpack.i.l.bf16 %v3140_v6  ;;  %v3142_v19 = vunpack.i.h.bf16 %v3140_v6  ;;  %v3008_v6 = vld [vmem:[#allocation12 + $0x10] sm:$0xff] }
 0xd8a   :  { %2090 = vmatpush.msrb.mxu3 %v3137_v41  ;;  %v3009_v41 = vld [vmem:[#allocation12 + $0x18] sm:$0xff] }
 0xd8b   :  { %2185 = vmatpush.msra.mxu0 %v3141_v62  ;;  %2452 = vmatpush.bf16.msrb.mxu1 %v3009_v41 }
 0xd8d   :  { %2186 = vmatpush.msra.mxu0 %v3142_v19 }
 0xd8f   :  { %2453 = vmatpush.bf16.msrb.mxu1 %v3008_v6 }
 0xd90   :  { %v3145_v9 = vpop.permute.xlu2 %3144 }
 0xd91   :  { %v3146_v20 = vunpack.i.l.bf16 %v3145_v9  ;;  %v3147_v13 = vunpack.i.h.bf16 %v3145_v9 }
 0xd93   :  { %2281 = vmatpush.msra.mxu3 %v3146_v20 }
 0xd95   :  { %2282 = vmatpush.msra.mxu3 %v3147_v13 }
 0xd98   :  { %v3150_v61 = vpop.permute.xlu2 %3149 }
 0xd99   :  { %v3151_v33 = vunpack.i.l.bf16 %v3150_v61  ;;  %v3152_v15 = vunpack.i.h.bf16 %v3150_v61 }
 0xd9b   :  { %2377 = vmatpush.msrb.mxu0 %v3151_v33 }
 0xd9d   :  { %2378 = vmatpush.msrb.mxu0 %v3152_v15 }
 0xdac   :  { %v1838_v17 = vpop.xlane.xlu1 %1837 }
 0xdad   :  { %3337 = vrcp.f32 %v1838_v17 }
 0xdae   :  { %3339 = vrcp.f32 %v2055_v8 }
 0xdb3   :  { %v3338_v57 = vpop.eup %3337 }
 0xdb4   :  { %v1842_v1 = vmul.f32 %v3338_v57, %v4469_v2  ;;  %v2058_v45 = vpop.xlane.xlu1 %2057  ;;  %v3340_v60 = vpop.eup %3339 }
 0xdb5   :  { %v2061_v29 = vmul.f32 %v3340_v60, %v4454_v55 }
 0xdb6   :  { %2931 = vmatmul.msk.f32.gmra.mxu3 %vm393_vm10, %v1842_v1  ;;  %v2151_v27 = vpop.xlane.xlu0 %2150 }
 0xdb7   :  { %3341 = vrcp.f32 %v2151_v27 }
 0xdb8   :  { %3343 = vrcp.f32 %v2058_v45 }
 0xdbd   :  { %v3342_v58 = vpop.eup %3341 }
 0xdbe   :  { %v2157_v48 = vmul.f32 %v3342_v58, %v4481_v24  ;;  %2942 = vmatmul.msk.f32.vlgmr.msrb.gmra.mxu3 %vm393_vm10, %v2061_v29  ;;  %v2154_v40 = vpop.xlane.xlu0 %2153  ;;  %v2247_v32 = vpop.xlane.xlu1 %2246 }
 0xdbf   :  { %3345 = vrcp.f32 %v2154_v40  ;;  %v3344_v2 = vpop.eup %3343 }
 0xdc0   :  { %2948 = vmatmul.msk.f32.vlgmr.msra.gmra.mxu0 %vm393_vm10, %v2157_v48  ;;  %3347 = vrcp.f32 %v2247_v32  ;;  %v2062_v42 = vmul.f32 %v3344_v2, %v4476_v34 }
 0xdc5   :  { %v3346_v23 = vpop.eup %3345 }
 0xdc6   :  { %2943 = vmatmul.msk.f32.gmra.mxu3 %vm393_vm10, %v2062_v42  ;;  %v2343_v25 = vpop.xlane.xlu0 %2342  ;;  %v2158_v55 = vmul.f32 %v3346_v23, %v4486_v39  ;;  %v2250_v28 = vpop.xlane.xlu1 %2249 }
 0xdc7   :  { %3349 = vrcp.f32 %v2343_v25  ;;  %v3348_v24 = vpop.eup %3347 }
 0xdc8   :  { %2949 = vmatmul.msk.f32.gmra.mxu0 %vm393_vm10, %v2158_v55  ;;  %3351 = vrcp.f32 %v2250_v28  ;;  %v2253_v14 = vmul.f32 %v3348_v24, %v4489_v50 }
 0xdcd   :  { %v3350_v46 = vpop.eup %3349 }
 0xdce   :  { %v2349_v7 = vmul.f32 %v3350_v46, %v4496_v31  ;;  %2954 = vmatmul.msk.f32.vlgmr.msra.gmra.mxu3 %vm393_vm10, %v2253_v14  ;;  %v2346_v34 = vpop.xlane.xlu0 %2345  ;;  %v3352_v36 = vpop.eup %3351 }
 0xdcf   :  { %3353 = vrcp.f32 %v2346_v34  ;;  %v2254_v39 = vmul.f32 %v3352_v36, %v4498_v26 }
 0xdd0   :  { %2960 = vmatmul.msk.f32.vlgmr.msrb.gmra.mxu0 %vm393_vm10, %v2349_v7 }
 0xdd5   :  { %v3354_v53 = vpop.eup %3353 }
 0xdd6   :  { %2955 = vmatmul.msk.f32.gmra.mxu3 %vm393_vm10, %v2254_v39  ;;  %v2350_v3 = vmul.f32 %v3354_v53, %v4504_v38  ;;  %v3194_v39 = vld [vmem:[%s4663_s7 + $0x1] ss:$0 sm:$0xff] }
 0xdd8   :  { %2961 = vmatmul.msk.f32.gmra.mxu0 %vm393_vm10, %v2350_v3 }
 0xde5   :  { %v1776_v50 = vpop.f32.mrf.mxu0 }
 0xded   :  { %v1680_v43 = vpop.f32.mrf.mxu3 }
 0xdf0   :  { %v1779_v16 = vpop.f32.mrf.mxu0 }
 0xdf1   :  { %v3153_v4 = vpack.i.bf16 %v1779_v16, %v1776_v50 }
 0xdf3   :  { %3154 = vrot.lane.b32.xlu1 %v3153_v4, %s3621_s30 }
 0xdf5   :  { %v1683_v5 = vpop.f32.mrf.mxu3 }
 0xdfd   :  { %v1968_v31 = vpop.f32.mrf.mxu0 }
 0xe05   :  { %v1971_v12 = vpop.f32.mrf.mxu0 }
 0xe06   :  { %v3163_v18 = vpack.i.bf16 %v1971_v12, %v1968_v31 }
 0xe08   :  { %3164 = vrot.lane.b32.xlu0 %v3163_v18, %s3640_s27 }
 0xe0a   :  { %v1872_v26 = vpop.f32.mrf.mxu3 }
 0xe39   :  { %v1875_v63 = vpop.f32.mrf.mxu3 }
 0xe3a   :  { %v3158_v0 = vpack.i.bf16 %v1875_v63, %v1872_v26 }
 0xe3c   :  { %3159 = vrot.lane.b32.xlu2 %v3158_v0, %s3626_s0 }
 0xe3d   :  { %v2188_v38 = vpop.f32.mrf.mxu0 }
 0xe41   :  { %v2092_v11 = vpop.f32.mrf.mxu3 }
 0xe45   :  { %v2191_v51 = vpop.f32.mrf.mxu0 }
 0xe46   :  { %v3168_v52 = vpack.i.bf16 %v2191_v51, %v2188_v38 }
 0xe48   :  { %3169 = vrot.lane.b32.xlu2 %v3168_v52, %s3621_s30 }
 0xe49   :  { %v2095_v21 = vpop.f32.mrf.mxu3 }
 0xe4d   :  { %v2380_v35 = vpop.f32.mrf.mxu0 }
 0xe51   :  { %v2284_v37 = vpop.f32.mrf.mxu3 }
 0xe55   :  { %v2383_v30 = vpop.f32.mrf.mxu0 }
 0xe56   :  { %v3178_v44 = vpack.i.bf16 %v2383_v30, %v2380_v35 }
 0xe58   :  { %3179 = vrot.lane.b32.xlu1 %v3178_v44, %s3640_s27 }
 0xe59   :  { %v2287_v49 = vpop.f32.mrf.mxu3 }
 0xe5a   :  { %v3173_v47 = vpack.i.bf16 %v2287_v49, %v2284_v37 }
 0xe5c   :  { %3174 = vrot.lane.b32.xlu2 %v3173_v47, %s3626_s0 }
 0xe65   :  { %v3155_v62 = vpop.permute.xlu1 %3154 }
 0xe66   :  { %v3157_v19 = vunpack.i.h.bf16 %v3155_v62  ;;  %v3156_v9 = vunpack.i.l.bf16 %v3155_v62 }
 0xe68   :  { %v1998_v15 = vsel %vm361_vm8, %v1680_v43, %v3156_v9  ;;  %v1999_v17 = vsel %vm361_vm8, %v1683_v5, %v3157_v19 }
 0xe7a   :  { %v3165_v20 = vpop.permute.xlu0 %3164 }
 0xe7b   :  { %v3167_v8 = vunpack.i.h.bf16 %v3165_v20  ;;  %v3166_v57 = vunpack.i.l.bf16 %v3165_v20 }
 0xe96   :  { %v3160_v13 = vpop.permute.xlu2 %3159 }
 0xe97   :  { %v3162_v61 = vunpack.i.h.bf16 %v3160_v13  ;;  %v3161_v33 = vunpack.i.l.bf16 %v3160_v13 }
 0xe99   :  { %v2001_v1 = vsel %vm393_vm10, %v1999_v17, %v3162_v61  ;;  %v2000_v45 = vsel %vm393_vm10, %v1998_v15, %v3161_v33  ;;  %v3011_v33 = vld [vmem:[#allocation13 + $0x18] sm:$0xff] }
 0xe9a   :  { %v2003_v27 = vsel %vm767_vm3, %v2001_v1, %v3167_v8  ;;  %v2002_v60 = vsel %vm767_vm3, %v2000_v45, %v3166_v57  ;;  %2611 = vmatpush.bf16.msrb.mxu3 %v3011_v33  ;;  %v3010_v57 = vld [vmem:[#allocation13 + $0x10] sm:$0xff] }
 0xe9b   :  { %v2416_v29 = vpack.c.bf16 %v2003_v27, %v2002_v60 }
 0xe9d   :  { %2971 = vmatmul.msk.bf16.vlgmr.msrb.gmra.mxu1 %vm198_vm0, %v2416_v29 }
 0xe9e   :  { %2612 = vmatpush.bf16.msrb.mxu3 %v3010_v57 }
 0xea2   :  { %v3170_v58 = vpop.permute.xlu2 %3169 }
 0xea3   :  { %v3172_v40 = vunpack.i.h.bf16 %v3170_v58  ;;  %v3171_v32 = vunpack.i.l.bf16 %v3170_v58 }
 0xea5   :  { %v2410_v25 = vsel %vm361_vm8, %v2092_v11, %v3171_v32  ;;  %v2411_v55 = vsel %vm361_vm8, %v2095_v21, %v3172_v40 }
 0xeb6   :  { %v3175_v48 = vpop.permute.xlu2 %3174 }
 0xeb7   :  { %v3177_v2 = vunpack.i.h.bf16 %v3175_v48  ;;  %v3176_v42 = vunpack.i.l.bf16 %v3175_v48 }
 0xeb9   :  { %v2413_v14 = vsel %vm393_vm10, %v2411_v55, %v3177_v2  ;;  %v2412_v46 = vsel %vm393_vm10, %v2410_v25, %v3176_v42 }
 0xeca   :  { %v3180_v23 = vpop.permute.xlu1 %3179 }
 0xecb   :  { %v3182_v28 = vunpack.i.h.bf16 %v3180_v23  ;;  %v3181_v24 = vunpack.i.l.bf16 %v3180_v23 }
 0xecd   :  { %v2414_v7 = vsel %vm767_vm3, %v2412_v46, %v3181_v24  ;;  %v2415_v34 = vsel %vm767_vm3, %v2413_v14, %v3182_v28  ;;  %v3195_v24 = vld [vmem:[%s4664_s8 + $0x1] ss:$0 sm:$0xff] }
 0xece   :  { %v2417_v36 = vpack.c.bf16 %v2415_v34, %v2414_v7  ;;  %v3196_v34 = vld [vmem:[%s4677_s20 + $0x1] ss:$0 sm:$0xff] }
 0xed0   :  { %2972 = vmatmul.msk.bf16.gmra.mxu1 %vm198_vm0, %v2417_v36 }
 0xf1a   :  { %v2455_v53 = vpop.f32.mrf.mxu1 }
 0xf1b   :  { %v2456_v3 = vadd.f32 %v3194_v39, %v2455_v53 }
 0xf1d   :  { %v2465_v50 = vadd.f32 %v2456_v3, %v4233_v22 }
 0xf1f   :  { %v2473_v16 = vsel %vm198_vm0, %v2465_v50, 0.0 }
 0xf20   :  { %2474 = vadd.xlane.f32.xlu0 %v2473_v16 }
 0xf22   :  { %v2457_v4 = vpop.f32.mrf.mxu1 }
 0xf23   :  { %v2458_v31 = vadd.f32 %v3194_v39, %v2457_v4 }
 0xf25   :  { %v2466_v12 = vadd.f32 %v2458_v31, %v4235_v54 }
 0xf27   :  { %v2476_v18 = vsel %vm198_vm0, %v2466_v12, 0.0 }
 0xf28   :  { %2477 = vadd.xlane.f32.xlu2 %v2476_v18 }
 0xf4d   :  { %v2460_v43 = vpop.f32.mrf.mxu1 }
 0xf4e   :  { %v2461_v5 = vadd.f32 %v3194_v39, %v2460_v43 }
 0xf50   :  { %v2467_v26 = vadd.f32 %v2461_v5, %v4242_v56 }
 0xf52   :  { %v2479_v63 = vsel %vm198_vm0, %v2467_v26, 0.0 }
 0xf53   :  { %2480 = vadd.xlane.f32.xlu1 %v2479_v63 }
 0xf55   :  { %v2462_v0 = vpop.f32.mrf.mxu1 }
 0xf56   :  { %v2463_v38 = vadd.f32 %v3194_v39, %v2462_v0 }
 0xf58   :  { %v2468_v22 = vadd.f32 %v2463_v38, %v4244_v59 }
 0xf5a   :  { %v2482_v11 = vsel %vm198_vm0, %v2468_v22, 0.0 }
 0xf5b   :  { %2483 = vadd.xlane.f32.xlu2 %v2482_v11 }
 0xf93   :  { %v2475_v51 = vpop.xlane.xlu0 %2474 }
 0xf94   :  { %v2485_v54 = vmul.f32 %v2475_v51, %v3773_v10 }
 0xf96   :  { %v2489_v52 = vsub.f32 %v2465_v50, %v2485_v54 }
 0xf98   :  { %v2493_v21 = vmul.f32 %v2489_v52, %v2489_v52 }
 0xf9a   :  { %v2497_v35 = vsel %vm198_vm0, %v2493_v21, 0.0 }
 0xf9b   :  { %2498 = vadd.xlane.f32.xlu0 %v2497_v35  ;;  %v2478_v37 = vpop.xlane.xlu2 %2477 }
 0xf9c   :  { %v2486_v56 = vmul.f32 %v2478_v37, %v3773_v10 }
 0xf9e   :  { %v2490_v30 = vsub.f32 %v2466_v12, %v2486_v56 }
 0xfa0   :  { %v2494_v44 = vmul.f32 %v2490_v30, %v2490_v30 }
 0xfa2   :  { %v2500_v49 = vsel %vm198_vm0, %v2494_v44, 0.0 }
 0xfa3   :  { %2501 = vadd.xlane.f32.xlu1 %v2500_v49 }
 0xfc6   :  { %v2481_v59 = vpop.xlane.xlu1 %2480 }
 0xfc7   :  { %v2487_v47 = vmul.f32 %v2481_v59, %v3773_v10 }
 0xfc9   :  { %v4576_v41 = vsub.f32 %v2467_v26, %v2487_v47 }
 0xfcb   :  { %v2495_v6 = vmul.f32 %v4576_v41, %v4576_v41 }
 0xfcd   :  { %v2503_v62 = vsel %vm198_vm0, %v2495_v6, 0.0 }
 0xfce   :  { %v2484_v19 = vpop.xlane.xlu2 %2483  ;;  %2504 = vadd.xlane.f32.xlu2 %v2503_v62 }
 0xfcf   :  { %v2488_v9 = vmul.f32 %v2484_v19, %v3773_v10 }
 0xfd1   :  { %v4582_v20 = vsub.f32 %v2468_v22, %v2488_v9  ;;  %v3013_v9 = vld [vmem:[#allocation15 + $0x18] sm:$0xff] }
 0xfd2   :  { %2664 = vmatpush.bf16.msrb.mxu2 %v3013_v9 }
 0xfd3   :  { %v2496_v13 = vmul.f32 %v4582_v20, %v4582_v20 }
 0xfd5   :  { %v2506_v61 = vsel %vm198_vm0, %v2496_v13, 0.0  ;;  %v3012_v13 = vld [vmem:[#allocation15 + $0x10] sm:$0xff] }
 0xfd6   :  { %2507 = vadd.xlane.f32.xlu0 %v2506_v61  ;;  %2665 = vmatpush.bf16.msrb.mxu2 %v3012_v13 }
0x100e   :  { %v2499_v15 = vpop.xlane.xlu0 %2498 }
0x100f   :  { %v2509_v17 = vmul.f32 %v2499_v15, %v3773_v10 }
0x1011   :  { %v2513_v8 = vadd.f32 1e-05, %v2509_v17 }
0x1013   :  { %3355 = vrsqrt.f32 %v2513_v8  ;;  %vm2523_vm10 = vweird.f32 %v2513_v8 }
0x1016   :  { %v2502_v1 = vpop.xlane.xlu1 %2501 }
0x1017   :  { %v2510_v45 = vmul.f32 %v2502_v1, %v3773_v10 }
0x1019   :  { %v3356_v27 = vpop.eup %3355  ;;  %v2514_v60 = vadd.f32 1e-05, %v2510_v45 }
0x101a   :  { %v2518_v29 = vmul.f32 %v3356_v27, %v2513_v8  ;;  %vm2524_vm8 = vweird.f32 %v3356_v27 }
0x101b   :  { %3357 = vrsqrt.f32 %v2514_v60  ;;  %vm2525_vm3 = vmor %vm2523_vm10, %vm2524_vm8  ;;  %vm2533_vm5 = vweird.f32 %v2514_v60 }
0x101c   :  { %v2519_v58 = vmul.f32 %v3356_v27, %v2518_v29 }
0x101e   :  { %v2520_v48 = vmul.f32 0.5, %v2519_v58 }
0x1020   :  { %v2521_v40 = vsub.f32 1.5, %v2520_v48 }
0x1021   :  { %v3358_v32 = vpop.eup %3357 }
0x1022   :  { %v2522_v2 = vmul.f32 %v3356_v27, %v2521_v40  ;;  %v2528_v42 = vmul.f32 %v3358_v32, %v2514_v60  ;;  %vm2534_vm4 = vweird.f32 %v3358_v32  ;;  %v3198_v40 = vld [vmem:[%s4669_s13 + $0x1] ss:$0 sm:$0xff] }
0x1023   :  { %vm2535_vm6 = vmor %vm2533_vm5, %vm2534_vm4 }
0x1024   :  { %v2529_v23 = vmul.f32 %v3358_v32, %v2528_v42  ;;  %v2526_v25 = vsel %vm2525_vm3, %v3356_v27, %v2522_v2 }
0x1025   :  { %v2557_v14 = vmul.f32 %v2526_v25, %v2489_v52 }
0x1026   :  { %v2530_v55 = vmul.f32 0.5, %v2529_v23 }
0x1027   :  { %v2564_v36 = vmul.f32 %v3195_v24, %v2557_v14 }
0x1028   :  { %v2531_v28 = vsub.f32 1.5, %v2530_v55 }
0x1029   :  { %v4595_v3 = vadd.f32 %v3196_v34, %v2564_v36 }
0x102a   :  { %v2532_v46 = vmul.f32 %v3358_v32, %v2531_v28 }
0x102c   :  { %v2536_v7 = vsel %vm2535_vm6, %v3358_v32, %v2532_v46 }
0x102d   :  { %v2558_v39 = vmul.f32 %v2536_v7, %v2490_v30 }
0x102f   :  { %v2565_v53 = vmul.f32 %v3195_v24, %v2558_v39 }
0x1031   :  { %v4597_v50 = vadd.f32 %v3196_v34, %v2565_v53 }
0x1033   :  { %v2575_v16 = vpack.c.bf16 %v4597_v50, %v4595_v3 }
0x1035   :  { %2984 = vmatmul.msk.bf16.vlgmr.msrb.gmra.mxu3 %vm198_vm0, %v2575_v16 }
0x1041   :  { %v2505_v4 = vpop.xlane.xlu2 %2504 }
0x1042   :  { %v2511_v31 = vmul.f32 %v2505_v4, %v3773_v10 }
0x1044   :  { %v2515_v12 = vadd.f32 1e-05, %v2511_v31 }
0x1046   :  { %3359 = vrsqrt.f32 %v2515_v12  ;;  %vm2543_vm9 = vweird.f32 %v2515_v12 }
0x1049   :  { %v2508_v18 = vpop.xlane.xlu0 %2507 }
0x104a   :  { %v2512_v43 = vmul.f32 %v2508_v18, %v3773_v10 }
0x104c   :  { %v3360_v5 = vpop.eup %3359  ;;  %v2516_v26 = vadd.f32 1e-05, %v2512_v43 }
0x104d   :  { %v2538_v63 = vmul.f32 %v3360_v5, %v2515_v12  ;;  %vm2544_vm7 = vweird.f32 %v3360_v5 }
0x104e   :  { %3361 = vrsqrt.f32 %v2516_v26  ;;  %vm2545_vm11 = vmor %vm2543_vm9, %vm2544_vm7  ;;  %vm2553_vm13 = vweird.f32 %v2516_v26 }
0x104f   :  { %v2539_v0 = vmul.f32 %v3360_v5, %v2538_v63 }
0x1051   :  { %v2540_v38 = vmul.f32 0.5, %v2539_v0 }
0x1053   :  { %v2541_v22 = vsub.f32 1.5, %v2540_v38 }
0x1054   :  { %v3362_v11 = vpop.eup %3361 }
0x1055   :  { %v2542_v51 = vmul.f32 %v3360_v5, %v2541_v22  ;;  %v2548_v54 = vmul.f32 %v3362_v11, %v2516_v26  ;;  %vm2554_vm12 = vweird.f32 %v3362_v11 }
0x1056   :  { %vm2555_vm14 = vmor %vm2553_vm13, %vm2554_vm12 }
0x1057   :  { %v2549_v52 = vmul.f32 %v3362_v11, %v2548_v54  ;;  %v2546_v21 = vsel %vm2545_vm11, %v3360_v5, %v2542_v51 }
0x1058   :  { %v2559_v56 = vmul.f32 %v2546_v21, %v4576_v41  ;;  %v3197_v41 = vld [vmem:[%s4667_s11 + $0x1] ss:$0 sm:$0xff] }
0x1059   :  { %v2550_v35 = vmul.f32 0.5, %v2549_v52 }
0x105a   :  { %v2566_v59 = vmul.f32 %v3195_v24, %v2559_v56 }
0x105b   :  { %v2551_v37 = vsub.f32 1.5, %v2550_v35 }
0x105c   :  { %v2573_v6 = vadd.f32 %v3196_v34, %v2566_v59 }
0x105d   :  { %v2552_v30 = vmul.f32 %v3362_v11, %v2551_v37 }
0x105f   :  { %v2556_v44 = vsel %vm2555_vm14, %v3362_v11, %v2552_v30 }
0x1060   :  { %v2560_v49 = vmul.f32 %v2556_v44, %v4582_v20 }
0x1062   :  { %v2567_v47 = vmul.f32 %v3195_v24, %v2560_v49 }
0x1064   :  { %v2574_v62 = vadd.f32 %v3196_v34, %v2567_v47 }
0x1066   :  { %v2576_v19 = vpack.c.bf16 %v2574_v62, %v2573_v6 }
0x1068   :  { %2985 = vmatmul.msk.bf16.gmra.mxu3 %vm198_vm0, %v2576_v19 }
0x10b8   :  { %v2614_v61 = vpop.f32.mrf.mxu3 }
0x10b9   :  { %v2615_v33 = vadd.f32 %v3197_v41, %v2614_v61 }
0x10bb   :  { %v2624_v20 = vmax.f32 %v2615_v33, 0.0 }
0x10c0   :  { %v2616_v15 = vpop.f32.mrf.mxu3 }
0x10c1   :  { %v2617_v17 = vadd.f32 %v3197_v41, %v2616_v15  ;;  %v3199_v15 = vld [vmem:[#allocation16 + $0x1] ss:$0 sm:$0xff] }
0x10c3   :  { %v2625_v8 = vmax.f32 %v2617_v17, 0.0 }
0x10c5   :  { %v2628_v57 = vpack.c.bf16 %v2625_v8, %v2624_v20  ;;  %v3200_v8 = vld [vmem:[%s4671_s15 + $0x1] ss:$0 sm:$0xff]  ;;  %s3641_s15 = smov [#allocation18]  }
0x10c6   :  { %s2795_s22 = sshll.u32 %s3641_s15, 4  ;;  %s2796_s22 = int_to_ptr.vmem [resolvable:$true] %s2795_s22 }
0x10c7   :  { %2995 = vmatmul.msk.bf16.vlgmr.msrb.gmra.mxu2 %vm198_vm0, %v2628_v57 }
0x10eb   :  { %v2619_v1 = vpop.f32.mrf.mxu3 }
0x10ec   :  { %v2620_v45 = vadd.f32 %v3197_v41, %v2619_v1 }
0x10ee   :  { %v2626_v29 = vmax.f32 %v2620_v45, 0.0 }
0x10f3   :  { %v2621_v27 = vpop.f32.mrf.mxu3 }
0x10f4   :  { %v2622_v60 = vadd.f32 %v3197_v41, %v2621_v27 }
0x10f6   :  { %v2627_v58 = vmax.f32 %v2622_v60, 0.0 }
0x10f8   :  { %v2629_v48 = vpack.c.bf16 %v2627_v58, %v2626_v29 }
0x10fa   :  { %2996 = vmatmul.msk.bf16.gmra.mxu2 %vm198_vm0, %v2629_v48 }
0x114a   :  { %v2667_v32 = vpop.f32.mrf.mxu2 }
0x114b   :  { %v2668_v2 = vadd.f32 %v3198_v40, %v2667_v32 }
0x114d   :  { %v2677_v42 = vadd.f32 %v2668_v2, %v4595_v3 }
0x114f   :  { %v2685_v23 = vsel %vm198_vm0, %v2677_v42, 0.0 }
0x1150   :  { %2686 = vadd.xlane.f32.xlu1 %v2685_v23 }
0x1152   :  { %v2669_v25 = vpop.f32.mrf.mxu2 }
0x1153   :  { %v2670_v55 = vadd.f32 %v3198_v40, %v2669_v25 }
0x1155   :  { %v2678_v28 = vadd.f32 %v2670_v55, %v4597_v50 }
0x1157   :  { %v2688_v24 = vsel %vm198_vm0, %v2678_v28, 0.0 }
0x1158   :  { %2689 = vadd.xlane.f32.xlu2 %v2688_v24 }
0x117d   :  { %v2672_v14 = vpop.f32.mrf.mxu2 }
0x117e   :  { %v2673_v46 = vadd.f32 %v3198_v40, %v2672_v14 }
0x1180   :  { %v2679_v7 = vadd.f32 %v2673_v46, %v2573_v6 }
0x1182   :  { %v2691_v34 = vsel %vm198_vm0, %v2679_v7, 0.0 }
0x1183   :  { %2692 = vadd.xlane.f32.xlu0 %v2691_v34 }
0x1185   :  { %v2674_v36 = vpop.f32.mrf.mxu2 }
0x1186   :  { %v2675_v39 = vadd.f32 %v3198_v40, %v2674_v36 }
0x1188   :  { %v2680_v53 = vadd.f32 %v2675_v39, %v2574_v62 }
0x118a   :  { %v2694_v3 = vsel %vm198_vm0, %v2680_v53, 0.0 }
0x118b   :  { %2695 = vadd.xlane.f32.xlu1 %v2694_v3 }
0x11c3   :  { %v2687_v16 = vpop.xlane.xlu1 %2686 }
0x11c4   :  { %v2697_v4 = vmul.f32 %v2687_v16, %v3773_v10 }
0x11c6   :  { %v2701_v31 = vsub.f32 %v2677_v42, %v2697_v4 }
0x11c8   :  { %v2705_v50 = vmul.f32 %v2701_v31, %v2701_v31 }
0x11ca   :  { %v2709_v12 = vsel %vm198_vm0, %v2705_v50, 0.0 }
0x11cb   :  { %v2690_v18 = vpop.xlane.xlu2 %2689  ;;  %2710 = vadd.xlane.f32.xlu2 %v2709_v12 }
0x11cc   :  { %v2698_v43 = vmul.f32 %v2690_v18, %v3773_v10 }
0x11ce   :  { %v2702_v5 = vsub.f32 %v2678_v28, %v2698_v43 }
0x11d0   :  { %v2706_v26 = vmul.f32 %v2702_v5, %v2702_v5 }
0x11d2   :  { %v2712_v63 = vsel %vm198_vm0, %v2706_v26, 0.0 }
0x11d3   :  { %2713 = vadd.xlane.f32.xlu0 %v2712_v63 }
0x11f6   :  { %v2693_v0 = vpop.xlane.xlu0 %2692 }
0x11f7   :  { %v2699_v38 = vmul.f32 %v2693_v0, %v3773_v10 }
0x11f9   :  { %v4626_v22 = vsub.f32 %v2679_v7, %v2699_v38 }
0x11fb   :  { %v2707_v11 = vmul.f32 %v4626_v22, %v4626_v22 }
0x11fd   :  { %v2715_v51 = vsel %vm198_vm0, %v2707_v11, 0.0 }
0x11fe   :  { %2716 = vadd.xlane.f32.xlu1 %v2715_v51  ;;  %v2696_v54 = vpop.xlane.xlu1 %2695 }
0x11ff   :  { %v2700_v52 = vmul.f32 %v2696_v54, %v3773_v10 }
0x1201   :  { %v4632_v21 = vsub.f32 %v2680_v53, %v2700_v52 }
0x1203   :  { %v2708_v35 = vmul.f32 %v4632_v21, %v4632_v21 }
0x1205   :  { %v2718_v37 = vsel %vm198_vm0, %v2708_v35, 0.0 }
0x1206   :  { %2719 = vadd.xlane.f32.xlu2 %v2718_v37 }
0x123e   :  { %v2711_v56 = vpop.xlane.xlu2 %2710 }
0x123f   :  { %v2721_v30 = vmul.f32 %v2711_v56, %v3773_v10 }
0x1241   :  { %v2725_v44 = vadd.f32 1e-05, %v2721_v30 }
0x1243   :  { %3363 = vrsqrt.f32 %v2725_v44  ;;  %vm2735_vm1 = vweird.f32 %v2725_v44 }
0x1246   :  { %v2714_v49 = vpop.xlane.xlu0 %2713 }
0x1247   :  { %v2722_v59 = vmul.f32 %v2714_v49, %v3773_v10 }
0x1249   :  { %v3364_v47 = vpop.eup %3363  ;;  %v2726_v6 = vadd.f32 1e-05, %v2722_v59 }
0x124a   :  { %v2730_v62 = vmul.f32 %v3364_v47, %v2725_v44  ;;  %vm2736_vm15 = vweird.f32 %v3364_v47 }
0x124b   :  { %3365 = vrsqrt.f32 %v2726_v6  ;;  %vm2737_vm2 = vmor %vm2735_vm1, %vm2736_vm15  ;;  %vm2745_vm10 = vweird.f32 %v2726_v6 }
0x124c   :  { %v2731_v19 = vmul.f32 %v3364_v47, %v2730_v62 }
0x124e   :  { %v2732_v9 = vmul.f32 0.5, %v2731_v19 }
0x1250   :  { %v2733_v13 = vsub.f32 1.5, %v2732_v9 }
0x1251   :  { %v3366_v61 = vpop.eup %3365 }
0x1252   :  { %v2734_v41 = vmul.f32 %v3364_v47, %v2733_v13  ;;  %v2740_v33 = vmul.f32 %v3366_v61, %v2726_v6  ;;  %vm2746_vm8 = vweird.f32 %v3366_v61 }
0x1253   :  { %vm2747_vm3 = vmor %vm2745_vm10, %vm2746_vm8 }
0x1254   :  { %v2738_v17 = vsel %vm2737_vm2, %v3364_v47, %v2734_v41  ;;  %v2741_v20 = vmul.f32 %v3366_v61, %v2740_v33 }
0x1255   :  { %v2769_v57 = vmul.f32 %v2738_v17, %v2701_v31 }
0x1256   :  { %v2742_v1 = vmul.f32 0.5, %v2741_v20 }
0x1257   :  { %v2776_v45 = vmul.f32 %v3199_v15, %v2769_v57 }
0x1258   :  { %v2743_v27 = vsub.f32 1.5, %v2742_v1 }
0x1259   :  { %v2783_v60 = vadd.f32 %v3200_v8, %v2776_v45 }
0x125a   :  { %v2744_v29 = vmul.f32 %v3366_v61, %v2743_v27 }
0x125b   :  { %2787 = vst.msk [vmem:[#allocation18] sm:$0xff] %vm198_vm0, %v2783_v60 }
0x125c   :  { %v2748_v58 = vsel %vm2747_vm3, %v3366_v61, %v2744_v29 }
0x125d   :  { %v2770_v48 = vmul.f32 %v2748_v58, %v2702_v5 }
0x125f   :  { %v2777_v40 = vmul.f32 %v3199_v15, %v2770_v48 }
0x1261   :  { %v2784_v32 = vadd.f32 %v3200_v8, %v2777_v40 }
0x1263   :  { %2788 = vst.msk [vmem:[#allocation18 + $0x8] sm:$0xff] %vm198_vm0, %v2784_v32 }
0x1271   :  { %v2717_v2 = vpop.xlane.xlu1 %2716 }
0x1272   :  { %v2723_v42 = vmul.f32 %v2717_v2, %v3773_v10 }
0x1274   :  { %v2727_v23 = vadd.f32 1e-05, %v2723_v42 }
0x1276   :  { %3367 = vrsqrt.f32 %v2727_v23  ;;  %vm2755_vm5 = vweird.f32 %v2727_v23 }
0x1279   :  { %v2720_v25 = vpop.xlane.xlu2 %2719 }
0x127a   :  { %v2724_v55 = vmul.f32 %v2720_v25, %v3773_v10 }
0x127c   :  { %v3368_v28 = vpop.eup %3367  ;;  %v2728_v24 = vadd.f32 1e-05, %v2724_v55 }
0x127d   :  { %v2750_v14 = vmul.f32 %v3368_v28, %v2727_v23  ;;  %vm2756_vm4 = vweird.f32 %v3368_v28 }
0x127e   :  { %3369 = vrsqrt.f32 %v2728_v24  ;;  %vm2757_vm6 = vmor %vm2755_vm5, %vm2756_vm4  ;;  %vm2765_vm9 = vweird.f32 %v2728_v24 }
0x127f   :  { %v2751_v46 = vmul.f32 %v3368_v28, %v2750_v14 }
0x1281   :  { %v2752_v7 = vmul.f32 0.5, %v2751_v46 }
0x1283   :  { %v2753_v34 = vsub.f32 1.5, %v2752_v7 }
0x1284   :  { %v3370_v36 = vpop.eup %3369 }
0x1285   :  { %v2754_v39 = vmul.f32 %v3368_v28, %v2753_v34  ;;  %v2760_v53 = vmul.f32 %v3370_v36, %v2728_v24  ;;  %vm2766_vm7 = vweird.f32 %v3370_v36 }
0x1286   :  { %vm2767_vm11 = vmor %vm2765_vm9, %vm2766_vm7 }
0x1287   :  { %v2758_v3 = vsel %vm2757_vm6, %v3368_v28, %v2754_v39  ;;  %v2761_v16 = vmul.f32 %v3370_v36, %v2760_v53 }
0x1288   :  { %v2771_v4 = vmul.f32 %v2758_v3, %v4626_v22 }
0x1289   :  { %v2762_v31 = vmul.f32 0.5, %v2761_v16 }
0x128a   :  { %v2778_v50 = vmul.f32 %v3199_v15, %v2771_v4 }
0x128b   :  { %v2763_v10 = vsub.f32 1.5, %v2762_v31 }
0x128c   :  { %v2785_v12 = vadd.f32 %v3200_v8, %v2778_v50 }
0x128d   :  { %v2764_v18 = vmul.f32 %v3370_v36, %v2763_v10 }
0x128e   :  { %2789 = vst.msk [vmem:[#allocation18 + $0x10] sm:$0xff] %vm198_vm0, %v2785_v12 }
0x128f   :  { %v2768_v43 = vsel %vm2767_vm11, %v3370_v36, %v2764_v18 }
0x1290   :  { %v2772_v5 = vmul.f32 %v2768_v43, %v4632_v21 }
0x1292   :  { %v2779_v26 = vmul.f32 %v3199_v15, %v2772_v5 }
0x1294   :  { %v2786_v63 = vadd.f32 %v3200_v8, %v2779_v26 }
0x1296   :  { %2790 = vst.msk [vmem:[#allocation18 + $0x18] sm:$0xff] %vm198_vm0, %v2786_v63 }
0x1297   :  { %2803 = dma.vmem_to_hbm [thread:$0]  %s2796_s22, 512, %s2798_s3, [#allocation6], %s3620_s29, %s3620_s29, %s3621_s30  }
0x1298   :  { %3611 = dma.done.wait [#allocation6], 512  }
0x1299   :  { %3612 = vsyncadd [#allocation6], 4294966784 }
0x129a   :  { %2808 = vsyncpa [#allocation5], 1 }
0x129b   :  { %2809 = vsyncpa [#allocation8], 1 }
0x129c   :  { %2810 = vsyncpa [#allocation11], 1 }
0x129d   :  { %2811 = vsyncpa [#allocation14], 1 }
0x129e   :  { %2812 = vsyncpa [#allocation17], 1 }
0x129f   :  { %2813 = vsyncpa [#allocation6], 1 }

</bundles_post_ra>
